<compile_context>
chip_gen: v5e
topology: v5e:2x2
jax: 0.10.0
libtpu: 0.0.40
codegen_flags: <defaults>
</compile_context>

<pallas_src>
import math

import jax
import jax.numpy as jnp
from jax import lax
from jax.experimental import pallas as pl
from jax.experimental.pallas import tpu as pltpu

LN_EPS = 1e-5            # nn.LayerNorm default
NEG_INF = -1e30          # large finite negative for the causal mask (avoids 0/0)

# Preferred tile sizes (MXU-filling on v6e/v7x); actual tiles are clipped to
# divide the problem dims via _pick_tile().
PREF_TILE_S = 256        # token tile for projection / MLP / LM-head kernels
PREF_TILE_QK = 256       # query & key/value tile for flash attention (kept equal)
PREF_TILE_V = 512        # vocab tile for the LM head (lane-dense, multiple of 128)


def _vmem_limit_bytes():
    """~75% of physical VMEM: 48 MiB on v7x (64 MiB), 96 MiB on v5e/v6e (128 MiB)."""
    try:
        cap = int(pltpu.get_tpu_info().vmem_capacity_bytes)
    except Exception:
        cap = 64 * 1024 * 1024
    return min(100 * 1024 * 1024, (cap * 3) // 4)


VMEM_LIMIT = _vmem_limit_bytes()

# TODO(synk): at realistic E (>=768) on v7x, also mark constant-index weight
# specs single-buffered and tile the MLP over the 4E hidden dim to stay in VMEM.


def _pick_tile(dim, pref):
    """Largest multiple of 128 that divides `dim` and is <= pref (dim % 128 == 0
    assumed for dim >= 128; otherwise returns dim itself)."""
    t = min(pref, dim)
    while t > 128 and dim % t:
        t -= 128
    return t


def _layernorm(x, g, b):
    mu = jnp.mean(x, axis=-1, keepdims=True)
    var = jnp.mean((x - mu) ** 2, axis=-1, keepdims=True)
    return (x - mu) * lax.rsqrt(var + LN_EPS) * g + b


def _full_spec(arr):
    """Whole (untiled) parameter block, same block for every grid step."""
    zeros = (0,) * arr.ndim
    return pl.BlockSpec(arr.shape, lambda *_, zeros=zeros: zeros)


# ---------------------------------------------------------------------------
# Kernel 1: LayerNorm1 + fused QKV projection, head-split outputs.
# grid = (B, S // TS)
# ---------------------------------------------------------------------------
def ln_qkv_kernel(x_ref, g_ref, b_ref, wqkv_ref, q_ref, k_ref, v_ref):
    x = x_ref[0]                                       # (TS, E) f32
    E = x.shape[-1]
    H = q_ref.shape[1]
    dk = q_ref.shape[3]
    h = _layernorm(x, g_ref[0], b_ref[0])              # f32 LayerNorm math
    qkv = jnp.dot(h.astype(jnp.bfloat16), wqkv_ref[...],
                  preferred_element_type=jnp.float32)  # one (TS,E)@(E,3E) matmul
    qkv = qkv.astype(jnp.bfloat16)
    # Per-head, lane-aligned slice stores -> head-split layout without any XLA
    # transpose through HBM.
    for hh in range(H):
        q_ref[0, hh] = qkv[:, 0 * E + hh * dk:0 * E + (hh + 1) * dk]
        k_ref[0, hh] = qkv[:, 1 * E + hh * dk:1 * E + (hh + 1) * dk]
        v_ref[0, hh] = qkv[:, 2 * E + hh * dk:2 * E + (hh + 1) * dk]


# ---------------------------------------------------------------------------
# Kernel 2: causal flash attention (heads batched), merged-layout output.
# grid = (B, S // TQ, S // TK); KV axis is the innermost (arbitrary) axis.
# KV tiles above the diagonal are never DMA'd (index_map clamp) nor computed.
# ---------------------------------------------------------------------------
def flash_attn_kernel(q_ref, k_ref, v_ref, o_ref, m_sc, l_sc, acc_sc):
    qi = pl.program_id(1)
    ki = pl.program_id(2)
    H = q_ref.shape[1]
    tq = q_ref.shape[2]
    tk = k_ref.shape[2]
    dk = q_ref.shape[3]
    sm_scale = 1.0 / math.sqrt(dk)

    @pl.when(ki == 0)
    def _():
        m_sc[...] = jnp.full_like(m_sc, -jnp.inf)
        l_sc[...] = jnp.zeros_like(l_sc)
        acc_sc[...] = jnp.zeros_like(acc_sc)

    def online_softmax_step(apply_mask):
        q = q_ref[0]              # (H, TQ, dk) bf16
        k = k_ref[0]              # (H, TK, dk) bf16
        v = v_ref[0]              # (H, TK, dk) bf16
        s = jnp.einsum("hqd,hkd->hqk", q, k,
                       preferred_element_type=jnp.float32) * sm_scale
        if apply_mask:
            # Only reached on the diagonal tile (ki == qi, tq == tk), so the
            # mask is tile-local: col > row.
            r = lax.broadcasted_iota(jnp.int32, (tq, tk), 0)
            c = lax.broadcasted_iota(jnp.int32, (tq, tk), 1)
            s = s + jnp.where(c > r, NEG_INF, 0.0)[None, :, :]
        m_prev = m_sc[...]
        m_new = jnp.maximum(m_prev, s.max(axis=-1, keepdims=True))
        alpha = jnp.exp(m_prev - m_new)
        p = jnp.exp(s - m_new)
        l_sc[...] = alpha * l_sc[...] + p.sum(axis=-1, keepdims=True)
        acc_sc[...] = alpha * acc_sc[...] + jnp.einsum(
            "hqk,hkd->hqd", p.astype(v.dtype), v,
            preferred_element_type=jnp.float32)
        m_sc[...] = m_new

    @pl.when(ki < qi)             # strictly-below-diagonal tiles: no mask work
    def _():
        online_softmax_step(apply_mask=False)

    @pl.when(ki == qi)            # diagonal tile: apply the causal mask
    def _():
        online_softmax_step(apply_mask=True)

    @pl.when(ki == pl.num_programs(2) - 1)
    def _():
        out = (acc_sc[...] *
               pl.reciprocal(l_sc[...], approx=True)).astype(o_ref.dtype)
        # Merge heads via lane-aligned slice writes (no XLA transpose).
        for hh in range(H):
            o_ref[0, :, hh * dk:(hh + 1) * dk] = out[hh]
    # TODO(synk): attention-weight dropout omitted (eval-mode identity)


# ---------------------------------------------------------------------------
# Kernel 3: attention output projection + residual + LN2 + MLP + residual.
# grid = (B, S // TS)
# ---------------------------------------------------------------------------
def attn_proj_mlp_kernel(x_ref, a_ref, wo_ref, wob_ref, g2_ref, b2_ref,
                         w1_ref, b1_ref, w2_ref, b2b_ref, out_ref):
    x = x_ref[0]                                       # (TS, E) f32 residual stream
    a = a_ref[0]                                       # (TS, E) bf16, heads merged
    attn = jnp.dot(a, wo_ref[...],
                   preferred_element_type=jnp.float32) + wob_ref[0]
    # TODO(synk): post-attention dropout omitted (eval-mode identity)
    x = x + attn

    h = _layernorm(x, g2_ref[0], b2_ref[0])
    f = jnp.dot(h.astype(jnp.bfloat16), w1_ref[...],
                preferred_element_type=jnp.float32) + b1_ref[0]
    f = jax.nn.gelu(f, approximate=False)              # exact erf GELU == nn.GELU()
    f = jnp.dot(f.astype(jnp.bfloat16), w2_ref[...],
                preferred_element_type=jnp.float32) + b2b_ref[0]
    # TODO(synk): post-MLP dropout omitted (eval-mode identity)
    out_ref[0] = x + f


# ---------------------------------------------------------------------------
# Kernel 4: final LayerNorm + LM head, tiled over the vocab dimension.
# grid = (B, S // TS, V // TV); LN is computed once per token tile (vi == 0)
# and cached in VMEM scratch, reused for every vocab tile.
# ---------------------------------------------------------------------------
def lm_head_kernel(x_ref, g_ref, b_ref, w_ref, o_ref, h_sc):
    @pl.when(pl.program_id(2) == 0)
    def _():
        h_sc[...] = _layernorm(x_ref[0], g_ref[0], b_ref[0]).astype(jnp.bfloat16)
    o_ref[0] = jnp.dot(h_sc[...], w_ref[...],
                       preferred_element_type=jnp.float32)


# ---------------------------------------------------------------------------
# pallas_call wrappers
# ---------------------------------------------------------------------------
def run_ln_qkv(x, g, b, wqkv, n_heads):
    B, S, E = x.shape
    dk = E // n_heads
    ts = _pick_tile(S, PREF_TILE_S)
    x_spec = pl.BlockSpec((1, ts, E), lambda bi, si: (bi, si, 0))
    qkv_spec = pl.BlockSpec((1, n_heads, ts, dk), lambda bi, si: (bi, 0, si, 0))
    out_sd = jax.ShapeDtypeStruct((B, n_heads, S, dk), jnp.bfloat16)
    return pl.pallas_call(
        ln_qkv_kernel,
        out_shape=(out_sd, out_sd, out_sd),
        grid=(B, S // ts),
        in_specs=[x_spec, _full_spec(g), _full_spec(b), _full_spec(wqkv)],
        out_specs=(qkv_spec, qkv_spec, qkv_spec),
        compiler_params=pltpu.CompilerParams(
            dimension_semantics=("parallel", "parallel"),
            vmem_limit_bytes=VMEM_LIMIT),
    )(x, g, b, wqkv)


def run_flash_attention(q, k, v):
    B, H, S, dk = q.shape
    E = H * dk
    t = _pick_tile(S, PREF_TILE_QK)          # TQ == TK (diagonal-tile mask assumes it)
    q_spec = pl.BlockSpec((1, H, t, dk), lambda b, qi, ki: (b, 0, qi, 0))
    # Clamp the KV block index: tiles above the causal diagonal map to the same
    # block as the diagonal step, so Pallas skips their DMA entirely.  The
    # ki < qi / ki == qi compute guards in the kernel MUST stay.
    kv_spec = pl.BlockSpec((1, H, t, dk),
                           lambda b, qi, ki: (b, 0, jnp.minimum(ki, qi), 0))
    o_spec = pl.BlockSpec((1, t, E), lambda b, qi, ki: (b, qi, 0))
    return pl.pallas_call(
        flash_attn_kernel,
        out_shape=jax.ShapeDtypeStruct((B, S, E), jnp.bfloat16),
        grid=(B, S // t, S // t),
        in_specs=[q_spec, kv_spec, kv_spec],
        out_specs=o_spec,
        scratch_shapes=[pltpu.VMEM((H, t, 1), jnp.float32),
                        pltpu.VMEM((H, t, 1), jnp.float32),
                        pltpu.VMEM((H, t, dk), jnp.float32)],
        compiler_params=pltpu.CompilerParams(
            dimension_semantics=("parallel", "parallel", "arbitrary"),
            vmem_limit_bytes=VMEM_LIMIT),
    )(q, k, v)


def run_attn_proj_mlp(x, attn, layer):
    B, S, E = x.shape
    ts = _pick_tile(S, PREF_TILE_S)
    act = pl.BlockSpec((1, ts, E), lambda bi, si: (bi, si, 0))
    weights = (layer["wo"], layer["wo_b"], layer["ln2_g"], layer["ln2_b"],
               layer["w1"], layer["b1"], layer["w2"], layer["b2"])
    return pl.pallas_call(
        attn_proj_mlp_kernel,
        out_shape=jax.ShapeDtypeStruct((B, S, E), jnp.float32),
        grid=(B, S // ts),
        in_specs=[act, act] + [_full_spec(w) for w in weights],
        out_specs=act,
        compiler_params=pltpu.CompilerParams(
            dimension_semantics=("parallel", "parallel"),
            vmem_limit_bytes=VMEM_LIMIT),
    )(x, attn, *weights)


def run_lm_head(x, g, b, w_out):
    B, S, E = x.shape
    V = w_out.shape[1]
    ts = _pick_tile(S, PREF_TILE_S)
    tv = _pick_tile(V, PREF_TILE_V)
    x_spec = pl.BlockSpec((1, ts, E), lambda bi, si, vi: (bi, si, 0))
    w_spec = pl.BlockSpec((E, tv), lambda bi, si, vi: (0, vi))
    o_spec = pl.BlockSpec((1, ts, tv), lambda bi, si, vi: (bi, si, vi))
    return pl.pallas_call(
        lm_head_kernel,
        out_shape=jax.ShapeDtypeStruct((B, S, V), jnp.float32),
        grid=(B, S // ts, V // tv),
        in_specs=[x_spec, _full_spec(g), _full_spec(b), w_spec],
        out_specs=o_spec,
        scratch_shapes=[pltpu.VMEM((ts, E), jnp.bfloat16)],
        compiler_params=pltpu.CompilerParams(
            # vocab axis must stay innermost & sequential (LN scratch reuse)
            dimension_semantics=("parallel", "parallel", "arbitrary"),
            vmem_limit_bytes=VMEM_LIMIT),
    )(x, g, b, w_out)


# ---------------------------------------------------------------------------
# Model glue (no head split/merge transposes anymore — kernels handle layout)
# ---------------------------------------------------------------------------
def my_gpt_forward(in_idx, params, cfg):
    B, S = in_idx.shape
    n_heads = cfg["n_heads"]
    tok = params["tok_emb"][in_idx]                    # embedding gather in plain JAX
    pos = params["pos_emb"][:S]
    x = (tok + pos[None, :, :]).astype(jnp.float32)
    # TODO(synk): drop_emb dropout omitted (eval-mode identity; stochastic op)
    for layer in params["layers"]:
        q, k, v = run_ln_qkv(x, layer["ln1_g"], layer["ln1_b"],
                             layer["wqkv"], n_heads)
        attn = run_flash_attention(q, k, v)            # already merged (B, S, E)
        x = run_attn_proj_mlp(x, attn, layer)
    return run_lm_head(x, params["final_g"], params["final_b"], params["w_out"])


# ---------------------------------------------------------------------------
# Deterministic parameter construction (weights bf16, LN/bias f32)
# ---------------------------------------------------------------------------
def make_params(key, cfg):
    V, E = cfg["vocab_size"], cfg["emb_dim"]
    L, ML = cfg["n_layers"], cfg["max_length"]
    H4 = 4 * E
    keys = iter(jax.random.split(key, 8 + 8 * L))      # over-allocate

    def nrm(shape, dtype=jnp.bfloat16):
        return (0.02 * jax.random.normal(next(keys), shape, jnp.float32)).astype(dtype)

    layers = []
    for _ in range(L):
        layers.append(dict(
            ln1_g=jnp.ones((1, E), jnp.float32),
            ln1_b=jnp.zeros((1, E), jnp.float32),
            wqkv=nrm((E, 3 * E)),                      # fused [Wq | Wk | Wv], (in, out)
            wo=nrm((E, E)),
            wo_b=nrm((1, E), jnp.float32),
            ln2_g=jnp.ones((1, E), jnp.float32),
            ln2_b=jnp.zeros((1, E), jnp.float32),
            w1=nrm((E, H4)),
            b1=nrm((1, H4), jnp.float32),
            w2=nrm((H4, E)),
            b2=nrm((1, E), jnp.float32),
        ))

    return dict(
        tok_emb=nrm((V, E), jnp.float32),
        pos_emb=nrm((ML, E), jnp.float32),
        layers=layers,
        final_g=jnp.ones((1, E), jnp.float32),
        final_b=jnp.zeros((1, E), jnp.float32),
        w_out=nrm((E, V)),                             # (in, out) = out_head.weight.T
    )


# ---------------------------------------------------------------------------
# Pure-JAX reference (same bf16 matmul operands, f32 accumulation)
# ---------------------------------------------------------------------------
def split_heads(t, n_heads):
    B, S, E = t.shape
    return t.reshape(B, S, n_heads, E // n_heads).transpose(0, 2, 1, 3)


def merge_heads(t):
    B, H, S, dk = t.shape
    return t.transpose(0, 2, 1, 3).reshape(B, S, H * dk)


def reference_forward(in_idx, params, cfg):
    n_heads = cfg["n_heads"]
    B, S = in_idx.shape
    x = (params["tok_emb"][in_idx] + params["pos_emb"][:S][None]).astype(jnp.float32)
    bias = jnp.where(jnp.triu(jnp.ones((S, S), bool), k=1), NEG_INF, 0.0)
    for layer in params["layers"]:
        E = x.shape[-1]
        dk = E // n_heads
        h = _layernorm(x, layer["ln1_g"][0], layer["ln1_b"][0])
        qkv = jnp.dot(h.astype(jnp.bfloat16), layer["wqkv"],
                      preferred_element_type=jnp.float32)
        q = split_heads(qkv[..., 0:E].astype(jnp.bfloat16), n_heads)
        k = split_heads(qkv[..., E:2 * E].astype(jnp.bfloat16), n_heads)
        v = split_heads(qkv[..., 2 * E:].astype(jnp.bfloat16), n_heads)
        s = jnp.einsum("bhqd,bhkd->bhqk", q, k,
                       preferred_element_type=jnp.float32) * (1.0 / math.sqrt(dk))
        s = s + bias[None, None]
        p = jax.nn.softmax(s, axis=-1)
        a = jnp.einsum("bhqk,bhkd->bhqd", p.astype(jnp.bfloat16), v,
                       preferred_element_type=jnp.float32)
        a = merge_heads(a.astype(jnp.bfloat16))
        x = x + (jnp.dot(a, layer["wo"], preferred_element_type=jnp.float32)
                 + layer["wo_b"][0])
        h2 = _layernorm(x, layer["ln2_g"][0], layer["ln2_b"][0])
        f = jnp.dot(h2.astype(jnp.bfloat16), layer["w1"],
                    preferred_element_type=jnp.float32) + layer["b1"][0]
        f = jax.nn.gelu(f, approximate=False)
        f = jnp.dot(f.astype(jnp.bfloat16), layer["w2"],
                    preferred_element_type=jnp.float32) + layer["b2"][0]
        x = x + f
    h = _layernorm(x, params["final_g"][0], params["final_b"][0])
    return jnp.dot(h.astype(jnp.bfloat16), params["w_out"],
                   preferred_element_type=jnp.float32)


if __name__ == "__main__":
    # Small but lane-dense config: E=256, dk=128, V=256 (all tiles multiples of 128).
    cfg = dict(vocab_size=256, emb_dim=256, n_heads=2, n_layers=2,
               max_length=256, drop_rate=0.1, qkv_bias=False)
    B, S = 2, 256

    key = jax.random.PRNGKey(0)
    pkey, ikey = jax.random.split(key)
    params = make_params(pkey, cfg)
    in_idx = jax.random.randint(ikey, (B, S), 0, cfg["vocab_size"], dtype=jnp.int32)

    logits = my_gpt_forward(in_idx, params, cfg)
    jax.block_until_ready(logits)

    assert logits.shape == (B, S, cfg["vocab_size"])
    assert bool(jnp.isfinite(logits).all())

    ref = reference_forward(in_idx, params, cfg)
    max_err = float(jnp.max(jnp.abs(logits - ref)))
    assert max_err < 2e-2, f"kernel vs reference max |err| = {max_err}"

    print("KERNEL_OK")
</pallas_src>

<mosaic_0001>
module attributes {stable_mosaic.version = 11 : i64} {
  func.func @ln_qkv_kernel(%arg0: i32, %arg1: i32, %arg2: memref<1x256x256xf32, #tpu.memory_space<vmem>>, %arg3: memref<1x256xf32, #tpu.memory_space<vmem>>, %arg4: memref<1x256xf32, #tpu.memory_space<vmem>>, %arg5: memref<256x768xbf16, #tpu.memory_space<vmem>>, %arg6: memref<1x2x256x128xbf16, #tpu.memory_space<vmem>>, %arg7: memref<1x2x256x128xbf16, #tpu.memory_space<vmem>>, %arg8: memref<1x2x256x128xbf16, #tpu.memory_space<vmem>>) attributes {dimension_semantics = [#tpu.dimension_semantics<parallel>, #tpu.dimension_semantics<parallel>], iteration_bounds = array<i64: 2, 1>, scalar_prefetch = 0 : i64, scratch_operands = 0 : i64, tpu.core_type = #tpu.core_type<tc>, window_params = [{transform_indices = @transform_0, window_bounds = array<i64: 1, 256, 256>}, {pipeline_mode = #tpu.pipeline_mode<synchronous>, transform_indices = @transform_1, window_bounds = array<i64: 1, 256>}, {pipeline_mode = #tpu.pipeline_mode<synchronous>, transform_indices = @transform_2, window_bounds = array<i64: 1, 256>}, {pipeline_mode = #tpu.pipeline_mode<synchronous>, transform_indices = @transform_3, window_bounds = array<i64: 256, 768>}, {transform_indices = @transform_4, window_bounds = array<i64: 1, 2, 256, 128>}, {transform_indices = @transform_5, window_bounds = array<i64: 1, 2, 256, 128>}, {transform_indices = @transform_6, window_bounds = array<i64: 1, 2, 256, 128>}]} {
    %c0 = arith.constant 0 : index
    %c0_0 = arith.constant 0 : index
    %c0_1 = arith.constant 0 : index
    %0 = vector.load %arg2[%c0, %c0_0, %c0_1] : memref<1x256x256xf32, #tpu.memory_space<vmem>>, vector<1x256x256xf32>
    %1 = vector.shape_cast %0 : vector<1x256x256xf32> to vector<256x256xf32>
    %c0_2 = arith.constant 0 : index
    %c0_3 = arith.constant 0 : index
    %2 = vector.load %arg3[%c0_2, %c0_3] : memref<1x256xf32, #tpu.memory_space<vmem>>, vector<1x256xf32>
    %3 = vector.shape_cast %2 : vector<1x256xf32> to vector<256xf32>
    %c0_4 = arith.constant 0 : index
    %c0_5 = arith.constant 0 : index
    %4 = vector.load %arg4[%c0_4, %c0_5] : memref<1x256xf32, #tpu.memory_space<vmem>>, vector<1x256xf32>
    %5 = vector.shape_cast %4 : vector<1x256xf32> to vector<256xf32>
    %cst = arith.constant dense<0.000000e+00> : vector<256xf32>
    %6 = vector.multi_reduction <add>, %1, %cst [1] : vector<256x256xf32> to vector<256xf32>
    %7 = vector.shape_cast %6 : vector<256xf32> to vector<256x1xf32>
    %cst_6 = arith.constant 2.560000e+02 : f32
    %8 = vector.broadcast %cst_6 : f32 to vector<256x1xf32>
    %9 = arith.divf %7, %8 : vector<256x1xf32>
    %10 = vector.broadcast %9 : vector<256x1xf32> to vector<256x256xf32>
    %11 = arith.subf %1, %10 : vector<256x256xf32>
    %12 = arith.mulf %11, %11 : vector<256x256xf32>
    %cst_7 = arith.constant dense<0.000000e+00> : vector<256xf32>
    %13 = vector.multi_reduction <add>, %12, %cst_7 [1] : vector<256x256xf32> to vector<256xf32>
    %14 = vector.shape_cast %13 : vector<256xf32> to vector<256x1xf32>
    %cst_8 = arith.constant 2.560000e+02 : f32
    %15 = vector.broadcast %cst_8 : f32 to vector<256x1xf32>
    %16 = arith.divf %14, %15 : vector<256x1xf32>
    %17 = vector.broadcast %9 : vector<256x1xf32> to vector<256x256xf32>
    %18 = arith.subf %1, %17 : vector<256x256xf32>
    %cst_9 = arith.constant 9.99999974E-6 : f32
    %19 = vector.broadcast %cst_9 : f32 to vector<256x1xf32>
    %20 = arith.addf %16, %19 : vector<256x1xf32>
    %21 = math.rsqrt %20 : vector<256x1xf32>
    %22 = vector.broadcast %21 : vector<256x1xf32> to vector<256x256xf32>
    %23 = arith.mulf %18, %22 : vector<256x256xf32>
    %24 = vector.shape_cast %3 : vector<256xf32> to vector<1x256xf32>
    %25 = vector.broadcast %24 : vector<1x256xf32> to vector<256x256xf32>
    %26 = arith.mulf %23, %25 : vector<256x256xf32>
    %27 = vector.shape_cast %5 : vector<256xf32> to vector<1x256xf32>
    %28 = vector.broadcast %27 : vector<1x256xf32> to vector<256x256xf32>
    %29 = arith.addf %26, %28 : vector<256x256xf32>
    %30 = arith.truncf %29 : vector<256x256xf32> to vector<256x256xbf16>
    %c0_10 = arith.constant 0 : index
    %c0_11 = arith.constant 0 : index
    %31 = vector.load %arg5[%c0_10, %c0_11] : memref<256x768xbf16, #tpu.memory_space<vmem>>, vector<256x768xbf16>
    %cst_12 = arith.constant dense<0.000000e+00> : vector<256x768xf32>
    %32 = tpu.matmul %30, %31, %cst_12 {dimension_numbers = #tpu.dot_dimension_numbers<[1], [0], [0], [1], [0, 0, 1, 1], [], []>} : vector<256x256xbf16>, vector<256x768xbf16>, vector<256x768xf32> -> vector<256x768xf32>
    %33 = arith.truncf %32 : vector<256x768xf32> to vector<256x768xbf16>
    %34 = vector.extract_strided_slice %33 {offsets = [0, 0], sizes = [256, 128], strides = [1, 1]} : vector<256x768xbf16> to vector<256x128xbf16>
    %c0_13 = arith.constant 0 : index
    %c0_14 = arith.constant 0 : index
    %c0_15 = arith.constant 0 : index
    %c0_16 = arith.constant 0 : index
    %35 = vector.load %arg6[%c0_13, %c0_14, %c0_15, %c0_16] : memref<1x2x256x128xbf16, #tpu.memory_space<vmem>>, vector<1x1x256x128xbf16>
    %36 = vector.shape_cast %35 : vector<1x1x256x128xbf16> to vector<256x128xbf16>
    %37 = vector.shape_cast %34 : vector<256x128xbf16> to vector<1x1x256x128xbf16>
    tpu.vector_store %arg6[%c0_13, %c0_14, %c0_15, %c0_16], %37 {strides = array<i32>} : memref<1x2x256x128xbf16, #tpu.memory_space<vmem>>, vector<1x1x256x128xbf16>,
    %38 = vector.extract_strided_slice %33 {offsets = [0, 256], sizes = [256, 128], strides = [1, 1]} : vector<256x768xbf16> to vector<256x128xbf16>
    %c0_17 = arith.constant 0 : index
    %c0_18 = arith.constant 0 : index
    %c0_19 = arith.constant 0 : index
    %c0_20 = arith.constant 0 : index
    %39 = vector.load %arg7[%c0_17, %c0_18, %c0_19, %c0_20] : memref<1x2x256x128xbf16, #tpu.memory_space<vmem>>, vector<1x1x256x128xbf16>
    %40 = vector.shape_cast %39 : vector<1x1x256x128xbf16> to vector<256x128xbf16>
    %41 = vector.shape_cast %38 : vector<256x128xbf16> to vector<1x1x256x128xbf16>
    tpu.vector_store %arg7[%c0_17, %c0_18, %c0_19, %c0_20], %41 {strides = array<i32>} : memref<1x2x256x128xbf16, #tpu.memory_space<vmem>>, vector<1x1x256x128xbf16>,
    %42 = vector.extract_strided_slice %33 {offsets = [0, 512], sizes = [256, 128], strides = [1, 1]} : vector<256x768xbf16> to vector<256x128xbf16>
    %c0_21 = arith.constant 0 : index
    %c0_22 = arith.constant 0 : index
    %c0_23 = arith.constant 0 : index
    %c0_24 = arith.constant 0 : index
    %43 = vector.load %arg8[%c0_21, %c0_22, %c0_23, %c0_24] : memref<1x2x256x128xbf16, #tpu.memory_space<vmem>>, vector<1x1x256x128xbf16>
    %44 = vector.shape_cast %43 : vector<1x1x256x128xbf16> to vector<256x128xbf16>
    %45 = vector.shape_cast %42 : vector<256x128xbf16> to vector<1x1x256x128xbf16>
    tpu.vector_store %arg8[%c0_21, %c0_22, %c0_23, %c0_24], %45 {strides = array<i32>} : memref<1x2x256x128xbf16, #tpu.memory_space<vmem>>, vector<1x1x256x128xbf16>,
    %46 = vector.extract_strided_slice %33 {offsets = [0, 128], sizes = [256, 128], strides = [1, 1]} : vector<256x768xbf16> to vector<256x128xbf16>
    %c0_25 = arith.constant 0 : index
    %c1 = arith.constant 1 : index
    %c0_26 = arith.constant 0 : index
    %c0_27 = arith.constant 0 : index
    %47 = vector.load %arg6[%c0_25, %c1, %c0_26, %c0_27] : memref<1x2x256x128xbf16, #tpu.memory_space<vmem>>, vector<1x1x256x128xbf16>
    %48 = vector.shape_cast %47 : vector<1x1x256x128xbf16> to vector<256x128xbf16>
    %49 = vector.shape_cast %46 : vector<256x128xbf16> to vector<1x1x256x128xbf16>
    tpu.vector_store %arg6[%c0_25, %c1, %c0_26, %c0_27], %49 {strides = array<i32>} : memref<1x2x256x128xbf16, #tpu.memory_space<vmem>>, vector<1x1x256x128xbf16>,
    %50 = vector.extract_strided_slice %33 {offsets = [0, 384], sizes = [256, 128], strides = [1, 1]} : vector<256x768xbf16> to vector<256x128xbf16>
    %c0_28 = arith.constant 0 : index
    %c1_29 = arith.constant 1 : index
    %c0_30 = arith.constant 0 : index
    %c0_31 = arith.constant 0 : index
    %51 = vector.load %arg7[%c0_28, %c1_29, %c0_30, %c0_31] : memref<1x2x256x128xbf16, #tpu.memory_space<vmem>>, vector<1x1x256x128xbf16>
    %52 = vector.shape_cast %51 : vector<1x1x256x128xbf16> to vector<256x128xbf16>
    %53 = vector.shape_cast %50 : vector<256x128xbf16> to vector<1x1x256x128xbf16>
    tpu.vector_store %arg7[%c0_28, %c1_29, %c0_30, %c0_31], %53 {strides = array<i32>} : memref<1x2x256x128xbf16, #tpu.memory_space<vmem>>, vector<1x1x256x128xbf16>,
    %54 = vector.extract_strided_slice %33 {offsets = [0, 640], sizes = [256, 128], strides = [1, 1]} : vector<256x768xbf16> to vector<256x128xbf16>
    %c0_32 = arith.constant 0 : index
    %c1_33 = arith.constant 1 : index
    %c0_34 = arith.constant 0 : index
    %c0_35 = arith.constant 0 : index
    %55 = vector.load %arg8[%c0_32, %c1_33, %c0_34, %c0_35] : memref<1x2x256x128xbf16, #tpu.memory_space<vmem>>, vector<1x1x256x128xbf16>
    %56 = vector.shape_cast %55 : vector<1x1x256x128xbf16> to vector<256x128xbf16>
    %57 = vector.shape_cast %54 : vector<256x128xbf16> to vector<1x1x256x128xbf16>
    tpu.vector_store %arg8[%c0_32, %c1_33, %c0_34, %c0_35], %57 {strides = array<i32>} : memref<1x2x256x128xbf16, #tpu.memory_space<vmem>>, vector<1x1x256x128xbf16>,
    return
  }
  func.func @transform_0(%arg0: i32, %arg1: i32) -> (i32, i32, i32) {
    %c0_i32 = arith.constant 0 : i32
    %c0_i32_0 = arith.constant 0 : i32
    return %arg0, %arg1, %c0_i32 : i32, i32, i32
  }
  func.func @transform_1(%arg0: i32, %arg1: i32) -> (i32, i32) {
    %c0_i32 = arith.constant 0 : i32
    %c0_i32_0 = arith.constant 0 : i32
    %c0_i32_1 = arith.constant 0 : i32
    return %c0_i32, %c0_i32_0 : i32, i32
  }
  func.func @transform_2(%arg0: i32, %arg1: i32) -> (i32, i32) {
    %c0_i32 = arith.constant 0 : i32
    %c0_i32_0 = arith.constant 0 : i32
    %c0_i32_1 = arith.constant 0 : i32
    return %c0_i32, %c0_i32_0 : i32, i32
  }
  func.func @transform_3(%arg0: i32, %arg1: i32) -> (i32, i32) {
    %c0_i32 = arith.constant 0 : i32
    %c0_i32_0 = arith.constant 0 : i32
    %c0_i32_1 = arith.constant 0 : i32
    return %c0_i32, %c0_i32_0 : i32, i32
  }
  func.func @transform_4(%arg0: i32, %arg1: i32) -> (i32, i32, i32, i32) {
    %c0_i32 = arith.constant 0 : i32
    %c0_i32_0 = arith.constant 0 : i32
    %c0_i32_1 = arith.constant 0 : i32
    return %arg0, %c0_i32, %arg1, %c0_i32_0 : i32, i32, i32, i32
  }
  func.func @transform_5(%arg0: i32, %arg1: i32) -> (i32, i32, i32, i32) {
    %c0_i32 = arith.constant 0 : i32
    %c0_i32_0 = arith.constant 0 : i32
    %c0_i32_1 = arith.constant 0 : i32
    return %arg0, %c0_i32, %arg1, %c0_i32_0 : i32, i32, i32, i32
  }
  func.func @transform_6(%arg0: i32, %arg1: i32) -> (i32, i32, i32, i32) {
    %c0_i32 = arith.constant 0 : i32
    %c0_i32_0 = arith.constant 0 : i32
    %c0_i32_1 = arith.constant 0 : i32
    return %arg0, %c0_i32, %arg1, %c0_i32_0 : i32, i32, i32, i32
  }
}

</mosaic_0001>

<bundles_post_ra>
// kernel: tpu_custom_call.1
= control target key start
LH: loop header
LB: loop body
LE: loop exit
PB: predicated region body
PF: predicated region fallthrough
CT: control target
= control target key end

     0   :  { %s7087_s0 = inlined_call_operand.hbm [shape: f32[2,256,256], index: 0, kind: input, shape index: {}]   ;;  %s7088_s1 = inlined_call_operand.hbm [shape: f32[1,256], index: 1, kind: input, shape index: {}]   ;;  %s7089_s2 = inlined_call_operand.hbm [shape: f32[1,256], index: 2, kind: input, shape index: {}]   ;;  %s7090_s3 = inlined_call_operand.hbm [shape: bf16[256,768], index: 3, kind: input, shape index: {}]   ;;  %s7091_s4 = inlined_call_operand.hbm [shape: bf16[2,2,256,128], index: 4, kind: output, shape index: {0}]   ;;  %s7092_s5 = inlined_call_operand.hbm [shape: bf16[2,2,256,128], index: 5, kind: output, shape index: {1}]   ;;  %s7093_s6 = inlined_call_operand.hbm [shape: bf16[2,2,256,128], index: 6, kind: output, shape index: {2}]  }
   0x1   :  { %7152 = sst [smem:[#allocation45_spill]] %s7088_s1 }
   0x2   :  { %7153 = sst [smem:[#allocation46_spill]] %s7089_s2 }
   0x3   :  { %7154 = sst [smem:[#allocation47_spill]] %s7090_s3 }
   0x4   :  { %12 = vsyncpa [#allocation3], 0 }
   0x5   :  { %14 = vsyncpa [#allocation3 + $0x1], 0 }
   0x6   :  { %15 = vsyncpa [#allocation6], 0 }
   0x7   :  { %16 = vsyncpa [#allocation9], 0 }
   0x8   :  { %17 = vsyncpa [#allocation4], 0 }
   0x9   :  { %19 = vsyncpa [#allocation4 + $0x1], 0 }
   0xa   :  { %20 = vsyncpa [#allocation12], 0 }
   0xb   :  { %22 = vsyncpa [#allocation12 + $0x1], 0  ;;  %s5267_s21 = smov 0   ;;  %s5269_s22 = smov 0  }
   0xc   :  { %s5271_s23 = smov 0   ;;  %s5273_s24 = smov 0  }
   0xd   :  { %s5275_s25 = smov 0   ;;  %s5277_s26 = smov 0  }
   0xe LB: > { %s5298_s27 = sadd.s32 4294967295, %s5220_s26   ;;  %s7094_s28 = sadd.s32 4294967294, %s5220_s26   ;;  %s5220_s26 = sphi %s5277_s26, %s28_s26   ;;  %s5216_s25 = sphi %s5275_s25, %s7258_s25   ;;  %s5212_s24 = sphi %s5273_s24, %s7257_s24   ;;  %s5208_s23 = sphi %s5271_s23, %s7256_s23   ;;  %s5204_s22 = sphi %s5269_s22, %s7255_s22   ;;  %s5200_s21 = sphi %s5267_s21, %s7254_s21  }
   0xf   : > { %p62_p0 = scmp.ne.s32.totalorder %s5204_s22, %s5200_s21  ;;  %p63_p1 = scmp.eq.s32.totalorder %s5298_s27, 0 }
  0x10   : > { %p151_p2 = scmp.eq.s32.totalorder %s5298_s27, 1  ;;  %p157_p3 = scmp.eq.s32.totalorder %s7094_s28, 1 }
  0x11   : > { %p5309_p4 = por %p63_p1, %p62_p0  ;;  %p3882_p5 = scmp.ge.s32.totalorder %s5220_s26, 1 }
  0x12   : > { %p5314_p6 = por %p157_p3, %p62_p0  ;;  %p220_p7 = scmp.lt.s32.totalorder %s5220_s26, 3 }
  0x13   : > { %s7157_s1 = sld [smem:[#allocation45_spill]]  ;;  %p3886_p9 = scmp.ge.s32.totalorder %s5220_s26, 2 }
  0x14   : > { %p5322_p8 = pnand %p3882_p5, %p220_p7  ;;  %s5222_s11 = smov [#allocation5]  }
  0x15   : > { %s234_s12 = sshll.u32 %s5222_s11, 4  ;;  %s7159_s2 = sld [smem:[#allocation46_spill]]  ;;  %s235_s12 = int_to_ptr.vmem [resolvable:$true] %s234_s12 }
  0x16   : > { %p4794_p10 = pneg %p5322_p8  ;;  %s7161_s3 = sld [smem:[#allocation47_spill]] }
  0x17   : > { %s5223_s20 = smov [#allocation7]   ;;  %s5224_s8 = smov [#allocation8]  }
  0x18   : > { %p5334_p11 = pnand %p4794_p10, %p63_p1  ;;  %s246_s7 = sshll.u32 %s5223_s20, 4  ;;  %s247_s7 = int_to_ptr.vmem [resolvable:$true] %s246_s7 }
  0x19   : > { %s232_s9 = sshll.u32 %s7157_s1, 4  ;;  %s257_s11 = sshll.u32 %s5224_s8, 4  ;;  %s233_s9 = int_to_ptr.hbm [resolvable:$true] %s232_s9  ;;  %s258_s11 = int_to_ptr.vmem [resolvable:$true] %s257_s11 }
  0x1a   : > { %4797 = dma.hbm_to_vmem [thread:$0]  (!%p5334_p11), %s233_s9, 32, %s235_s12, [#allocation6]  }
  0x1b   : > { %s244_s15 = sshll.u32 %s7159_s2, 4  ;;  %s5225_s13 = smov 384   ;;  %s245_s15 = int_to_ptr.hbm [resolvable:$true] %s244_s15 }
  0x1c   : > { %s255_s19 = sshll.u32 %s7161_s3, 4  ;;  %s5226_s14 = smov 24   ;;  %s256_s19 = int_to_ptr.hbm [resolvable:$true] %s255_s19 }
  0x1d   : > { %4800 = dma.hbm_to_vmem [thread:$0]  (!%p5334_p11), %s245_s15, 32, %s247_s7, [#allocation6]  }
  0x1e   : > { %4803 = dma.hbm_to_vmem [thread:$0]  (!%p5334_p11), %s256_s19, 12288, %s258_s11, [#allocation9], %s5225_s13, %s5225_s13, %s5226_s14  }
  0x1f   : > { %s49_s17 = sadd.s32 1, %s5208_s23  ;;  %s40_s18 = sadd.s32 1, %s5216_s25 }
  0x20   : > { %p56_p12 = scmp.ne.s32.totalorder %s5208_s23, %s5204_s22  ;;  %p42_p13 = scmp.ge.s32.totalorder %s40_s18, 2 }
  0x21   : > { %p57_p0 = scmp.eq.s32.totalorder %s5220_s26, 0  ;;  %p4821_p5 = scmp.lt.s32.totalorder %s5220_s26, 2 }
  0x22   : > { %p5354_p3 = por %p151_p2, %p56_p12  ;;  %s7260_s18 = smov (%p42_p13, %s40_s18), 0 }
  0x23   : > { %7163 = sst [smem:[#allocation19_spill]] %s7260_s18  ;;  %p5361_p7 = por %p57_p0, %p56_p12 }
  0x24   : > { %s271_s15 = sand.u32 1, %s5208_s23   ;;  %s44_s16 = ssub.s32 %s5216_s25, %s7260_s18 }
  0x25   : > { %p47_p10 = scmp.eq.s32.totalorder %s44_s16, 0  ;;  %s3887_s19 = sshll.u32 %s271_s15, 9 }
  0x26   : > { %s4389_s20 = sshll.u32 %s5216_s25, 9  ;;  %s275_s14 = scalar_lea.vmem [#allocation2], %s3887_s19 }
  0x27   : > { %s5370_s7 = scalar_select %p47_p10, %s5208_s23, %s49_s17  }
  0x28   : > { %s283_s13 = scalar_lea.hbm %s7087_s0, %s4389_s20  ;;  %s286_s28 = sshll.u32 %s275_s14, 4  ;;  %s287_s28 = int_to_ptr.vmem [resolvable:$true] %s286_s28 }
  0x29   : > { %s284_s1 = sshll.u32 %s283_s13, 4  ;;  %p4805_p2 = pnand %p4821_p5, %p5361_p7  ;;  %s285_s1 = int_to_ptr.hbm [resolvable:$true] %s284_s1 }
  0x2a   : > { %s272_s2 = scalar_lea.sflag [#allocation3], %s271_s15  ;;  %s5227_s3 = smov 256  }
  0x2b   : > { %s5228_s18 = smov 16   ;;  %298 = sbr.rel (%p5322_p8) target bundleno = 1448 (0x5a8), region = 36 }
  0x2c   : > { %4807 = dma.hbm_to_vmem [thread:$0]  (!%p4805_p2), %s285_s1, 8192, %s287_s28, %s272_s2, %s5227_s3, %s5227_s3, %s5228_s18  }
  0x30   : > { %s5382_s17 = sand.u32 1, %s5204_s22  }
  0x31   : > { %s3891_s16 = sshll.u32 %s5382_s17, 9  ;;  %s301_s19 = scalar_lea.sflag [#allocation3], %s5382_s17 }
  0x32   : > { %s5386_s20 = scalar_lea.vmem [#allocation2], %s3891_s16 }
  0x33   : > { %5179 = dma.done.wait (%p5309_p4), %s301_s19, 8192  }
  0x34   : > { %5181 = vsyncadd (%p5309_p4), %s301_s19, 4294959104 }
  0x35   : > { %5183 = dma.done.wait (%p63_p1), [#allocation6], 64  }
  0x36   : > { %5185 = vsyncadd (%p63_p1), [#allocation6], 4294967232 }
  0x37   : > { %5187 = dma.done.wait (%p63_p1), [#allocation9], 12288  }
  0x38   : > { %5189 = vsyncadd (%p63_p1), [#allocation9], 4294955008  ;;  %v5401_v0 = vld [vmem:[%s5386_s20 + $0x20] sm:$0xff]  ;;  %v5404_v1 = vld [vmem:[%s5386_s20 + $0x28] sm:$0xff]  ;;  %v5229_v27 = vmov 256.0   ;;  %s6089_s1 = sshll.u32 %s5382_s17, 8 }
  0x39   : > { %v363_v2 = vld [vmem:[%s5386_s20] sm:$0xff]  ;;  %v435_v3 = vadd.f32 %v5404_v1, %v5401_v0  ;;  %v364_v4 = vld [vmem:[%s5386_s20 + $0x8] sm:$0xff]  ;;  %v369_v8 = vld [vmem:[%s5386_s20 + $0x30] sm:$0xff]  ;;  %4884 = vrcp.f32 %v5229_v27  ;;  %s6107_s2 = scalar_lea.vmem [#allocation10], %s6089_s1  ;;  %s6806_s3 = scalar_lea.vmem [#allocation11], %s6089_s1 }
  0x3a   : > { %v429_v5 = vadd.f32 %v364_v4, %v363_v2  ;;  %v371_v6 = vld [vmem:[%s5386_s20 + $0x40] sm:$0xff]  ;;  %v372_v7 = vld [vmem:[%s5386_s20 + $0x48] sm:$0xff]  ;;  %v370_v9 = vld [vmem:[%s5386_s20 + $0x38] sm:$0xff]  ;;  %s6921_s28 = scalar_lea.vmem [#allocation13], %s6089_s1  ;;  %s6975_s29 = sshll.u32 %s5212_s24, 8 }
  0x3b   : > { %436 = vadd.xlane.f32.xlu1 %v435_v3  ;;  %v441_v10 = vadd.f32 %v372_v7, %v371_v6  ;;  %v365_v11 = vld [vmem:[%s5386_s20 + $0x10] sm:$0xff]  ;;  %v366_v12 = vld [vmem:[%s5386_s20 + $0x18] sm:$0xff]  ;;  %v438_v13 = vadd.f32 %v370_v9, %v369_v8  ;;  %v5431_v20 = vld [vmem:[%s5386_s20 + $0x60] sm:$0xff]  ;;  %s3672_s12 = scalar_lea.hbm %s7092_s5, %s6975_s29  ;;  %s3634_s15 = sand.u32 1, %s5298_s27  }
  0x3c   : > { %430 = vadd.xlane.f32.xlu0 %v429_v5  ;;  %v5417_v14 = vld [vmem:[%s5386_s20 + $0x50] sm:$0xff]  ;;  %v5420_v15 = vld [vmem:[%s5386_s20 + $0x58] sm:$0xff]  ;;  %v432_v16 = vadd.f32 %v366_v12, %v365_v11  ;;  %v5434_v21 = vld [vmem:[%s5386_s20 + $0x68] sm:$0xff]  ;;  %s3673_s8 = sshll.u32 %s6806_s3, 4  ;;  %s3675_s11 = sshll.u32 %s3672_s12, 4  ;;  %s3674_s8 = int_to_ptr.vmem [resolvable:$true] %s3673_s8  ;;  %s3676_s11 = int_to_ptr.hbm [resolvable:$true] %s3675_s11 }
  0x3d   : > { %442 = vadd.xlane.f32.xlu2 %v441_v10  ;;  %v444_v17 = vadd.f32 %v5420_v15, %v5417_v14  ;;  %v5425_v18 = vld [vmem:[%s5386_s20 + $0x70] sm:$0xff]  ;;  %v5428_v19 = vld [vmem:[%s5386_s20 + $0x78] sm:$0xff]  ;;  %v447_v23 = vadd.f32 %v5434_v21, %v5431_v20  ;;  %v5441_v24 = vld [vmem:[%s5386_s20 + $0x80] sm:$0xff]  ;;  %s6984_s24 = scalar_lea.sflag [#allocation12], %s3634_s15  ;;  %s5084_s13 = sshra.s32 %s3676_s11, 4  ;;  %s5085_s13 = int_to_ptr.hbm [resolvable:$true] %s5084_s13 }
  0x3e   : > { %v450_v22 = vadd.f32 %v5428_v19, %v5425_v18  ;;  %v5444_v25 = vld [vmem:[%s5386_s20 + $0x88] sm:$0xff]  ;;  %v5462_v47 = vld [vmem:[%s5386_s20 + $0x90] sm:$0xff]  ;;  %v5465_v48 = vld [vmem:[%s5386_s20 + $0x98] sm:$0xff]  ;;  %s5086_s14 = scalar_lea.hbm %s5085_s13, 256  ;;  %s5090_s19 = scalar_lea.hbm %s7092_s5, 512 }
  0x3f   : > { %v453_v26 = vadd.f32 %v5444_v25, %v5441_v24  ;;  %v4885_v28 = vpop.eup %4884  ;;  %v456_v55 = vadd.f32 %v5465_v48, %v5462_v47  ;;  %v5532_v27 = vld [vmem:[%s5386_s20 + $0xb0] sm:$0xff]  ;;  %p5087_p1 = scmp.ne.s32.totalorder %s5085_s13, %s5086_s14  ;;  %p5091_p11 = scmp.lt.s32.totalorder %s5085_s13, %s7092_s5 }
  0x40   : > { %v526_v29 = vmul.f32 256.0, %v4885_v28  ;;  %vm530_vm0 = vweird.f32 %v4885_v28  ;;  %p5092_p12 = scmp.lt.s32.totalorder %s5090_s19, %s5086_s14 }
  0x41   : > { %p5088_p4 = pnand %p5087_p1, %p5354_p3 }
  0x42   : > { %v527_v30 = vsub.f32 1.0, %v526_v29  ;;  %p5093_p13 = por %p5092_p12, %p5091_p11 }
  0x43   : > { %439 = vadd.xlane.f32.xlu1 %v438_v13  ;;  %p5089_p8 = pneg %p5088_p4 }
  0x44   : > { %433 = vadd.xlane.f32.xlu0 %v432_v16  ;;  %v528_v31 = vmul.f32 %v4885_v28, %v527_v30 }
  0x45   : > { %445 = vadd.xlane.f32.xlu2 %v444_v17  ;;  %p5094_p0 = pnand %p5093_p13, %p5089_p8 }
  0x46   : > { %v529_v32 = vadd.f32 %v4885_v28, %v528_v31 }
  0x48   : > { %v5448_v33 = vsel %vm530_vm0, %v4885_v28, %v529_v32  ;;  %v5535_v28 = vld [vmem:[%s5386_s20 + $0xb8] sm:$0xff] }
  0x4b   : > { %451 = vadd.xlane.f32.xlu1 %v450_v22 }
  0x4c   : > { %448 = vadd.xlane.f32.xlu0 %v447_v23  ;;  %v5522_v23 = vld [vmem:[%s5386_s20 + $0xd0] sm:$0xff] }
  0x53   : > { %454 = vadd.xlane.f32.xlu1 %v453_v26  ;;  %v5525_v26 = vld [vmem:[%s5386_s20 + $0xd8] sm:$0xff] }
  0x54   : > { %v468_v29 = vadd.f32 %v5525_v26, %v5522_v23 }
  0xae   : > { %v437_v34 = vpop.xlane.xlu1 %436 }
  0xaf   : > { %v431_v35 = vpop.xlane.xlu0 %430  ;;  %v534_v49 = vmul.f32 %v5448_v33, %v437_v34 }
  0xb0   : > { %v532_v36 = vmul.f32 %v5448_v33, %v431_v35  ;;  %v443_v39 = vpop.xlane.xlu2 %442  ;;  %v462_v35 = vadd.f32 %v5535_v28, %v5532_v27 }
  0xb1   : > { %v536_v46 = vmul.f32 %v5448_v33, %v443_v39  ;;  %v5488_v60 = vsub.f32 %v5401_v0, %v534_v49  ;;  %v5491_v61 = vsub.f32 %v5404_v1, %v534_v49  ;;  %v5549_v39 = vld [vmem:[%s5386_s20 + $0xe0] sm:$0xff] }
  0xb2   : > { %v5451_v37 = vsub.f32 %v363_v2, %v532_v36  ;;  %v5453_v38 = vsub.f32 %v364_v4, %v532_v36 }
  0xb3   : > { %v5479_v56 = vsub.f32 %v371_v6, %v536_v46  ;;  %v5481_v57 = vsub.f32 %v372_v7, %v536_v46  ;;  %v632_v6 = vmul.f32 %v5488_v60, %v5488_v60  ;;  %v633_v7 = vmul.f32 %v5491_v61, %v5491_v61 }
  0xb4   : > { %v628_v40 = vmul.f32 %v5451_v37, %v5451_v37  ;;  %v629_v41 = vmul.f32 %v5453_v38, %v5453_v38 }
  0xb5   : > { %v636_v5 = vmul.f32 %v5479_v56, %v5479_v56  ;;  %v637_v0 = vmul.f32 %v5481_v57, %v5481_v57  ;;  %v698_v16 = vadd.f32 %v633_v7, %v632_v6  ;;  %v5606_v6 = vld [vmem:[%s5386_s20 + $0x110] sm:$0xff]  ;;  %v5609_v7 = vld [vmem:[%s5386_s20 + $0x118] sm:$0xff] }
  0xb6   : > { %v440_v42 = vpop.xlane.xlu1 %439  ;;  %v692_v43 = vadd.f32 %v629_v41, %v628_v40  ;;  %v5552_v40 = vld [vmem:[%s5386_s20 + $0xe8] sm:$0xff]  ;;  %v5559_v41 = vld [vmem:[%s5386_s20 + $0xc0] sm:$0xff] }
  0xb7   : > { %v535_v44 = vmul.f32 %v5448_v33, %v440_v42  ;;  %v434_v45 = vpop.xlane.xlu0 %433  ;;  %v704_v10 = vadd.f32 %v637_v0, %v636_v5  ;;  %v5562_v42 = vld [vmem:[%s5386_s20 + $0xc8] sm:$0xff]  ;;  %v5598_v0 = vld [vmem:[%s5386_s20 + $0x100] sm:$0xff] }
  0xb8   : > { %v533_v50 = vmul.f32 %v5448_v33, %v434_v45  ;;  %693 = vadd.xlane.f32.xlu2 %v692_v43  ;;  %v446_v3 = vpop.xlane.xlu2 %445  ;;  %v471_v43 = vadd.f32 %v5552_v40, %v5549_v39  ;;  %v465_v46 = vadd.f32 %v5562_v42, %v5559_v41 }
  0xb9   : > { %v5469_v51 = vsub.f32 %v369_v8, %v535_v44  ;;  %v5471_v52 = vsub.f32 %v370_v9, %v535_v44  ;;  %v537_v1 = vmul.f32 %v5448_v33, %v446_v3  ;;  %v5507_v8 = vld [vmem:[%s5386_s20 + $0xa0] sm:$0xff]  ;;  %v5510_v9 = vld [vmem:[%s5386_s20 + $0xa8] sm:$0xff] }
  0xba   : > { %v5473_v53 = vsub.f32 %v365_v11, %v533_v50  ;;  %v5475_v54 = vsub.f32 %v366_v12, %v533_v50  ;;  %v459_v13 = vadd.f32 %v5510_v9, %v5507_v8 }
  0xbb   : > { %v634_v58 = vmul.f32 %v5469_v51, %v5469_v51  ;;  %v635_v59 = vmul.f32 %v5471_v52, %v5471_v52  ;;  %v5513_v11 = vsub.f32 %v5417_v14, %v537_v1  ;;  %v5516_v12 = vsub.f32 %v5420_v15, %v537_v1 }
  0xbc   : > { %v630_v62 = vmul.f32 %v5473_v53, %v5473_v53  ;;  %v631_v63 = vmul.f32 %v5475_v54, %v5475_v54 }
  0xbd   : > { %v701_v2 = vadd.f32 %v635_v59, %v634_v58  ;;  %v638_v14 = vmul.f32 %v5513_v11, %v5513_v11  ;;  %v639_v15 = vmul.f32 %v5516_v12, %v5516_v12  ;;  %v5583_v59 = vld [vmem:[%s5386_s20 + $0xf8] sm:$0xff] }
  0xbe   : > { %v695_v4 = vadd.f32 %v631_v63, %v630_v62  ;;  %v452_v30 = vpop.xlane.xlu1 %451 }
  0xbf   : > { %702 = vadd.xlane.f32.xlu1 %v701_v2  ;;  %v449_v17 = vpop.xlane.xlu0 %448  ;;  %v707_v34 = vadd.f32 %v639_v15, %v638_v14  ;;  %v539_v36 = vmul.f32 %v5448_v33, %v452_v30  ;;  %v4435_v14 = vld [vmem:[#allocation8 + $0x164] sm:$0xf0]  ;;  %v4260_v15 = vld [vmem:[#allocation8 + $0x2d0] sm:$0xf] }
  0xc0   : > { %457 = vadd.xlane.f32.xlu2 %v456_v55  ;;  %696 = vadd.xlane.f32.xlu0 %v695_v4  ;;  %v538_v22 = vmul.f32 %v5448_v33, %v449_v17  ;;  %v4483_v30 = vld [vmem:[#allocation8 + $0x2e4] sm:$0xf0] }
  0xc1   : > { %v5567_v44 = vsub.f32 %v5425_v18, %v539_v36  ;;  %v5570_v45 = vsub.f32 %v5428_v19, %v539_v36  ;;  %v5580_v19 = vld [vmem:[%s5386_s20 + $0xf0] sm:$0xff]  ;;  %v4261_v36 = vor.u32 %v4483_v30, %v4260_v15  ;;  %v4420_v30 = vld [vmem:[#allocation8 + $0xf4] sm:$0xf] }
  0xc2   : > { %v5540_v31 = vsub.f32 %v5431_v20, %v538_v22  ;;  %v5543_v32 = vsub.f32 %v5434_v21, %v538_v22  ;;  %v474_v3 = vadd.f32 %v5583_v59, %v5580_v19  ;;  %v4068_v22 = vld [vmem:[#allocation8 + $0x150] sm:$0xf] }
  0xc3   : > { %v642_v58 = vmul.f32 %v5567_v44, %v5567_v44  ;;  %v643_v18 = vmul.f32 %v5570_v45, %v5570_v45  ;;  %2071 = vmatpush.bf16.msra.mxu1 %v4261_v36 }
  0xc4   : > { %v640_v20 = vmul.f32 %v5540_v31, %v5540_v31  ;;  %v641_v21 = vmul.f32 %v5543_v32, %v5543_v32 }
  0xc5   : > { %v713_v2 = vadd.f32 %v643_v18, %v642_v58  ;;  %v4477_v18 = vld [vmem:[#allocation8 + $0x2b4] sm:$0xf0] }
  0xc6   : > { %v710_v49 = vadd.f32 %v641_v21, %v640_v20  ;;  %v455_v50 = vpop.xlane.xlu1 %454  ;;  %v4480_v21 = vld [vmem:[#allocation8 + $0x2d4] sm:$0xf] }
  0xc7   : > { %705 = vadd.xlane.f32.xlu1 %v704_v10  ;;  %v540_v55 = vmul.f32 %v5448_v33, %v455_v50  ;;  %v480_v10 = vadd.f32 %v5609_v7, %v5606_v6  ;;  %v4429_v50 = vld [vmem:[#allocation8 + $0x134] sm:$0xf0] }
  0xc8   : > { %460 = vadd.xlane.f32.xlu2 %v459_v13  ;;  %699 = vadd.xlane.f32.xlu0 %v698_v16  ;;  %v5614_v13 = vld [vmem:[%s5386_s20 + $0x120] sm:$0xff]  ;;  %v5617_v16 = vld [vmem:[%s5386_s20 + $0x128] sm:$0xff] }
  0xc9   : > { %v5586_v62 = vsub.f32 %v5441_v24, %v540_v55  ;;  %v5589_v63 = vsub.f32 %v5444_v25, %v540_v55  ;;  %v5601_v24 = vld [vmem:[%s5386_s20 + $0x108] sm:$0xff]  ;;  %v483_v17 = vadd.f32 %v5617_v16, %v5614_v13  ;;  %v4236_v55 = vld [vmem:[#allocation8 + $0x2a0] sm:$0xf] }
  0xca   : > { %v477_v1 = vadd.f32 %v5601_v24, %v5598_v0 }
  0xcb   : > { %7165 = vst [vmem:[#allocation20_spill] sm:$0xff] %v5589_v63  ;;  %v644_v4 = vmul.f32 %v5586_v62, %v5586_v62  ;;  %v645_v5 = vmul.f32 %v5589_v63, %v5589_v63 }
  0xcd   : > { %v716_v25 = vadd.f32 %v645_v5, %v644_v4  ;;  %v4237_v4 = vor.u32 %v4477_v18, %v4236_v55  ;;  %v4414_v18 = vld [vmem:[#allocation8 + $0xc4] sm:$0xf] }
  0xcf   : > { %469 = vadd.xlane.f32.xlu1 %v468_v29  ;;  %v4069_v29 = vor.u32 %v4435_v14, %v4068_v22  ;;  %2072 = vmatpush.bf16.msra.mxu1 %v4237_v4  ;;  %v4423_v22 = vld [vmem:[#allocation8 + $0x104] sm:$0xf0]  ;;  %v4212_v14 = vld [vmem:[#allocation8 + $0x270] sm:$0xf] }
  0xd0   : > { %708 = vadd.xlane.f32.xlu2 %v707_v34  ;;  %463 = vadd.xlane.f32.xlu0 %v462_v35  ;;  %v4432_v34 = vld [vmem:[#allocation8 + $0x154] sm:$0xf]  ;;  %v4070_v35 = vld [vmem:[#allocation8 + $0x168] sm:$0xf0] }
  0xd1   : > { %v4073_v20 = vor.u32 %v4432_v34, %v4070_v35  ;;  %1982 = vmatpush.bf16.msra.mxu0 %v4069_v29  ;;  %v4471_v29 = vld [vmem:[#allocation8 + $0x284] sm:$0xf0]  ;;  %v4022_v34 = vld [vmem:[#allocation8 + $0x108] sm:$0xf0] }
  0xd2   : > { %v4213_v35 = vor.u32 %v4471_v29, %v4212_v14  ;;  %v4025_v36 = vor.u32 %v4420_v30, %v4022_v34  ;;  %v4408_v29 = vld [vmem:[#allocation8 + $0x94] sm:$0xf]  ;;  %v3974_v30 = vld [vmem:[#allocation8 + $0xa8] sm:$0xf0] }
  0xd3   : > { %2160 = vmatpush.bf16.msra.mxu2 %v4073_v20  ;;  %v4468_v20 = vld [vmem:[#allocation8 + $0x274] sm:$0xf] }
  0xd4   : > { %2073 = vmatpush.bf16.msra.mxu1 %v4213_v35  ;;  %v3977_v35 = vor.u32 %v4408_v29, %v3974_v30  ;;  %v4447_v29 = vld [vmem:[#allocation8 + $0x1c4] sm:$0xf0]  ;;  %v4396_v30 = vld [vmem:[#allocation8 + $0x34] sm:$0xf] }
  0xd7   : > { %472 = vadd.xlane.f32.xlu1 %v471_v43  ;;  %v4262_v43 = vld [vmem:[#allocation8 + $0x2e8] sm:$0xf0] }
  0xd8   : > { %466 = vadd.xlane.f32.xlu0 %v465_v46  ;;  %711 = vadd.xlane.f32.xlu2 %v710_v49  ;;  %v4265_v46 = vor.u32 %v4480_v21, %v4262_v43  ;;  %v4044_v49 = vld [vmem:[#allocation8 + $0x120] sm:$0xf]  ;;  %v4214_v21 = vld [vmem:[#allocation8 + $0x288] sm:$0xf0] }
  0xd9   : > { %v4045_v58 = vor.u32 %v4429_v50, %v4044_v49  ;;  %v4217_v43 = vor.u32 %v4468_v20, %v4214_v21  ;;  %v4417_v49 = vld [vmem:[#allocation8 + $0xd4] sm:$0xf0]  ;;  %v4188_v50 = vld [vmem:[#allocation8 + $0x240] sm:$0xf]  ;;  %v4166_v20 = vld [vmem:[#allocation8 + $0x228] sm:$0xf0] }
  0xda   : > { %2249 = vmatpush.bf16.msra.mxu3 %v4265_v46  ;;  %v3996_v46 = vld [vmem:[#allocation8 + $0xc0] sm:$0xf] }
  0xdb   : > { %1983 = vmatpush.bf16.msra.mxu0 %v4045_v58  ;;  %v3997_v55 = vor.u32 %v4417_v49, %v3996_v46  ;;  %v4465_v58 = vld [vmem:[#allocation8 + $0x254] sm:$0xf0]  ;;  %v4140_v49 = vld [vmem:[#allocation8 + $0x1e0] sm:$0xf] }
  0xdc   : > { %v4405_v46 = vld [vmem:[#allocation8 + $0x74] sm:$0xf0] }
  0xe0   : > { %714 = vadd.xlane.f32.xlu0 %v713_v2  ;;  %475 = vadd.xlane.f32.xlu2 %v474_v3  ;;  %v4426_v2 = vld [vmem:[#allocation8 + $0x124] sm:$0xf]  ;;  %v4046_v3 = vld [vmem:[#allocation8 + $0x138] sm:$0xf0] }
  0xe1   : > { %v4049_v5 = vor.u32 %v4426_v2, %v4046_v3  ;;  %v3998_v2 = vld [vmem:[#allocation8 + $0xd8] sm:$0xf0]  ;;  %v4189_v3 = vor.u32 %v4465_v58, %v4188_v50  ;;  %v4402_v58 = vld [vmem:[#allocation8 + $0x64] sm:$0xf] }
  0xe2   : > { %v4001_v4 = vor.u32 %v4414_v18, %v3998_v2  ;;  %v3950_v18 = vld [vmem:[#allocation8 + $0x78] sm:$0xf0] }
  0xe3   : > { %2161 = vmatpush.bf16.msra.mxu2 %v4049_v5  ;;  %v4462_v5 = vld [vmem:[#allocation8 + $0x244] sm:$0xf]  ;;  %2074 = vmatpush.bf16.msra.mxu1 %v4189_v3  ;;  %v3953_v3 = vor.u32 %v4402_v58, %v3950_v18 }
  0xe7   : > { %2162 = vmatpush.bf16.msra.mxu2 %v4025_v36  ;;  %v4456_v36 = vld [vmem:[#allocation8 + $0x214] sm:$0xf] }
  0xe8   : > { %717 = vadd.xlane.f32.xlu0 %v716_v25  ;;  %478 = vadd.xlane.f32.xlu2 %v477_v1  ;;  %v4474_v25 = vld [vmem:[#allocation8 + $0x2a4] sm:$0xf]  ;;  %v4238_v1 = vld [vmem:[#allocation8 + $0x2b8] sm:$0xf0]  ;;  %v4169_v21 = vor.u32 %v4456_v36, %v4166_v20  ;;  %v4444_v20 = vld [vmem:[#allocation8 + $0x1b4] sm:$0xf] }
  0xeb   : > { %2163 = vmatpush.bf16.msra.mxu2 %v4001_v4  ;;  %v4450_v4 = vld [vmem:[#allocation8 + $0x1e4] sm:$0xf] }
  0xef   : > { %2164 = vmatpush.bf16.msra.mxu2 %v3977_v35 }
  0xf0   : > { %481 = vadd.xlane.f32.xlu0 %v480_v10  ;;  %v4241_v10 = vor.u32 %v4474_v25, %v4238_v1  ;;  %v4190_v25 = vld [vmem:[#allocation8 + $0x258] sm:$0xf0] }
  0xf1   : > { %v4193_v1 = vor.u32 %v4462_v5, %v4190_v25  ;;  %v4142_v5 = vld [vmem:[#allocation8 + $0x1f8] sm:$0xf0] }
  0xf2   : > { %2250 = vmatpush.bf16.msra.mxu3 %v4241_v10  ;;  %v3972_v10 = vld [vmem:[#allocation8 + $0x90] sm:$0xf]  ;;  %v4145_v25 = vor.u32 %v4450_v4, %v4142_v5 }
  0xf3   : > { %2165 = vmatpush.bf16.msra.mxu2 %v3953_v3 }
  0xf6   : > { %2251 = vmatpush.bf16.msra.mxu3 %v4217_v43  ;;  %v3948_v43 = vld [vmem:[#allocation8 + $0x60] sm:$0xf] }
  0xf7   : > { %v3949_v50 = vor.u32 %v4405_v46, %v3948_v43 }
  0xf8   : > { %484 = vadd.xlane.f32.xlu0 %v483_v17  ;;  %v4020_v17 = vld [vmem:[#allocation8 + $0xf0] sm:$0xf] }
  0xf9   : > { %v4021_v15 = vor.u32 %v4423_v22, %v4020_v17  ;;  %v4411_v17 = vld [vmem:[#allocation8 + $0xa4] sm:$0xf0]  ;;  %v4164_v22 = vld [vmem:[#allocation8 + $0x210] sm:$0xf] }
  0xfa   : > { %2252 = vmatpush.bf16.msra.mxu3 %v4193_v1  ;;  %v3973_v14 = vor.u32 %v4411_v17, %v3972_v10  ;;  %v3924_v10 = vld [vmem:[#allocation8 + $0x30] sm:$0xf]  ;;  %v4399_v17 = vld [vmem:[#allocation8 + $0x44] sm:$0xf0] }
  0xfb   : > { %1984 = vmatpush.bf16.msra.mxu0 %v4021_v15  ;;  %v4459_v15 = vld [vmem:[#allocation8 + $0x224] sm:$0xf0] }
  0xfc   : > { %v4165_v34 = vor.u32 %v4459_v15, %v4164_v22  ;;  %v4116_v22 = vld [vmem:[#allocation8 + $0x1b0] sm:$0xf]  ;;  %v3925_v15 = vor.u32 %v4399_v17, %v3924_v10 }
  0xfd   : > { %v4117_v35 = vor.u32 %v4447_v29, %v4116_v22  ;;  %v4092_v29 = vld [vmem:[#allocation8 + $0x180] sm:$0xf] }
  0xfe   : > { %2075 = vmatpush.bf16.msra.mxu1 %v4165_v34  ;;  %2253 = vmatpush.bf16.msra.mxu3 %v4169_v21  ;;  %v3926_v34 = vld [vmem:[#allocation8 + $0x48] sm:$0xf0] }
  0xff   : > { %1985 = vmatpush.bf16.msra.mxu0 %v3997_v55  ;;  %v4453_v55 = vld [vmem:[#allocation8 + $0x1f4] sm:$0xf0]  ;;  %v3929_v36 = vor.u32 %v4396_v30, %v3926_v34  ;;  %v4118_v21 = vld [vmem:[#allocation8 + $0x1c8] sm:$0xf0] }
 0x100   : > { %v4141_v2 = vor.u32 %v4453_v55, %v4140_v49  ;;  %v4121_v46 = vor.u32 %v4444_v20, %v4118_v21  ;;  %v3902_v20 = vld [vmem:[#allocation8 + $0x18] sm:$0xf0] }
 0x101   : > { %2166 = vmatpush.bf16.msra.mxu2 %v3929_v36  ;;  %v4390_v36 = vld [vmem:[#allocation8 + $0x4] sm:$0xf] }
 0x102   : > { %2076 = vmatpush.bf16.msra.mxu1 %v4141_v2  ;;  %2254 = vmatpush.bf16.msra.mxu3 %v4145_v25 }
 0x103   : > { %1986 = vmatpush.bf16.msra.mxu0 %v3973_v14 }
 0x106   : > { %2077 = vmatpush.bf16.msra.mxu1 %v4117_v35  ;;  %2255 = vmatpush.bf16.msra.mxu3 %v4121_v46  ;;  %v4441_v35 = vld [vmem:[#allocation8 + $0x194] sm:$0xf0] }
 0x107   : > { %1987 = vmatpush.bf16.msra.mxu0 %v3949_v50 }
 0x10b   : > { %1988 = vmatpush.bf16.msra.mxu0 %v3925_v15  ;;  %v4393_v15 = vld [vmem:[#allocation8 + $0x14] sm:$0xf0] }
 0x12b   : > { %v694_v1 = vpop.xlane.xlu2 %693 }
 0x12c   : > { %v788_v14 = vmul.f32 %v694_v1, %v5448_v33 }
 0x12e   : > { %v5622_v43 = vadd.f32 1e-05, %v788_v14 }
 0x130   : > { %4886 = vrsqrt.f32 %v5622_v43  ;;  %vm858_vm2 = vweird.f32 %v5622_v43 }
 0x132   : > { %v703_v49 = vpop.xlane.xlu1 %702 }
 0x133   : > { %v791_v50 = vmul.f32 %v703_v49, %v5448_v33  ;;  %v458_v55 = vpop.xlane.xlu2 %457  ;;  %v697_v58 = vpop.xlane.xlu0 %696 }
 0x134   : > { %v541_v18 = vmul.f32 %v5448_v33, %v458_v55  ;;  %v789_v2 = vmul.f32 %v697_v58, %v5448_v33  ;;  %v4093_v55 = vor.u32 %v4441_v35, %v4092_v29  ;;  %v3905_v58 = vor.u32 %v4390_v36, %v3902_v20 }
 0x135   : > { %v5628_v3 = vadd.f32 1e-05, %v791_v50 }
 0x136   : > { %v4887_v4 = vpop.eup %4886  ;;  %v5631_v5 = vsub.f32 %v5462_v47, %v541_v18  ;;  %v5634_v25 = vsub.f32 %v5465_v48, %v541_v18  ;;  %v5636_v1 = vadd.f32 1e-05, %v789_v2  ;;  %v3900_v47 = vld [vmem:[#allocation8] sm:$0xf]  ;;  %v4438_v18 = vld [vmem:[#allocation8 + $0x184] sm:$0xf]  ;;  %2078 = vmatpush.bf16.msra.mxu1 %v4093_v55  ;;  %2167 = vmatpush.bf16.msra.mxu2 %v3905_v58 }
 0x137   : > { %v853_v10 = vmul.f32 %v4887_v4, %v5622_v43  ;;  %4888 = vrsqrt.f32 %v5628_v3  ;;  %v3901_v34 = vor.u32 %v4393_v15, %v3900_v47  ;;  %v4094_v2 = vld [vmem:[#allocation8 + $0x198] sm:$0xf0]  ;;  %vm859_vm1 = vweird.f32 %v4887_v4 }
 0x138   : > { %7166 = vst [vmem:[#allocation21_spill] sm:$0xff] %v5631_v5  ;;  %4890 = vrsqrt.f32 %v5636_v1  ;;  %v646_v17 = vmul.f32 %v5631_v5, %v5631_v5  ;;  %v647_v22 = vmul.f32 %v5634_v25, %v5634_v25  ;;  %vm860_vm3 = vmor %vm858_vm2, %vm859_vm1  ;;  %vm868_vm5 = vweird.f32 %v5636_v1 }
 0x139   : > { %7167 = vst [vmem:[#allocation22_spill] sm:$0xff] %v5634_v25  ;;  %v854_v14 = vmul.f32 %v4887_v4, %v853_v10  ;;  %1989 = vmatpush.bf16.msra.mxu0 %v3901_v34  ;;  %vm888_vm6 = vweird.f32 %v5628_v3 }
 0x13a   : > { %v706_v48 = vpop.xlane.xlu1 %705  ;;  %v719_v30 = vadd.f32 %v647_v22, %v646_v17  ;;  %v4097_v17 = vor.u32 %v4438_v18, %v4094_v2 }
 0x13b   : > { %v855_v21 = vmul.f32 0.5, %v854_v14  ;;  %v792_v46 = vmul.f32 %v706_v48, %v5448_v33  ;;  %v461_v49 = vpop.xlane.xlu2 %460  ;;  %v700_v50 = vpop.xlane.xlu0 %699 }
 0x13c   : > { %v542_v10 = vmul.f32 %v5448_v33, %v461_v49  ;;  %v790_v25 = vmul.f32 %v700_v50, %v5448_v33  ;;  %720 = vadd.xlane.f32.xlu1 %v719_v30  ;;  %2256 = vmatpush.bf16.msra.mxu3 %v4097_v17 }
 0x13d   : > { %v5648_v22 = vpop.eup %4888  ;;  %v856_v47 = vsub.f32 1.5, %v855_v21  ;;  %v5650_v15 = vadd.f32 1e-05, %v792_v46  ;;  %v427_v46 = vld [vmem:[#allocation5] sm:$0x3] }
 0x13e   : > { %v4891_v14 = vpop.eup %4890  ;;  %v883_v29 = vmul.f32 %v5648_v22, %v5628_v3  ;;  %v5655_v48 = vsub.f32 %v5507_v8, %v542_v10  ;;  %v5658_v35 = vsub.f32 %v5510_v9, %v542_v10  ;;  %v5663_v20 = vadd.f32 1e-05, %v790_v25  ;;  %v428_v25 = vld [vmem:[#allocation7] sm:$0x3] }
 0x13f   : > { %v857_v30 = vmul.f32 %v4887_v4, %v856_v47  ;;  %v863_v34 = vmul.f32 %v4891_v14, %v5636_v1  ;;  %4892 = vrsqrt.f32 %v5650_v15  ;;  %v5671_v10 = vperm.slane %v427_v46, 0 }
 0x140   : > { %7168 = vst [vmem:[#allocation23_spill] sm:$0xff] %v5655_v48  ;;  %v884_v36 = vmul.f32 %v5648_v22, %v883_v29  ;;  %v648_v21 = vmul.f32 %v5655_v48, %v5655_v48  ;;  %v649_v9 = vmul.f32 %v5658_v35, %v5658_v35  ;;  %4894 = vrsqrt.f32 %v5663_v20 }
 0x141   : > { %7169 = vst [vmem:[#allocation24_spill] sm:$0xff] %v5658_v35  ;;  %v864_v8 = vmul.f32 %v4891_v14, %v863_v34  ;;  %v861_v49 = vsel %vm860_vm3, %v4887_v4, %v857_v30  ;;  %v5673_v17 = vperm.slane %v427_v46, 1  ;;  %vm869_vm4 = vweird.f32 %v4891_v14  ;;  %v5679_v34 = vld [vmem:[%s5386_s20 + $0x130] sm:$0xff] }
 0x142   : > { %v885_v50 = vmul.f32 0.5, %v884_v36  ;;  %v470_v43 = vpop.xlane.xlu1 %469  ;;  %v722_v2 = vadd.f32 %v649_v9, %v648_v21  ;;  %v1172_v4 = vmul.f32 %v861_v49, %v5451_v37  ;;  %v1173_v29 = vmul.f32 %v861_v49, %v5453_v38  ;;  %7170 = vst [vmem:[#allocation25_spill] sm:$0xff] %v5679_v34  ;;  %v5682_v36 = vld [vmem:[%s5386_s20 + $0x138] sm:$0xff]  ;;  %v5694_v38 = vld [vmem:[%s5386_s20 + $0x140] sm:$0xff]  ;;  %v5697_v49 = vld [vmem:[%s5386_s20 + $0x148] sm:$0xff] }
 0x143   : > { %v865_v55 = vmul.f32 0.5, %v864_v8  ;;  %v709_v58 = vpop.xlane.xlu2 %708  ;;  %v464_v18 = vpop.xlane.xlu0 %463  ;;  %7171 = vst [vmem:[#allocation26_spill] sm:$0xff] %v5682_v36  ;;  %v5684_v21 = vperm.slane %v428_v25, 0  ;;  %v5688_v9 = vperm.slane %v428_v25, 1  ;;  %vm889_vm7 = vweird.f32 %v5648_v22  ;;  %vm870_vm8 = vmor %vm868_vm5, %vm869_vm4 }
 0x144   : > { %v793_v47 = vmul.f32 %v709_v58, %v5448_v33  ;;  %723 = vadd.xlane.f32.xlu1 %v722_v2  ;;  %v886_v8 = vsub.f32 1.5, %v885_v50  ;;  %7172 = vst [vmem:[#allocation27_spill] sm:$0xff] %v5694_v38  ;;  %v545_v50 = vmul.f32 %v5448_v33, %v470_v43  ;;  %v486_v25 = vadd.f32 %v5682_v36, %v5679_v34  ;;  %vm5713_vm9 = vmor %vm888_vm6, %vm889_vm7 }
 0x145   : > { %v866_v30 = vsub.f32 1.5, %v865_v55  ;;  %v5686_v46 = vpop.eup %4892  ;;  %7173 = vst [vmem:[#allocation28_spill] sm:$0xff] %v5697_v49  ;;  %v1241_v1 = vmul.f32 %v5671_v10, %v1172_v4  ;;  %v1242_v2 = vmul.f32 %v5673_v17, %v1173_v29  ;;  %v489_v5 = vadd.f32 %v5697_v49, %v5694_v38 }
 0x146   : > { %v5691_v37 = vadd.f32 1e-05, %v793_v47  ;;  %v4895_v55 = vpop.eup %4894  ;;  %v887_v35 = vmul.f32 %v5648_v22, %v886_v8  ;;  %v893_v4 = vmul.f32 %v5686_v46, %v5650_v15  ;;  %vm878_vm10 = vweird.f32 %v5663_v20 }
 0x147   : > { %v867_v58 = vmul.f32 %v4891_v14, %v866_v30  ;;  %v873_v30 = vmul.f32 %v4895_v55, %v5663_v20  ;;  %v1310_v38 = vadd.f32 %v5684_v21, %v1241_v1  ;;  %v5730_v34 = vsub.f32 %v5525_v26, %v545_v50 }
 0x148   : > { %4896 = vrsqrt.f32 %v5691_v37  ;;  %v894_v63 = vmul.f32 %v5686_v46, %v893_v4  ;;  %vm879_vm11 = vweird.f32 %v4895_v55  ;;  %vm898_vm13 = vweird.f32 %v5650_v15 }
 0x149   : > { %v871_v47 = vsel %vm870_vm8, %v4891_v14, %v867_v58  ;;  %v874_v29 = vmul.f32 %v4895_v55, %v873_v30  ;;  %v5724_v58 = vsub.f32 %v5522_v23, %v545_v50  ;;  %v1311_v30 = vadd.f32 %v5688_v9, %v1242_v2  ;;  %vm880_vm12 = vmor %vm878_vm10, %vm879_vm11 }
 0x14a   : > { %v1174_v3 = vmul.f32 %v871_v47, %v5473_v53  ;;  %v1175_v48 = vmul.f32 %v871_v47, %v5475_v54  ;;  %v543_v47 = vmul.f32 %v5448_v33, %v464_v18  ;;  %v473_v49 = vpop.xlane.xlu1 %472  ;;  %vm899_vm14 = vweird.f32 %v5686_v46 }
 0x14b   : > { %v712_v14 = vpop.xlane.xlu2 %711  ;;  %v467_v8 = vpop.xlane.xlu0 %466  ;;  %v875_v36 = vmul.f32 0.5, %v874_v29  ;;  %v546_v2 = vmul.f32 %v5448_v33, %v473_v49  ;;  %v654_v49 = vmul.f32 %v5724_v58, %v5724_v58  ;;  %vm908_vm15 = vweird.f32 %v5691_v37  ;;  %vm900_vm2 = vmor %vm898_vm13, %vm899_vm14 }
 0x14c   : > { %v1243_v53 = vmul.f32 %v5671_v10, %v1174_v3  ;;  %v1244_v54 = vmul.f32 %v5673_v17, %v1175_v48  ;;  %487 = vadd.xlane.f32.xlu1 %v486_v25  ;;  %v891_v3 = vsel %vm5713_vm9, %v5648_v22, %v887_v35  ;;  %v794_v18 = vmul.f32 %v712_v14, %v5448_v33 }
 0x14d   : > { %v876_v1 = vsub.f32 1.5, %v875_v36  ;;  %v5745_v50 = vsub.f32 %v5532_v27, %v543_v47  ;;  %v5748_v22 = vsub.f32 %v5535_v28, %v543_v47  ;;  %v544_v36 = vmul.f32 %v5448_v33, %v467_v8 }
 0x14e   : > { %v1312_v48 = vadd.f32 %v5684_v21, %v1243_v53  ;;  %v1313_v23 = vadd.f32 %v5688_v9, %v1244_v54  ;;  %v5750_v35 = vpop.eup %4896  ;;  %v5752_v43 = vadd.f32 1e-05, %v794_v18  ;;  %v1179_v4 = vmul.f32 %v891_v3, %v5471_v52 }
 0x14f   : > { %v877_v25 = vmul.f32 %v4895_v55, %v876_v1  ;;  %v903_v27 = vmul.f32 %v5750_v35, %v5691_v37  ;;  %v895_v28 = vmul.f32 0.5, %v894_v63  ;;  %v5766_v8 = vsub.f32 %v5549_v39, %v546_v2 }
 0x150   : > { %v5740_v29 = vpack.c.bf16 %v1312_v48, %v1310_v38  ;;  %v5742_v26 = vpack.c.bf16 %v1313_v23, %v1311_v30  ;;  %v1178_v38 = vmul.f32 %v891_v3, %v5469_v51  ;;  %v5769_v53 = vsub.f32 %v5552_v40, %v546_v2 }
 0x151   : > { %v881_v14 = vsel %vm880_vm12, %v4895_v55, %v877_v25  ;;  %v904_v47 = vmul.f32 %v5750_v35, %v903_v27  ;;  %v655_v63 = vmul.f32 %v5730_v34, %v5730_v34  ;;  %4898 = vrsqrt.f32 %v5752_v43 }
 0x152   : > { %7176 = vst [vmem:[#allocation29_spill] sm:$0xff] %v5740_v29  ;;  %1990 = vmatmul.bf16.vlgmr.msra.gmra.mxu0 %v5740_v29  ;;  %2079 = vmatmul.bf16.vlgmr.msra.gmra.mxu1 %v5742_v26  ;;  %v1176_v20 = vmul.f32 %v881_v14, %v5488_v60  ;;  %v1177_v54 = vmul.f32 %v881_v14, %v5491_v61  ;;  %vm909_vm0 = vweird.f32 %v5750_v35  ;;  %vm918_vm3 = vweird.f32 %v5752_v43 }
 0x153   : > { %7177 = vst [vmem:[#allocation30_spill] sm:$0xff] %v5742_v26  ;;  %2168 = vmatmul.bf16.vlgmr.msra.gmra.mxu2 %v5740_v29  ;;  %v476_v51 = vpop.xlane.xlu2 %475  ;;  %v715_v52 = vpop.xlane.xlu0 %714  ;;  %2257 = vmatmul.bf16.vlgmr.msra.gmra.mxu3 %v5742_v26  ;;  %v5781_v39 = vsub.f32 %v5559_v41, %v544_v36  ;;  %v650_v40 = vmul.f32 %v5745_v50, %v5745_v50  ;;  %v905_v30 = vmul.f32 0.5, %v904_v47  ;;  %vm910_vm1 = vmor %vm908_vm15, %vm909_vm0  ;;  %v7205_v26 = vld [vmem:[#allocation24_spill] sm:$0xff] }
 0x154   : > { %v651_v60 = vmul.f32 %v5748_v22, %v5748_v22  ;;  %490 = vadd.xlane.f32.xlu1 %v489_v5  ;;  %v1245_v61 = vmul.f32 %v5671_v10, %v1176_v20  ;;  %v1246_v55 = vmul.f32 %v5673_v17, %v1177_v54  ;;  %v731_v3 = vadd.f32 %v655_v63, %v654_v49 }
 0x155   : > { %v5790_v48 = vsub.f32 %v5562_v42, %v544_v36  ;;  %v547_v41 = vmul.f32 %v5448_v33, %v476_v51  ;;  %v795_v18 = vmul.f32 %v715_v52, %v5448_v33  ;;  %v906_v1 = vsub.f32 1.5, %v905_v30 }
 0x156   : > { %v725_v23 = vadd.f32 %v651_v60, %v650_v40  ;;  %732 = vadd.xlane.f32.xlu0 %v731_v3  ;;  %v656_v5 = vmul.f32 %v5766_v8, %v5766_v8  ;;  %v657_v2 = vmul.f32 %v5769_v53, %v5769_v53  ;;  %v1247_v25 = vmul.f32 %v5671_v10, %v1178_v38 }
 0x157   : > { %v1248_v42 = vmul.f32 %v5673_v17, %v1179_v4  ;;  %v896_v36 = vsub.f32 1.5, %v895_v28  ;;  %v1314_v49 = vadd.f32 %v5684_v21, %v1245_v61  ;;  %v1315_v27 = vadd.f32 %v5688_v9, %v1246_v55  ;;  %v5807_v51 = vpop.eup %4898 }
 0x158   : > { %726 = vadd.xlane.f32.xlu2 %v725_v23  ;;  %v5805_v14 = vadd.f32 1e-05, %v795_v18  ;;  %v5810_v52 = vsub.f32 %v5580_v19, %v547_v41  ;;  %v5813_v38 = vsub.f32 %v5583_v59, %v547_v41  ;;  %v652_v4 = vmul.f32 %v5781_v39, %v5781_v39 }
 0x159   : > { %v653_v28 = vmul.f32 %v5790_v48, %v5790_v48  ;;  %v907_v47 = vmul.f32 %v5750_v35, %v906_v1  ;;  %v734_v63 = vadd.f32 %v657_v2, %v656_v5  ;;  %v1316_v40 = vadd.f32 %v5684_v21, %v1247_v25  ;;  %v5853_v1 = vld [vmem:[%s5386_s20 + $0x170] sm:$0xff]  ;;  %v5856_v5 = vld [vmem:[%s5386_s20 + $0x178] sm:$0xff] }
 0x15a   : > { %4900 = vrsqrt.f32 %v5805_v14  ;;  %v1317_v59 = vadd.f32 %v5688_v9, %v1248_v42  ;;  %v897_v61 = vmul.f32 %v5686_v46, %v896_v36  ;;  %v913_v3 = vmul.f32 %v5807_v51, %v5752_v43  ;;  %v5862_v42 = vld [vmem:[%s5386_s20 + $0x150] sm:$0xff] }
 0x15b   : > { %v479_v20 = vpop.xlane.xlu2 %478  ;;  %v5819_v54 = vpop.xlane.xlu0 %717  ;;  %v728_v60 = vadd.f32 %v653_v28, %v652_v4  ;;  %v5835_v55 = vpack.c.bf16 %v1316_v40, %v1314_v49  ;;  %v658_v37 = vmul.f32 %v5810_v52, %v5810_v52  ;;  %v911_v23 = vsel %vm910_vm1, %v5750_v35, %v907_v47 }
 0x15c   : > { %v548_v19 = vmul.f32 %v5448_v33, %v479_v20  ;;  %v5837_v30 = vpack.c.bf16 %v1317_v59, %v1315_v27  ;;  %v659_v18 = vmul.f32 %v5813_v38, %v5813_v38  ;;  %v901_v25 = vsel %vm900_vm2, %v5686_v46, %v897_v61 }
 0x15d   : > { %7178 = vst [vmem:[#allocation31_spill] sm:$0xff] %v5835_v55  ;;  %v1183_v36 = vmul.f32 %v911_v23, %v5516_v12  ;;  %v914_v49 = vmul.f32 %v5807_v51, %v913_v3  ;;  %v498_v46 = vadd.f32 %v5856_v5, %v5853_v1  ;;  %v1180_v47 = vmul.f32 %v901_v25, %v5479_v56 }
 0x15e   : > { %7179 = vst [vmem:[#allocation32_spill] sm:$0xff] %v5837_v30  ;;  %735 = vadd.xlane.f32.xlu0 %v734_v63  ;;  %v5845_v41 = vsub.f32 %v5598_v0, %v548_v19  ;;  %v5848_v15 = vsub.f32 %v5601_v24, %v548_v19  ;;  %v737_v35 = vadd.f32 %v659_v18, %v658_v37  ;;  %v5865_v0 = vld [vmem:[%s5386_s20 + $0x158] sm:$0xff]  ;;  %v5894_v18 = vld [vmem:[%s5386_s20 + $0x188] sm:$0xff]  ;;  %vm928_vm4 = vweird.f32 %v5805_v14 }
 0x15f   : > { %v1182_v24 = vmul.f32 %v911_v23, %v5513_v11  ;;  %v492_v20 = vadd.f32 %v5865_v0, %v5862_v42  ;;  %v1181_v63 = vmul.f32 %v901_v25, %v5481_v57  ;;  %v915_v19 = vmul.f32 0.5, %v914_v49  ;;  %v5891_v23 = vld [vmem:[%s5386_s20 + $0x180] sm:$0xff] }
 0x160   : > { %7180 = vst [vmem:[#allocation33_spill] sm:$0xff] %v5845_v41  ;;  %729 = vadd.xlane.f32.xlu2 %v728_v60  ;;  %v5858_v2 = vpop.eup %4900  ;;  %738 = vadd.xlane.f32.xlu1 %v737_v35  ;;  %v660_v11 = vmul.f32 %v5845_v41, %v5845_v41  ;;  %v661_v12 = vmul.f32 %v5848_v15, %v5848_v15  ;;  %v5899_v25 = vld [vmem:[%s5386_s20 + $0x160] sm:$0xff]  ;;  %v5902_v35 = vld [vmem:[%s5386_s20 + $0x168] sm:$0xff]  ;;  %vm919_vm6 = vweird.f32 %v5807_v51 }
 0x161   : > { %7181 = vst [vmem:[#allocation34_spill] sm:$0xff] %v5848_v15  ;;  %v923_v27 = vmul.f32 %v5858_v2, %v5805_v14  ;;  %v1251_v59 = vmul.f32 %v5671_v10, %v1182_v24  ;;  %v1252_v60 = vmul.f32 %v5673_v17, %v1183_v36  ;;  %v1249_v56 = vmul.f32 %v5671_v10, %v1180_v47  ;;  %vm920_vm8 = vmor %vm918_vm3, %vm919_vm6 }
 0x162   : > { %1995 = vmatmul.bf16.gmra.mxu0 %v5835_v55  ;;  %2084 = vmatmul.bf16.gmra.mxu1 %v5837_v30  ;;  %v740_v61 = vadd.f32 %v661_v12, %v660_v11  ;;  %v1250_v57 = vmul.f32 %v5673_v17, %v1181_v63  ;;  %v916_v24 = vsub.f32 1.5, %v915_v19  ;;  %vm929_vm5 = vweird.f32 %v5858_v2 }
 0x163   : > { %2173 = vmatmul.bf16.gmra.mxu2 %v5835_v55  ;;  %2262 = vmatmul.bf16.gmra.mxu3 %v5837_v30  ;;  %v482_v4 = vpop.xlane.xlu0 %481  ;;  %v924_v28 = vmul.f32 %v5858_v2, %v923_v27  ;;  %v1320_v36 = vadd.f32 %v5684_v21, %v1251_v59  ;;  %v1321_v49 = vadd.f32 %v5688_v9, %v1252_v60  ;;  %vm930_vm7 = vmor %vm928_vm4, %vm929_vm5 }
 0x164   : > { %v549_v37 = vmul.f32 %v5448_v33, %v482_v4  ;;  %v501_v27 = vadd.f32 %v5894_v18, %v5891_v23  ;;  %v495_v12 = vadd.f32 %v5902_v35, %v5899_v25  ;;  %v1318_v47 = vadd.f32 %v5684_v21, %v1249_v56 }
 0x165   : > { %v925_v40 = vmul.f32 0.5, %v924_v28  ;;  %v5922_v28 = vld [vmem:[%s5386_s20 + $0x190] sm:$0xff]  ;;  %v1319_v63 = vadd.f32 %v5688_v9, %v1250_v57 }
 0x166   : > { %499 = vadd.xlane.f32.xlu0 %v498_v46  ;;  %v5914_v4 = vsub.f32 %v5606_v6, %v549_v37  ;;  %v5917_v11 = vsub.f32 %v5609_v7, %v549_v37  ;;  %v917_v6 = vmul.f32 %v5807_v51, %v916_v24 }
 0x167   : > { %v926_v3 = vsub.f32 1.5, %v925_v40  ;;  %v5932_v40 = vpack.c.bf16 %v1320_v36, %v1318_v47  ;;  %v5934_v7 = vpack.c.bf16 %v1321_v49, %v1319_v63  ;;  %v5962_v36 = vld [vmem:[%s5386_s20 + $0x1a0] sm:$0xff]  ;;  %v5965_v49 = vld [vmem:[%s5386_s20 + $0x1a8] sm:$0xff] }
 0x168   : > { %493 = vadd.xlane.f32.xlu2 %v492_v20  ;;  %741 = vadd.xlane.f32.xlu1 %v740_v61  ;;  %7182 = vst [vmem:[#allocation35_spill] sm:$0xff] %v5917_v11  ;;  %v5925_v20 = vld [vmem:[%s5386_s20 + $0x198] sm:$0xff]  ;;  %v662_v61 = vmul.f32 %v5914_v4, %v5914_v4  ;;  %v921_v43 = vsel %vm920_vm8, %v5807_v51, %v917_v6 }
 0x169   : > { %v927_v46 = vmul.f32 %v5858_v2, %v926_v3  ;;  %7183 = vst [vmem:[#allocation36_spill] sm:$0xff] %v5932_v40  ;;  %v504_v59 = vadd.f32 %v5925_v20, %v5922_v28  ;;  %v663_v3 = vmul.f32 %v5917_v11, %v5917_v11  ;;  %v1184_v51 = vmul.f32 %v921_v43, %v5540_v31 }
 0x16a   : > { %7184 = vst [vmem:[#allocation37_spill] sm:$0xff] %v5934_v7 }
 0x16b   : > { %v485_v19 = vpop.xlane.xlu0 %484  ;;  %v931_v60 = vsel %vm930_vm7, %v5858_v2, %v927_v46  ;;  %v743_v24 = vadd.f32 %v663_v3, %v662_v61  ;;  %v1253_v31 = vmul.f32 %v5671_v10, %v1184_v51  ;;  %v5991_v61 = vld [vmem:[%s5386_s20 + $0x1b8] sm:$0xff] }
 0x16c   : > { %v550_v14 = vmul.f32 %v5448_v33, %v485_v19  ;;  %v1186_v2 = vmul.f32 %v931_v60, %v5567_v44  ;;  %v1187_v37 = vmul.f32 %v931_v60, %v5570_v45  ;;  %v1185_v44 = vmul.f32 %v921_v43, %v5543_v32  ;;  %v6000_v43 = vld [vmem:[%s5386_s20 + $0x1c0] sm:$0xff] }
 0x16d   : > { %v1322_v19 = vadd.f32 %v5684_v21, %v1253_v31 }
 0x16e   : > { %502 = vadd.xlane.f32.xlu0 %v501_v27  ;;  %v5955_v56 = vsub.f32 %v5614_v13, %v550_v14  ;;  %v5958_v57 = vsub.f32 %v5617_v16, %v550_v14  ;;  %v1255_v45 = vmul.f32 %v5671_v10, %v1186_v2  ;;  %v1256_v27 = vmul.f32 %v5673_v17, %v1187_v37  ;;  %v5988_v14 = vld [vmem:[%s5386_s20 + $0x1b0] sm:$0xff]  ;;  %v6003_v2 = vld [vmem:[%s5386_s20 + $0x1c8] sm:$0xff] }
 0x16f   : > { %v507_v13 = vadd.f32 %v5965_v49, %v5962_v36  ;;  %v1254_v32 = vmul.f32 %v5673_v17, %v1185_v44  ;;  %v510_v3 = vadd.f32 %v5991_v61, %v5988_v14  ;;  %v513_v37 = vadd.f32 %v6003_v2, %v6000_v43 }
 0x170   : > { %496 = vadd.xlane.f32.xlu2 %v495_v12  ;;  %505 = vadd.xlane.f32.xlu1 %v504_v59  ;;  %7185 = vst [vmem:[#allocation38_spill] sm:$0xff] %v5955_v56  ;;  %v664_v16 = vmul.f32 %v5955_v56, %v5955_v56  ;;  %v665_v46 = vmul.f32 %v5958_v57, %v5958_v57 }
 0x171   : > { %7186 = vst [vmem:[#allocation39_spill] sm:$0xff] %v5958_v57  ;;  %v1324_v12 = vadd.f32 %v5684_v21, %v1255_v45  ;;  %v1325_v47 = vadd.f32 %v5688_v9, %v1256_v27  ;;  %v1323_v6 = vadd.f32 %v5688_v9, %v1254_v32 }
 0x172   : > { %2000 = vmatmul.bf16.gmra.mxu0 %v5932_v40  ;;  %2089 = vmatmul.bf16.gmra.mxu1 %v5934_v7  ;;  %v746_v63 = vadd.f32 %v665_v46, %v664_v16 }
 0x173   : > { %2178 = vmatmul.bf16.gmra.mxu2 %v5932_v40  ;;  %2267 = vmatmul.bf16.gmra.mxu3 %v5934_v7  ;;  %v5983_v59 = vpack.c.bf16 %v1324_v12, %v1322_v19  ;;  %v5985_v60 = vpack.c.bf16 %v1325_v47, %v1323_v6 }
 0x175   : > { %7187 = vst [vmem:[#allocation40_spill] sm:$0xff] %v5983_v59 }
 0x176   : > { %7188 = vst [vmem:[#allocation41_spill] sm:$0xff] %v5985_v60 }
 0x178   : > { %744 = vadd.xlane.f32.xlu2 %v743_v24  ;;  %508 = vadd.xlane.f32.xlu1 %v507_v13  ;;  %v796_v24 = vmul.f32 %v5819_v54, %v5448_v33 }
 0x17a   : > { %v828_v51 = vadd.f32 1e-05, %v796_v24 }
 0x17c   : > { %4902 = vrsqrt.f32 %v828_v51  ;;  %vm938_vm9 = vweird.f32 %v828_v51 }
 0x180   : > { %747 = vadd.xlane.f32.xlu2 %v746_v63 }
 0x182   : > { %2005 = vmatmul.bf16.gmra.mxu0 %v5983_v59  ;;  %2094 = vmatmul.bf16.gmra.mxu1 %v5985_v60  ;;  %v4903_v44 = vpop.eup %4902 }
 0x183   : > { %2183 = vmatmul.bf16.gmra.mxu2 %v5983_v59  ;;  %2272 = vmatmul.bf16.gmra.mxu3 %v5985_v60  ;;  %v933_v45 = vmul.f32 %v4903_v44, %v828_v51  ;;  %vm939_vm10 = vweird.f32 %v4903_v44  ;;  %v7190_v60 = vld [vmem:[#allocation25_spill] sm:$0xff] }
 0x184   : > { %vm940_vm11 = vmor %vm938_vm9, %vm939_vm10 }
 0x185   : > { %v934_v27 = vmul.f32 %v4903_v44, %v933_v45 }
 0x187   : > { %v935_v46 = vmul.f32 0.5, %v934_v27 }
 0x188   : > { %511 = vadd.xlane.f32.xlu2 %v510_v3 }
 0x189   : > { %v936_v32 = vsub.f32 1.5, %v935_v46 }
 0x18b   : > { %v937_v19 = vmul.f32 %v4903_v44, %v936_v32 }
 0x190   : > { %514 = vadd.xlane.f32.xlu2 %v513_v37  ;;  %v941_v37 = vsel %vm940_vm11, %v4903_v44, %v937_v19 }
 0x191   : > { %v1188_v27 = vmul.f32 %v941_v37, %v5586_v62 }
 0x193   : > { %v1257_v62 = vmul.f32 %v5671_v10, %v1188_v27 }
 0x195   : > { %v1326_v40 = vadd.f32 %v5684_v21, %v1257_v62 }
 0x1af   : > { %v721_v13 = vpop.xlane.xlu1 %720 }
 0x1b0   : > { %v797_v16 = vmul.f32 %v721_v13, %v5448_v33 }
 0x1b2   : > { %v829_v31 = vadd.f32 1e-05, %v797_v16  ;;  %v7189_v16 = vld [vmem:[#allocation20_spill] sm:$0xff] }
 0x1b3   : > { %v1189_v46 = vmul.f32 %v941_v37, %v7189_v16 }
 0x1b4   : > { %4904 = vrsqrt.f32 %v829_v31  ;;  %vm948_vm13 = vweird.f32 %v829_v31 }
 0x1b7   : > { %v724_v12 = vpop.xlane.xlu1 %723 }
 0x1b8   : > { %v798_v47 = vmul.f32 %v724_v12, %v5448_v33 }
 0x1ba   : > { %v4905_v63 = vpop.eup %4904  ;;  %v6011_v6 = vadd.f32 1e-05, %v798_v47 }
 0x1bb   : > { %v943_v54 = vmul.f32 %v4905_v63, %v829_v31  ;;  %vm949_vm12 = vweird.f32 %v4905_v63  ;;  %v1258_v31 = vmul.f32 %v5673_v17, %v1189_v46 }
 0x1bc   : > { %4906 = vrsqrt.f32 %v6011_v6  ;;  %vm950_vm14 = vmor %vm948_vm13, %vm949_vm12  ;;  %vm958_vm0 = vweird.f32 %v6011_v6 }
 0x1bd   : > { %v944_v3 = vmul.f32 %v4905_v63, %v943_v54  ;;  %v7192_v54 = vld [vmem:[#allocation26_spill] sm:$0xff]  ;;  %v1327_v30 = vadd.f32 %v5688_v9, %v1258_v31 }
 0x1bf   : > { %v945_v24 = vmul.f32 0.5, %v944_v3  ;;  %v488_v45 = vpop.xlane.xlu1 %487 }
 0x1c0   : > { %v551_v51 = vmul.f32 %v5448_v33, %v488_v45  ;;  %v7195_v45 = vld [vmem:[#allocation22_spill] sm:$0xff] }
 0x1c1   : > { %v946_v13 = vsub.f32 1.5, %v945_v24  ;;  %v7194_v24 = vld [vmem:[#allocation21_spill] sm:$0xff] }
 0x1c2   : > { %v4907_v12 = vpop.eup %4906  ;;  %v6018_v47 = vsub.f32 %v7190_v60, %v551_v51  ;;  %v6021_v59 = vsub.f32 %v7192_v54, %v551_v51 }
 0x1c3   : > { %v947_v32 = vmul.f32 %v4905_v63, %v946_v13  ;;  %v953_v44 = vmul.f32 %v4907_v12, %v6011_v6  ;;  %vm959_vm15 = vweird.f32 %v4907_v12 }
 0x1c4   : > { %7191 = vst [vmem:[#allocation20_spill] sm:$0xff] %v6018_v47  ;;  %v666_v3 = vmul.f32 %v6018_v47, %v6018_v47  ;;  %v667_v37 = vmul.f32 %v6021_v59, %v6021_v59  ;;  %vm960_vm1 = vmor %vm958_vm0, %vm959_vm15 }
 0x1c5   : > { %7193 = vst [vmem:[#allocation25_spill] sm:$0xff] %v6021_v59  ;;  %v951_v19 = vsel %vm950_vm14, %v4905_v63, %v947_v32  ;;  %v954_v51 = vmul.f32 %v4907_v12, %v953_v44  ;;  %v7196_v44 = vld [vmem:[#allocation27_spill] sm:$0xff] }
 0x1c6   : > { %v1190_v60 = vmul.f32 %v951_v19, %v7194_v24  ;;  %v1191_v13 = vmul.f32 %v951_v19, %v7195_v45  ;;  %v749_v16 = vadd.f32 %v667_v37, %v666_v3  ;;  %v7198_v37 = vld [vmem:[#allocation28_spill] sm:$0xff] }
 0x1c7   : > { %v955_v27 = vmul.f32 0.5, %v954_v51  ;;  %v491_v63 = vpop.xlane.xlu1 %490 }
 0x1c8   : > { %v1259_v54 = vmul.f32 %v5671_v10, %v1190_v60  ;;  %v1260_v7 = vmul.f32 %v5673_v17, %v1191_v13  ;;  %v552_v32 = vmul.f32 %v5448_v33, %v491_v63  ;;  %750 = vadd.xlane.f32.xlu0 %v749_v16 }
 0x1c9   : > { %v733_v19 = vpop.xlane.xlu0 %732  ;;  %v956_v51 = vsub.f32 1.5, %v955_v27 }
 0x1ca   : > { %v1328_v46 = vadd.f32 %v5684_v21, %v1259_v54  ;;  %v1329_v24 = vadd.f32 %v5688_v9, %v1260_v7  ;;  %v6040_v3 = vsub.f32 %v7196_v44, %v552_v32  ;;  %v6043_v60 = vsub.f32 %v7198_v37, %v552_v32 }
 0x1cb   : > { %v727_v16 = vpop.xlane.xlu2 %726  ;;  %v801_v62 = vmul.f32 %v733_v19, %v5448_v33  ;;  %v6070_v19 = vld [vmem:[%s5386_s20 + $0x1d8] sm:$0xff] }
 0x1cc   : > { %7197 = vst [vmem:[#allocation26_spill] sm:$0xff] %v6040_v3  ;;  %v6045_v45 = vpack.c.bf16 %v1328_v46, %v1326_v40  ;;  %v6047_v13 = vpack.c.bf16 %v1329_v24, %v1327_v30  ;;  %v799_v31 = vmul.f32 %v727_v16, %v5448_v33  ;;  %v668_v7 = vmul.f32 %v6040_v3, %v6040_v3  ;;  %v6067_v24 = vld [vmem:[%s5386_s20 + $0x1d0] sm:$0xff] }
 0x1cd   : > { %7199 = vst [vmem:[#allocation21_spill] sm:$0xff] %v6043_v60  ;;  %v669_v54 = vmul.f32 %v6043_v60, %v6043_v60  ;;  %v6055_v63 = vadd.f32 1e-05, %v801_v62  ;;  %v957_v46 = vmul.f32 %v4907_v12, %v956_v51 }
 0x1ce   : > { %7200 = vst [vmem:[#allocation22_spill] sm:$0xff] %v6045_v45  ;;  %2010 = vmatmul.bf16.gmra.mxu0 %v6045_v45  ;;  %2099 = vmatmul.bf16.gmra.mxu1 %v6047_v13  ;;  %v6059_v30 = vadd.f32 1e-05, %v799_v31  ;;  %v516_v31 = vadd.f32 %v6070_v19, %v6067_v24 }
 0x1cf   : > { %7201 = vst [vmem:[#allocation27_spill] sm:$0xff] %v6047_v13  ;;  %2188 = vmatmul.bf16.gmra.mxu2 %v6045_v45  ;;  %2277 = vmatmul.bf16.gmra.mxu3 %v6047_v13  ;;  %v1991_v40 = vpop.f32.mrf.mxu0  ;;  %v2080_v27 = vpop.f32.mrf.mxu1  ;;  %v752_v32 = vadd.f32 %v669_v54, %v668_v7  ;;  %4908 = vrsqrt.f32 %v6055_v63  ;;  %v961_v37 = vsel %vm960_vm1, %v4907_v12, %v957_v46  ;;  %v7204_v13 = vld [vmem:[#allocation23_spill] sm:$0xff]  ;;  %vm988_vm2 = vweird.f32 %v6055_v63 }
 0x1d0   : > { %4910 = vrsqrt.f32 %v6059_v30  ;;  %7202 = vst [vmem:[#allocation28_spill] sm:$0xff] %v6067_v24  ;;  %v1192_v45 = vmul.f32 %v961_v37, %v7204_v13  ;;  %v2081_v59 = vadd.f32 %v2080_v27, %v1991_v40  ;;  %vm968_vm5 = vweird.f32 %v6059_v30 }
 0x1d1   : > { %753 = vadd.xlane.f32.xlu0 %v752_v32  ;;  %7203 = vst [vmem:[#allocation42_spill] sm:$0xff] %v6070_v19  ;;  %v736_v44 = vpop.xlane.xlu0 %735 }
 0x1d2   : > { %v802_v62 = vmul.f32 %v736_v44, %v5448_v33 }
 0x1d3   : > { %v730_v16 = vpop.xlane.xlu2 %729  ;;  %v739_v55 = vpop.xlane.xlu1 %738 }
 0x1d4   : > { %v800_v51 = vmul.f32 %v730_v16, %v5448_v33  ;;  %v6078_v54 = vadd.f32 1e-05, %v802_v62  ;;  %v1193_v16 = vmul.f32 %v961_v37, %v7205_v26  ;;  %v803_v13 = vmul.f32 %v739_v55, %v5448_v33 }
 0x1d5   : > { %v6076_v7 = vpop.eup %4908  ;;  %v1261_v26 = vmul.f32 %v5671_v10, %v1192_v45 }
 0x1d6   : > { %v2169_v6 = vpop.f32.mrf.mxu2  ;;  %v4911_v32 = vpop.eup %4910  ;;  %v983_v12 = vmul.f32 %v6076_v7, %v6055_v63  ;;  %v6083_v46 = vadd.f32 1e-05, %v800_v51  ;;  %4912 = vrsqrt.f32 %v6078_v54  ;;  %v6097_v24 = vadd.f32 1e-05, %v803_v13 }
 0x1d7   : > { %v2258_v44 = vpop.f32.mrf.mxu3  ;;  %v963_v29 = vmul.f32 %v4911_v32, %v6059_v30  ;;  %v1993_v62 = vpop.f32.mrf.mxu0  ;;  %v1262_v57 = vmul.f32 %v5673_v17, %v1193_v16  ;;  %vm989_vm3 = vweird.f32 %v6076_v7  ;;  %vm969_vm4 = vweird.f32 %v4911_v32 }
 0x1d8   : > { %v2082_v60 = vpop.f32.mrf.mxu1  ;;  %v984_v3 = vmul.f32 %v6076_v7, %v983_v12  ;;  %4914 = vrsqrt.f32 %v6083_v46  ;;  %v2259_v47 = vadd.f32 %v2258_v44, %v2169_v6  ;;  %v1330_v40 = vadd.f32 %v5684_v21, %v1261_v26  ;;  %vm6124_vm6 = vmor %vm988_vm2, %vm989_vm3 }
 0x1d9   : > { %517 = vadd.xlane.f32.xlu0 %v516_v31  ;;  %v964_v51 = vmul.f32 %v4911_v32, %v963_v29  ;;  %v6094_v19 = vadd.f32 %v2082_v60, %v1993_v62  ;;  %4916 = vrsqrt.f32 %v6097_v24  ;;  %v500_v60 = vpop.xlane.xlu0 %499  ;;  %vm970_vm7 = vmor %vm968_vm5, %vm969_vm4  ;;  %vm978_vm8 = vweird.f32 %v6083_v46 }
 0x1da   : > { %v985_v37 = vmul.f32 0.5, %v984_v3  ;;  %v3050_v15 = vpack.c.bf16 %v2259_v47, %v2081_v59  ;;  %vm998_vm9 = vweird.f32 %v6078_v54  ;;  %vm1008_vm10 = vweird.f32 %v6097_v24 }
 0x1db   : > { %v965_v56 = vmul.f32 0.5, %v964_v51  ;;  %v494_v12 = vpop.xlane.xlu2 %493  ;;  %v4492_v41 = vpack.c.bf16 %v6094_v19, %v2081_v59  ;;  %v742_v31 = vpop.xlane.xlu1 %741 }
 0x1dc   : > { %v986_v55 = vsub.f32 1.5, %v985_v37  ;;  %v6104_v29 = vpop.eup %4912  ;;  %v3274_v45 = vrot.slane %v3050_v15, 4  ;;  %v1331_v15 = vadd.f32 %v5688_v9, %v1262_v57  ;;  %v804_v63 = vmul.f32 %v742_v31, %v5448_v33 }
 0x1dd   : > { %v966_v3 = vsub.f32 1.5, %v965_v56  ;;  %4493 = vst [vmem:[%s6107_s2] sm:$0xff] %v4492_v41   ;;  %v993_v27 = vmul.f32 %v6104_v29, %v6078_v54  ;;  %v553_v26 = vmul.f32 %v5448_v33, %v494_v12  ;;  %v555_v37 = vmul.f32 %v5448_v33, %v500_v60 }
 0x1de   : > { %v6110_v47 = vpop.f32.mrf.mxu2  ;;  %v4915_v59 = vpop.eup %4914  ;;  %v987_v44 = vmul.f32 %v6076_v7, %v986_v55  ;;  %4282 = vst [vmem:[%s6107_s2 + $0x80] sm:$0xf] %v3274_v45  ;;  %v6151_v12 = vadd.f32 1e-05, %v804_v63  ;;  %vm999_vm11 = vweird.f32 %v6104_v29 }
 0x1df   : > { %v6116_v56 = vpop.f32.mrf.mxu3  ;;  %v967_v6 = vmul.f32 %v4911_v32, %v966_v3  ;;  %v973_v30 = vmul.f32 %v4915_v59, %v6083_v46  ;;  %v6130_v16 = vpop.f32.mrf.mxu0  ;;  %v994_v57 = vmul.f32 %v6104_v29, %v993_v27  ;;  %vm979_vm12 = vweird.f32 %v4915_v59  ;;  %vm1000_vm13 = vmor %vm998_vm9, %vm999_vm11 }
 0x1e0   : > { %v6132_v62 = vpop.f32.mrf.mxu1  ;;  %v6141_v55 = vpop.eup %4916  ;;  %v991_v27 = vsel %vm6124_vm6, %v6076_v7, %v987_v44  ;;  %v6158_v7 = vsub.f32 %v5862_v42, %v553_v26  ;;  %4918 = vrsqrt.f32 %v6151_v12  ;;  %vm980_vm14 = vmor %vm978_vm8, %vm979_vm12  ;;  %vm1018_vm2 = vweird.f32 %v6151_v12 }
 0x1e1   : > { %v971_v13 = vsel %vm970_vm7, %v4911_v32, %v967_v6  ;;  %v974_v51 = vmul.f32 %v4915_v59, %v973_v30  ;;  %v995_v11 = vmul.f32 0.5, %v994_v57  ;;  %v1003_v32 = vmul.f32 %v6141_v55, %v6097_v24 }
 0x1e2   : > { %v1194_v3 = vmul.f32 %v971_v13, %v5745_v50  ;;  %v1195_v45 = vmul.f32 %v971_v13, %v5748_v22  ;;  %v1198_v13 = vmul.f32 %v991_v27, %v5724_v58  ;;  %vm1009_vm15 = vweird.f32 %v6141_v55 }
 0x1e3   : > { %v975_v31 = vmul.f32 0.5, %v974_v51  ;;  %v497_v60 = vpop.xlane.xlu2 %496  ;;  %v996_v30 = vsub.f32 1.5, %v995_v11  ;;  %v1004_v57 = vmul.f32 %v6141_v55, %v1003_v32  ;;  %vm6199_vm0 = vmor %vm1008_vm10, %vm1009_vm15 }
 0x1e4   : > { %v1263_v6 = vmul.f32 %v5671_v10, %v1194_v3  ;;  %v1264_v50 = vmul.f32 %v5673_v17, %v1195_v45  ;;  %v1199_v3 = vmul.f32 %v991_v27, %v5730_v34  ;;  %v6185_v34 = vsub.f32 %v5865_v0, %v553_v26 }
 0x1e5   : > { %v976_v22 = vsub.f32 1.5, %v975_v31  ;;  %v997_v51 = vmul.f32 %v6104_v29, %v996_v30  ;;  %v1005_v42 = vmul.f32 0.5, %v1004_v57 }
 0x1e6   : > { %v6160_v44 = vpop.f32.mrf.mxu2  ;;  %v1332_v41 = vadd.f32 %v5684_v21, %v1263_v6  ;;  %v1333_v63 = vadd.f32 %v5688_v9, %v1264_v50  ;;  %v1267_v50 = vmul.f32 %v5671_v10, %v1198_v13  ;;  %v1268_v46 = vmul.f32 %v5673_v17, %v1199_v3  ;;  %v6211_v24 = vpop.eup %4918 }
 0x1e7   : > { %v6166_v11 = vpop.f32.mrf.mxu3  ;;  %v977_v45 = vmul.f32 %v4915_v59, %v976_v22  ;;  %v6172_v31 = vpop.f32.mrf.mxu0  ;;  %v1006_v27 = vsub.f32 1.5, %v1005_v42  ;;  %v6215_v13 = vsub.f32 %v5856_v5, %v555_v37  ;;  %vm1019_vm4 = vweird.f32 %v6211_v24 }
 0x1e8   : > { %v6174_v32 = vpop.f32.mrf.mxu1  ;;  %v6176_v6 = vpack.c.bf16 %v1332_v41, %v1330_v40  ;;  %v6178_v58 = vpack.c.bf16 %v1333_v63, %v1331_v15  ;;  %v1001_v40 = vsel %vm1000_vm13, %v6104_v29, %v997_v51  ;;  %v6191_v15 = vsub.f32 %v5853_v1, %v555_v37  ;;  %v503_v22 = vpop.xlane.xlu0 %502  ;;  %vm6401_vm6 = vmor %vm1018_vm2, %vm1019_vm4 }
 0x1e9   : > { %v981_v54 = vsel %vm980_vm14, %v4915_v59, %v977_v45  ;;  %v1007_v0 = vmul.f32 %v6141_v55, %v1006_v27  ;;  %v506_v1 = vpop.xlane.xlu1 %505  ;;  %v554_v41 = vmul.f32 %v5448_v33, %v497_v60  ;;  %v1200_v63 = vmul.f32 %v1001_v40, %v5766_v8 }
 0x1ea   : > { %7208 = vst [vmem:[#allocation23_spill] sm:$0xff] %v6178_v58  ;;  %v1196_v30 = vmul.f32 %v981_v54, %v5781_v39  ;;  %2015 = vmatmul.bf16.gmra.mxu0 %v6176_v6  ;;  %v1197_v57 = vmul.f32 %v981_v54, %v5790_v48  ;;  %v670_v39 = vmul.f32 %v6158_v7, %v6158_v7 }
 0x1eb   : > { %2104 = vmatmul.bf16.gmra.mxu1 %v6178_v58  ;;  %v745_v29 = vpop.xlane.xlu2 %744  ;;  %v671_v48 = vmul.f32 %v6185_v34, %v6185_v34  ;;  %2193 = vmatmul.bf16.gmra.mxu2 %v6176_v6  ;;  %v1336_v3 = vadd.f32 %v5684_v21, %v1267_v50  ;;  %v1201_v60 = vmul.f32 %v1001_v40, %v5769_v53 }
 0x1ec   : > { %v1265_v26 = vmul.f32 %v5671_v10, %v1196_v30  ;;  %2282 = vmatmul.bf16.gmra.mxu3 %v6178_v58  ;;  %v1011_v45 = vsel %vm6199_vm0, %v6141_v55, %v1007_v0  ;;  %v556_v42 = vmul.f32 %v5448_v33, %v503_v22  ;;  %v1337_v8 = vadd.f32 %v5688_v9, %v1268_v46 }
 0x1ed   : > { %v1266_v5 = vmul.f32 %v5673_v17, %v1197_v57  ;;  %v755_v37 = vadd.f32 %v671_v48, %v670_v39  ;;  %v674_v27 = vmul.f32 %v6191_v15, %v6191_v15  ;;  %v1013_v30 = vmul.f32 %v6211_v24, %v6151_v12  ;;  %v4475_v12 = vld [vmem:[#allocation8 + $0x2ac] sm:$0xf] }
 0x1ee   : > { %v6218_v51 = vpop.f32.mrf.mxu2  ;;  %v1334_v55 = vadd.f32 %v5684_v21, %v1265_v26  ;;  %v6240_v40 = vsub.f32 %v5899_v25, %v554_v41  ;;  %v6243_v22 = vsub.f32 %v5902_v35, %v554_v41  ;;  %v1269_v46 = vmul.f32 %v5671_v10, %v1200_v63  ;;  %v6260_v41 = vld [vmem:[%s5386_s20 + $0x1e0] sm:$0xff] }
 0x1ef   : > { %v6226_v54 = vpop.f32.mrf.mxu3  ;;  %v6232_v50 = vpop.f32.mrf.mxu0  ;;  %v1202_v57 = vmul.f32 %v1011_v45, %v5810_v52  ;;  %756 = vadd.xlane.f32.xlu1 %v755_v37  ;;  %v675_v0 = vmul.f32 %v6215_v13, %v6215_v13  ;;  %v2261_v59 = vadd.f32 %v6116_v56, %v6110_v47  ;;  %v1270_v39 = vmul.f32 %v5673_v17, %v1201_v60  ;;  %v6263_v52 = vld [vmem:[%s5386_s20 + $0x1e8] sm:$0xff] }
 0x1f0   : > { %v6234_v53 = vpop.f32.mrf.mxu1  ;;  %v6253_v26 = vsub.f32 %v5891_v23, %v556_v42  ;;  %v6256_v25 = vsub.f32 %v5894_v18, %v556_v42  ;;  %v805_v35 = vmul.f32 %v745_v29, %v5448_v33  ;;  %v1335_v48 = vadd.f32 %v5688_v9, %v1266_v5 }
 0x1f1   : > { %v761_v63 = vadd.f32 %v675_v0, %v674_v27  ;;  %v3053_v37 = vpack.c.bf16 %v2261_v59, %v6094_v19  ;;  %v557_v47 = vmul.f32 %v5448_v33, %v506_v1  ;;  %v6270_v23 = vpack.c.bf16 %v1336_v3, %v1334_v55  ;;  %v509_v27 = vpop.xlane.xlu1 %508 }
 0x1f2   : > { %v1203_v18 = vmul.f32 %v1011_v45, %v5813_v38  ;;  %v1014_v29 = vmul.f32 %v6211_v24, %v1013_v30  ;;  %v6274_v60 = vadd.f32 1e-05, %v805_v35  ;;  %v1271_v42 = vmul.f32 %v5671_v10, %v1202_v57 }
 0x1f3   : > { %v6268_v56 = vpop.xlane.xlu2 %747  ;;  %7211 = vst [vmem:[#allocation24_spill] sm:$0xff] %v6270_v23  ;;  %762 = vadd.xlane.f32.xlu2 %v761_v63  ;;  %v3275_v5 = vrot.slane %v3053_v37, 4  ;;  %v519_v19 = vadd.f32 %v6263_v52, %v6260_v41  ;;  %v672_v1 = vmul.f32 %v6240_v40, %v6240_v40  ;;  %v2086_v3 = vadd.f32 %v6132_v62, %v6130_v16 }
 0x1f4   : > { %4920 = vrsqrt.f32 %v6274_v60  ;;  %v673_v38 = vmul.f32 %v6243_v22, %v6243_v22  ;;  %v676_v45 = vmul.f32 %v6253_v26, %v6253_v26  ;;  %v6290_v55 = vsub.f32 %v5922_v28, %v557_v47 }
 0x1f5   : > { %4283 = vst [vmem:[%s6107_s2 + $0x84] sm:$0xf] %v3275_v5  ;;  %520 = vadd.xlane.f32.xlu0 %v519_v19  ;;  %v677_v30 = vmul.f32 %v6256_v25, %v6256_v25  ;;  %v2264_v57 = vadd.f32 %v6166_v11, %v6160_v44  ;;  %v6296_v59 = vmul.f32 0.5, %v1014_v29  ;;  %v6299_v35 = vsub.f32 %v5925_v20, %v557_v47  ;;  %v6314_v47 = vld [vmem:[%s5386_s20 + $0x1f0] sm:$0xff] }
 0x1f6   : > { %v2179_v0 = vpop.f32.mrf.mxu2  ;;  %v758_v63 = vadd.f32 %v673_v38, %v672_v1  ;;  %v558_v28 = vmul.f32 %v5448_v33, %v509_v27  ;;  %v6302_v5 = vpack.c.bf16 %v1337_v8, %v1335_v48  ;;  %v2088_v44 = vadd.f32 %v6174_v32, %v6172_v31  ;;  %v6317_v1 = vld [vmem:[%s5386_s20 + $0x1f8] sm:$0xff] }
 0x1f7   : > { %v2268_v16 = vpop.f32.mrf.mxu3  ;;  %v2003_v62 = vpop.f32.mrf.mxu0  ;;  %v764_v19 = vadd.f32 %v677_v30, %v676_v45  ;;  %v3056_v58 = vpack.c.bf16 %v2264_v57, %v2086_v3  ;;  %v6307_v11 = vadd.f32 %v5684_v21, %v1269_v46  ;;  %v6310_v29 = vadd.f32 %v5688_v9, %v1270_v39 }
 0x1f8   : > { %v2092_v37 = vpop.f32.mrf.mxu1  ;;  %7212 = vst [vmem:[#allocation43_spill] sm:$0xff] %v6302_v5  ;;  %v1272_v20 = vmul.f32 %v5673_v17, %v1203_v18  ;;  %759 = vadd.xlane.f32.xlu1 %v758_v63  ;;  %v6320_v48 = vsub.f32 %v5962_v36, %v558_v28  ;;  %v4497_v27 = vpack.c.bf16 %v2088_v44, %v2086_v3  ;;  %vm1028_vm1 = vweird.f32 %v6274_v60 }
 0x1f9   : > { %v3276_v8 = vrot.slane %v3056_v58, 4  ;;  %v678_v31 = vmul.f32 %v6290_v55, %v6290_v55  ;;  %v1340_v39 = vadd.f32 %v5684_v21, %v1271_v42  ;;  %v679_v36 = vmul.f32 %v6299_v35, %v6299_v35 }
 0x1fa   : > { %2020 = vmatmul.bf16.gmra.mxu0 %v6270_v23  ;;  %v6326_v46 = vpop.eup %4920  ;;  %v6339_v3 = vsub.f32 %v5965_v49, %v558_v28  ;;  %v522_v42 = vadd.f32 %v6317_v1, %v6314_v47  ;;  %4729 = vst [vmem:[%s6107_s2 + $0x8] sm:$0xff] %v4497_v27   ;;  %v2266_v30 = vadd.f32 %v6226_v54, %v6218_v51 }
 0x1fb   : > { %2109 = vmatmul.bf16.gmra.mxu1 %v6302_v5  ;;  %v512_v32 = vpop.xlane.xlu2 %511  ;;  %2198 = vmatmul.bf16.gmra.mxu2 %v6270_v23  ;;  %v1023_v18 = vmul.f32 %v6326_v46, %v6274_v60  ;;  %4284 = vst [vmem:[%s6107_s2 + $0x88] sm:$0xf] %v3276_v8  ;;  %vm1029_vm3 = vweird.f32 %v6326_v46  ;;  %v767_v45 = vadd.f32 %v679_v36, %v678_v31  ;;  %v4268_v23 = vld [vmem:[#allocation8 + $0x2d8] sm:$0xf] }
 0x1fc   : > { %765 = vadd.xlane.f32.xlu2 %v764_v19  ;;  %2287 = vmatmul.bf16.gmra.mxu3 %v6302_v5  ;;  %v559_v57 = vmul.f32 %v5448_v33, %v512_v32  ;;  %v2091_v49 = vadd.f32 %v6234_v53, %v6232_v50  ;;  %v680_v28 = vmul.f32 %v6320_v48, %v6320_v48  ;;  %vm6378_vm5 = vmor %vm1028_vm1, %vm1029_vm3 }
 0x1fd   : > { %v1024_v63 = vmul.f32 %v6326_v46, %v1023_v18  ;;  %v2269_v19 = vadd.f32 %v2268_v16, %v2179_v0  ;;  %768 = vadd.xlane.f32.xlu0 %v767_v45  ;;  %v3059_v5 = vpack.c.bf16 %v2266_v30, %v2088_v44  ;;  %v2093_v54 = vadd.f32 %v2092_v37, %v2003_v62  ;;  %v4433_v18 = vld [vmem:[#allocation8 + $0x15c] sm:$0xf]  ;;  %v4078_v0 = vld [vmem:[#allocation8 + $0x170] sm:$0xf0] }
 0x1fe   : > { %v2181_v38 = vpop.f32.mrf.mxu2  ;;  %v6355_v27 = vsub.f32 %v5988_v14, %v559_v57  ;;  %v6358_v51 = vsub.f32 %v5991_v61, %v559_v57  ;;  %v681_v50 = vmul.f32 %v6339_v3, %v6339_v3  ;;  %v4481_v62 = vld [vmem:[#allocation8 + $0x2dc] sm:$0xf]  ;;  %v4270_v37 = vld [vmem:[#allocation8 + $0x2f0] sm:$0xf0]  ;;  %v1341_v45 = vadd.f32 %v5688_v9, %v1272_v20  ;;  %v4484_v20 = vld [vmem:[#allocation8 + $0x2ec] sm:$0xf0] }
 0x1ff   : > { %v2270_v8 = vpop.f32.mrf.mxu3  ;;  %v2006_v58 = vpop.f32.mrf.mxu0  ;;  %v1025_v32 = vmul.f32 0.5, %v1024_v63  ;;  %v3062_v53 = vpack.c.bf16 %v2269_v19, %v2091_v49  ;;  %v3277_v16 = vrot.slane %v3059_v5, 4  ;;  %v4502_v44 = vpack.c.bf16 %v2093_v54, %v2091_v49  ;;  %v4076_v19 = vld [vmem:[#allocation8 + $0x158] sm:$0xf] }
 0x200   : > { %v2095_v31 = vpop.f32.mrf.mxu1  ;;  %v2271_v36 = vadd.f32 %v2270_v8, %v2181_v38  ;;  %523 = vadd.xlane.f32.xlu1 %v522_v42  ;;  %v682_v14 = vmul.f32 %v6355_v27, %v6355_v27  ;;  %v683_v61 = vmul.f32 %v6358_v51, %v6358_v51  ;;  %v4436_v42 = vld [vmem:[#allocation8 + $0x16c] sm:$0xf0]  ;;  %v6368_v5 = vpack.c.bf16 %v1340_v39, %v6307_v11 }
 0x201   : > { %v1026_v30 = vsub.f32 1.5, %v1025_v32  ;;  %v3278_v57 = vrot.slane %v3062_v53, 4  ;;  %4285 = vst [vmem:[%s6107_s2 + $0x8c] sm:$0xf] %v3277_v16  ;;  %v4081_v53 = vor.u32 %v4433_v18, %v4078_v0  ;;  %v770_v16 = vadd.f32 %v681_v50, %v680_v28  ;;  %v4427_v0 = vld [vmem:[#allocation8 + $0x12c] sm:$0xf] }
 0x202   : > { %v3065_v63 = vpack.c.bf16 %v2271_v36, %v2093_v54  ;;  %v773_v8 = vadd.f32 %v683_v61, %v682_v14  ;;  %v4273_v36 = vor.u32 %v4481_v62, %v4270_v37  ;;  %4730 = vst [vmem:[%s6107_s2 + $0x10] sm:$0xff] %v4502_v44   ;;  %v6391_v60 = vpack.c.bf16 %v1341_v45, %v6310_v29  ;;  %v4054_v28 = vld [vmem:[#allocation8 + $0x140] sm:$0xf0] }
 0x203   : > { %v515_v38 = vpop.xlane.xlu2 %514  ;;  %v1027_v32 = vmul.f32 %v6326_v46, %v1026_v30  ;;  %4286 = vst [vmem:[%s6107_s2 + $0x90] sm:$0xf] %v3278_v57  ;;  %2516 = vmatpush.bf16.msrb.mxu2 %v4081_v53  ;;  %v4269_v18 = vor.u32 %v4484_v20, %v4268_v23  ;;  %v7216_v50 = vsub.f32 1.5, %v6296_v59  ;;  %v2096_v44 = vadd.f32 %v2095_v31, %v2006_v58  ;;  %v4478_v58 = vld [vmem:[#allocation8 + $0x2bc] sm:$0xf0] }
 0x204   : > { %v560_v49 = vmul.f32 %v5448_v33, %v515_v38  ;;  %v3279_v11 = vrot.slane %v3065_v63, 4  ;;  %774 = vadd.xlane.f32.xlu2 %v773_v8  ;;  %7215 = vst [vmem:[#allocation44_spill] sm:$0xff] %v6391_v60  ;;  %2605 = vmatpush.bf16.msrb.mxu3 %v4273_v36  ;;  %v4077_v38 = vor.u32 %v4436_v42, %v4076_v19  ;;  %v4246_v63 = vld [vmem:[#allocation8 + $0x2c0] sm:$0xf0]  ;;  %v4052_v19 = vld [vmem:[#allocation8 + $0x128] sm:$0xf] }
 0x205   : > { %v1031_v29 = vsel %vm6378_vm5, %v6326_v46, %v1027_v32  ;;  %2427 = vmatpush.bf16.msrb.mxu1 %v4269_v18  ;;  %v4057_v42 = vor.u32 %v4427_v0, %v4054_v28  ;;  %v4244_v46 = vld [vmem:[#allocation8 + $0x2a8] sm:$0xf]  ;;  %v4249_v53 = vor.u32 %v4475_v12, %v4246_v63  ;;  %v7221_v18 = vld [vmem:[#allocation34_spill] sm:$0xff] }
 0x206   : > { %v2184_v39 = vpop.f32.mrf.mxu2  ;;  %v6385_v14 = vsub.f32 %v6000_v43, %v560_v49  ;;  %v6388_v61 = vsub.f32 %v6003_v2, %v560_v49  ;;  %4287 = vst [vmem:[%s6107_s2 + $0x94] sm:$0xf] %v3279_v11  ;;  %v1017_v43 = vmul.f32 %v6211_v24, %v7216_v50  ;;  %2338 = vmatpush.bf16.msrb.mxu0 %v4077_v38  ;;  %v4430_v49 = vld [vmem:[#allocation8 + $0x13c] sm:$0xf0]  ;;  %v7219_v11 = vld [vmem:[#allocation35_spill] sm:$0xff]  ;;  %v7220_v38 = vld [vmem:[#allocation33_spill] sm:$0xff] }
 0x207   : > { %v2273_v30 = vpop.f32.mrf.mxu3  ;;  %v2008_v57 = vpop.f32.mrf.mxu0  ;;  %v1206_v54 = vmul.f32 %v1031_v29, %v5914_v4  ;;  %2517 = vmatpush.bf16.msrb.mxu2 %v4057_v42 }
 0x208   : > { %v684_v23 = vmul.f32 %v6385_v14, %v6385_v14  ;;  %v2097_v62 = vpop.f32.mrf.mxu1  ;;  %v685_v59 = vmul.f32 %v6388_v61, %v6388_v61  ;;  %v2274_v37 = vadd.f32 %v2273_v30, %v2184_v39  ;;  %771 = vadd.xlane.f32.xlu1 %v770_v16  ;;  %v1021_v32 = vsel %vm6401_vm6, %v6211_v24, %v1017_v43 }
 0x209   : > { %v2098_v45 = vadd.f32 %v2097_v62, %v2008_v57  ;;  %v1207_v39 = vmul.f32 %v1031_v29, %v7219_v11  ;;  %v4053_v30 = vor.u32 %v4430_v49, %v4052_v19  ;;  %v4245_v57 = vor.u32 %v4478_v58, %v4244_v46  ;;  %2606 = vmatpush.bf16.msrb.mxu3 %v4249_v53  ;;  %v4030_v11 = vld [vmem:[#allocation8 + $0x110] sm:$0xf0]  ;;  %v4469_v53 = vld [vmem:[#allocation8 + $0x27c] sm:$0xf] }
 0x20a   : > { %2025 = vmatmul.bf16.gmra.mxu0 %v6368_v5  ;;  %v776_v31 = vadd.f32 %v685_v59, %v684_v23  ;;  %v3068_v8 = vpack.c.bf16 %v2274_v37, %v2096_v44  ;;  %v1204_v24 = vmul.f32 %v1021_v32, %v7220_v38  ;;  %v1205_v4 = vmul.f32 %v1021_v32, %v7221_v18 }
 0x20b   : > { %2114 = vmatmul.bf16.gmra.mxu1 %v6391_v60  ;;  %v4507_v20 = vpack.c.bf16 %v2098_v45, %v2096_v44  ;;  %2203 = vmatmul.bf16.gmra.mxu2 %v6368_v5  ;;  %v1275_v50 = vmul.f32 %v5671_v10, %v1206_v54  ;;  %v1276_v43 = vmul.f32 %v5673_v17, %v1207_v39  ;;  %v4421_v54 = vld [vmem:[#allocation8 + $0xfc] sm:$0xf] }
 0x20c   : > { %2292 = vmatmul.bf16.gmra.mxu3 %v6391_v60  ;;  %777 = vadd.xlane.f32.xlu0 %v776_v31  ;;  %v3280_v36 = vrot.slane %v3068_v8, 4  ;;  %v1273_v29 = vmul.f32 %v5671_v10, %v1204_v24  ;;  %v1274_v44 = vmul.f32 %v5673_v17, %v1205_v4  ;;  %v4033_v39 = vor.u32 %v4421_v54, %v4030_v11 }
 0x20d   : > { %4731 = vst [vmem:[%s6107_s2 + $0x18] sm:$0xff] %v4507_v20   ;;  %2339 = vmatpush.bf16.msrb.mxu0 %v4053_v30  ;;  %2428 = vmatpush.bf16.msrb.mxu1 %v4245_v57  ;;  %v1344_v62 = vadd.f32 %v5684_v21, %v1275_v50  ;;  %v1345_v59 = vadd.f32 %v5688_v9, %v1276_v43 }
 0x20e   : > { %v2186_v16 = vpop.f32.mrf.mxu2  ;;  %4288 = vst [vmem:[%s6107_s2 + $0x98] sm:$0xf] %v3280_v36  ;;  %v1342_v37 = vadd.f32 %v5684_v21, %v1273_v29  ;;  %v1343_v12 = vadd.f32 %v5688_v9, %v1274_v44  ;;  %v4222_v36 = vld [vmem:[#allocation8 + $0x290] sm:$0xf0]  ;;  %2518 = vmatpush.bf16.msrb.mxu2 %v4033_v39 }
 0x20f   : > { %v2275_v0 = vpop.f32.mrf.mxu3  ;;  %v7224_v44 = vld [vmem:[#allocation38_spill] sm:$0xff] }
 0x210   : > { %v2276_v28 = vadd.f32 %v2275_v0, %v2186_v16  ;;  %v6434_v63 = vpack.c.bf16 %v1344_v62, %v1342_v37  ;;  %v6436_v19 = vpack.c.bf16 %v1345_v59, %v1343_v12  ;;  %v4225_v16 = vor.u32 %v4469_v53, %v4222_v36  ;;  %v7225_v62 = vld [vmem:[#allocation39_spill] sm:$0xff]  ;;  %v7226_v12 = vld [vmem:[#allocation28_spill] sm:$0xff] }
 0x212   : > { %v3071_v2 = vpack.c.bf16 %v2276_v28, %v2098_v45  ;;  %7222 = vst [vmem:[#allocation35_spill] sm:$0xff] %v6434_v63  ;;  %v806_v45 = vmul.f32 %v6268_v56, %v5448_v33  ;;  %2607 = vmatpush.bf16.msrb.mxu3 %v4225_v16  ;;  %v7228_v16 = vld [vmem:[#allocation20_spill] sm:$0xff] }
 0x213   : > { %7223 = vst [vmem:[#allocation33_spill] sm:$0xff] %v6436_v19 }
 0x214   : > { %v3281_v23 = vrot.slane %v3071_v2, 4  ;;  %v838_v42 = vadd.f32 1e-05, %v806_v45 }
 0x216   : > { %4289 = vst [vmem:[%s6107_s2 + $0x9c] sm:$0xf] %v3281_v23  ;;  %4922 = vrsqrt.f32 %v838_v42  ;;  %vm1038_vm7 = vweird.f32 %v838_v42 }
 0x21a   : > { %2030 = vmatmul.bf16.gmra.mxu0 %v6434_v63 }
 0x21b   : > { %2119 = vmatmul.bf16.gmra.mxu1 %v6436_v19  ;;  %2208 = vmatmul.bf16.gmra.mxu2 %v6434_v63 }
 0x21c   : > { %2297 = vmatmul.bf16.gmra.mxu3 %v6436_v19  ;;  %v4923_v49 = vpop.eup %4922 }
 0x21d   : > { %v1033_v46 = vmul.f32 %v4923_v49, %v838_v42  ;;  %vm1039_vm8 = vweird.f32 %v4923_v49  ;;  %v7227_v42 = vld [vmem:[#allocation42_spill] sm:$0xff] }
 0x21e   : > { %vm1040_vm9 = vmor %vm1038_vm7, %vm1039_vm8 }
 0x21f   : > { %v1034_v58 = vmul.f32 %v4923_v49, %v1033_v46 }
 0x221   : > { %v1035_v20 = vmul.f32 0.5, %v1034_v58 }
 0x223   : > { %v1036_v30 = vsub.f32 1.5, %v1035_v20 }
 0x225   : > { %v1037_v38 = vmul.f32 %v4923_v49, %v1036_v30 }
 0x227   : > { %v1041_v4 = vsel %vm1040_vm9, %v4923_v49, %v1037_v38 }
 0x228   : > { %v1208_v23 = vmul.f32 %v1041_v4, %v7224_v44  ;;  %v1209_v59 = vmul.f32 %v1041_v4, %v7225_v62 }
 0x22a   : > { %v1277_v20 = vmul.f32 %v5671_v10, %v1208_v23  ;;  %v1278_v54 = vmul.f32 %v5673_v17, %v1209_v59 }
 0x23b   : > { %v751_v31 = vpop.xlane.xlu0 %750 }
 0x23c   : > { %v807_v8 = vmul.f32 %v751_v31, %v5448_v33 }
 0x23e   : > { %v839_v32 = vadd.f32 1e-05, %v807_v8 }
 0x240   : > { %4924 = vrsqrt.f32 %v839_v32  ;;  %vm1048_vm11 = vweird.f32 %v839_v32 }
 0x244   : > { %v754_v56 = vpop.xlane.xlu0 %753 }
 0x245   : > { %v808_v43 = vmul.f32 %v754_v56, %v5448_v33 }
 0x246   : > { %v4925_v57 = vpop.eup %4924 }
 0x247   : > { %v1043_v24 = vmul.f32 %v4925_v57, %v839_v32  ;;  %vm1049_vm10 = vweird.f32 %v4925_v57  ;;  %v6455_v58 = vadd.f32 1e-05, %v808_v43  ;;  %v7229_v32 = vld [vmem:[#allocation25_spill] sm:$0xff] }
 0x248   : > { %vm1050_vm12 = vmor %vm1048_vm11, %vm1049_vm10 }
 0x249   : > { %v1044_v18 = vmul.f32 %v4925_v57, %v1043_v24  ;;  %4926 = vrsqrt.f32 %v6455_v58  ;;  %vm1058_vm14 = vweird.f32 %v6455_v58 }
 0x24b   : > { %v2011_v0 = vpop.f32.mrf.mxu0  ;;  %v2100_v28 = vpop.f32.mrf.mxu1  ;;  %v1045_v50 = vmul.f32 0.5, %v1044_v18 }
 0x24c   : > { %v518_v2 = vpop.xlane.xlu0 %517  ;;  %v2101_v39 = vadd.f32 %v2100_v28, %v2011_v0  ;;  %v1346_v28 = vadd.f32 %v5684_v21, %v1277_v20 }
 0x24d   : > { %v561_v29 = vmul.f32 %v5448_v33, %v518_v2  ;;  %v1046_v37 = vsub.f32 1.5, %v1045_v50 }
 0x24f   : > { %v6450_v45 = vsub.f32 %v7226_v12, %v561_v29  ;;  %v6453_v46 = vsub.f32 %v7227_v42, %v561_v29  ;;  %v1047_v49 = vmul.f32 %v4925_v57, %v1046_v37  ;;  %v1347_v29 = vadd.f32 %v5688_v9, %v1278_v54  ;;  %v4927_v12 = vpop.eup %4926 }
 0x250   : > { %vm1059_vm13 = vweird.f32 %v4927_v12 }
 0x251   : > { %v686_v31 = vmul.f32 %v6450_v45, %v6450_v45  ;;  %v687_v8 = vmul.f32 %v6453_v46, %v6453_v46  ;;  %v1051_v11 = vsel %vm1050_vm12, %v4925_v57, %v1047_v49  ;;  %vm1060_vm15 = vmor %vm1058_vm14, %vm1059_vm13 }
 0x252   : > { %v2189_v53 = vpop.f32.mrf.mxu2  ;;  %v2278_v36 = vpop.f32.mrf.mxu3  ;;  %v1210_v30 = vmul.f32 %v1051_v11, %v7228_v16  ;;  %v1211_v56 = vmul.f32 %v1051_v11, %v7229_v32 }
 0x253   : > { %v2279_v38 = vadd.f32 %v2278_v36, %v2189_v53  ;;  %v2013_v24 = vpop.f32.mrf.mxu0  ;;  %v2102_v18 = vpop.f32.mrf.mxu1  ;;  %v779_v4 = vadd.f32 %v687_v8, %v686_v31  ;;  %v1053_v8 = vmul.f32 %v4927_v12, %v6455_v58  ;;  %v4424_v53 = vld [vmem:[#allocation8 + $0x10c] sm:$0xf0]  ;;  %v4220_v36 = vld [vmem:[#allocation8 + $0x278] sm:$0xf] }
 0x254   : > { %v2103_v50 = vadd.f32 %v2102_v18, %v2013_v24  ;;  %v1279_v43 = vmul.f32 %v5671_v10, %v1210_v30  ;;  %v1280_v57 = vmul.f32 %v5673_v17, %v1211_v56  ;;  %v4472_v56 = vld [vmem:[#allocation8 + $0x28c] sm:$0xf0] }
 0x255   : > { %v3074_v0 = vpack.c.bf16 %v2279_v38, %v2101_v39  ;;  %780 = vadd.xlane.f32.xlu1 %v779_v4  ;;  %v1054_v11 = vmul.f32 %v4927_v12, %v1053_v8  ;;  %v4221_v24 = vor.u32 %v4472_v56, %v4220_v36 }
 0x256   : > { %v4512_v2 = vpack.c.bf16 %v2103_v50, %v2101_v39  ;;  %v1348_v44 = vadd.f32 %v5684_v21, %v1279_v43  ;;  %v1349_v23 = vadd.f32 %v5688_v9, %v1280_v57  ;;  %v4028_v39 = vld [vmem:[#allocation8 + $0xf8] sm:$0xf] }
 0x257   : > { %v3282_v62 = vrot.slane %v3074_v0, 4  ;;  %v1055_v16 = vmul.f32 0.5, %v1054_v11  ;;  %v4029_v32 = vor.u32 %v4424_v53, %v4028_v39  ;;  %2429 = vmatpush.bf16.msrb.mxu1 %v4221_v24 }
 0x258   : > { %4732 = vst [vmem:[%s6107_s2 + $0x20] sm:$0xff] %v4512_v2   ;;  %v6473_v59 = vpack.c.bf16 %v1348_v44, %v1346_v28  ;;  %v6475_v37 = vpack.c.bf16 %v1349_v23, %v1347_v29 }
 0x259   : > { %4290 = vst [vmem:[%s6107_s2 + $0xa0] sm:$0xf] %v3282_v62  ;;  %2340 = vmatpush.bf16.msrb.mxu0 %v4029_v32  ;;  %v1056_v43 = vsub.f32 1.5, %v1055_v16 }
 0x25a   : > { %7230 = vst [vmem:[#allocation34_spill] sm:$0xff] %v6473_v59  ;;  %v2191_v42 = vpop.f32.mrf.mxu2  ;;  %v2280_v49 = vpop.f32.mrf.mxu3  ;;  %2035 = vmatmul.bf16.gmra.mxu0 %v6473_v59  ;;  %2124 = vmatmul.bf16.gmra.mxu1 %v6475_v37 }
 0x25b   : > { %7231 = vst [vmem:[#allocation38_spill] sm:$0xff] %v6475_v37  ;;  %v2281_v31 = vadd.f32 %v2280_v49, %v2191_v42  ;;  %2213 = vmatmul.bf16.gmra.mxu2 %v6473_v59  ;;  %2302 = vmatmul.bf16.gmra.mxu3 %v6475_v37  ;;  %v1057_v44 = vmul.f32 %v4927_v12, %v1056_v43 }
 0x25d   : > { %v3077_v20 = vpack.c.bf16 %v2281_v31, %v2103_v50  ;;  %v1061_v39 = vsel %vm1060_vm15, %v4927_v12, %v1057_v44  ;;  %v7232_v12 = vld [vmem:[#allocation26_spill] sm:$0xff]  ;;  %v7233_v44 = vld [vmem:[#allocation21_spill] sm:$0xff] }
 0x25f   : > { %v3283_v54 = vrot.slane %v3077_v20, 4 }
 0x261   : > { %4291 = vst [vmem:[%s6107_s2 + $0xa4] sm:$0xf] %v3283_v54 }
 0x262   : > { %v757_v30 = vpop.xlane.xlu1 %756 }
 0x263   : > { %v809_v38 = vmul.f32 %v757_v30, %v5448_v33 }
 0x265   : > { %v6485_v18 = vadd.f32 1e-05, %v809_v38 }
 0x266   : > { %v763_v50 = vpop.xlane.xlu2 %762 }
 0x267   : > { %v2016_v4 = vpop.f32.mrf.mxu0  ;;  %4928 = vrsqrt.f32 %v6485_v18  ;;  %v811_v0 = vmul.f32 %v763_v50, %v5448_v33  ;;  %v1212_v50 = vmul.f32 %v1061_v39, %v7232_v12  ;;  %vm1068_vm1 = vweird.f32 %v6485_v18 }
 0x268   : > { %v2105_v57 = vpop.f32.mrf.mxu1  ;;  %v521_v28 = vpop.xlane.xlu0 %520 }
 0x269   : > { %v6489_v2 = vadd.f32 1e-05, %v811_v0  ;;  %v562_v29 = vmul.f32 %v5448_v33, %v521_v28  ;;  %v2106_v16 = vadd.f32 %v2105_v57, %v2016_v4  ;;  %v1213_v4 = vmul.f32 %v1061_v39, %v7233_v44 }
 0x26b   : > { %4930 = vrsqrt.f32 %v6489_v2  ;;  %v760_v23 = vpop.xlane.xlu1 %759  ;;  %v6494_v62 = vsub.f32 %v6260_v41, %v562_v29  ;;  %v6497_v42 = vsub.f32 %v6263_v52, %v562_v29  ;;  %vm1088_vm3 = vweird.f32 %v6489_v2 }
 0x26c   : > { %v810_v49 = vmul.f32 %v760_v23, %v5448_v33 }
 0x26d   : > { %v4929_v31 = vpop.eup %4928  ;;  %v688_v8 = vmul.f32 %v6494_v62, %v6494_v62  ;;  %v689_v20 = vmul.f32 %v6497_v42, %v6497_v42 }
 0x26e   : > { %v2194_v54 = vpop.f32.mrf.mxu2  ;;  %v1063_v41 = vmul.f32 %v4929_v31, %v6485_v18  ;;  %v6506_v53 = vadd.f32 1e-05, %v810_v49  ;;  %vm1069_vm0 = vweird.f32 %v4929_v31 }
 0x26f   : > { %v2018_v11 = vpop.f32.mrf.mxu0  ;;  %v766_v52 = vpop.xlane.xlu2 %765  ;;  %v782_v30 = vadd.f32 %v689_v20, %v688_v8  ;;  %vm1070_vm2 = vmor %vm1068_vm1, %vm1069_vm0 }
 0x270   : > { %v2283_v36 = vpop.f32.mrf.mxu3  ;;  %v812_v58 = vmul.f32 %v766_v52, %v5448_v33  ;;  %v2107_v56 = vpop.f32.mrf.mxu1  ;;  %v1064_v38 = vmul.f32 %v4929_v31, %v1063_v41  ;;  %4932 = vrsqrt.f32 %v6506_v53  ;;  %vm1078_vm7 = vweird.f32 %v6506_v53 }
 0x271   : > { %v2284_v32 = vadd.f32 %v2283_v36, %v2194_v54  ;;  %v6510_v24 = vadd.f32 %v2107_v56, %v2018_v11  ;;  %v6512_v43 = vpop.eup %4930  ;;  %v769_v28 = vpop.xlane.xlu0 %768  ;;  %783 = vadd.xlane.f32.xlu2 %v782_v30  ;;  %v1281_v36 = vmul.f32 %v5671_v10, %v1212_v50  ;;  %v1282_v50 = vmul.f32 %v5673_v17, %v1213_v4 }
 0x272   : > { %v6515_v0 = vadd.f32 1e-05, %v812_v58  ;;  %v1065_v57 = vmul.f32 0.5, %v1064_v38  ;;  %v1083_v23 = vmul.f32 %v6512_v43, %v6489_v2  ;;  %v813_v49 = vmul.f32 %v769_v28, %v5448_v33 }
 0x273   : > { %v3080_v29 = vpack.c.bf16 %v2284_v32, %v2106_v16  ;;  %v524_v8 = vpop.xlane.xlu1 %523  ;;  %v4517_v54 = vpack.c.bf16 %v6510_v24, %v2106_v16  ;;  %v1350_v4 = vadd.f32 %v5684_v21, %v1281_v36  ;;  %vm1089_vm4 = vweird.f32 %v6512_v43 }
 0x274   : > { %4934 = vrsqrt.f32 %v6515_v0  ;;  %v1066_v11 = vsub.f32 1.5, %v1065_v57  ;;  %v1084_v41 = vmul.f32 %v6512_v43, %v1083_v23  ;;  %v563_v52 = vmul.f32 %v5448_v33, %v524_v8  ;;  %vm1090_vm5 = vmor %vm1088_vm3, %vm1089_vm4 }
 0x275   : > { %v3284_v20 = vrot.slane %v3080_v29, 4  ;;  %v6525_v39 = vadd.f32 1e-05, %v813_v49  ;;  %4733 = vst [vmem:[%s6107_s2 + $0x28] sm:$0xff] %v4517_v54   ;;  %v4415_v54 = vld [vmem:[#allocation8 + $0xcc] sm:$0xf]  ;;  %vm1098_vm11 = vweird.f32 %v6515_v0 }
 0x276   : > { %v2196_v58 = vpop.f32.mrf.mxu2  ;;  %v6530_v30 = vpop.eup %4932  ;;  %v1067_v32 = vmul.f32 %v4929_v31, %v1066_v11  ;;  %v1085_v56 = vmul.f32 0.5, %v1084_v41  ;;  %v6533_v38 = vsub.f32 %v6314_v47, %v563_v52  ;;  %v6536_v16 = vsub.f32 %v6317_v1, %v563_v52  ;;  %v4006_v11 = vld [vmem:[#allocation8 + $0xe0] sm:$0xf0] }
 0x277   : > { %4292 = vst [vmem:[%s6107_s2 + $0xa8] sm:$0xf] %v3284_v20  ;;  %v6539_v28 = vpop.f32.mrf.mxu0  ;;  %v1073_v18 = vmul.f32 %v6530_v30, %v6506_v53  ;;  %4936 = vrsqrt.f32 %v6525_v39  ;;  %vm1079_vm6 = vweird.f32 %v6530_v30  ;;  %v4418_v53 = vld [vmem:[#allocation8 + $0xdc] sm:$0xf0]  ;;  %vm1108_vm9 = vweird.f32 %v6525_v39 }
 0x278   : > { %v2285_v12 = vpop.f32.mrf.mxu3  ;;  %v6546_v29 = vpop.f32.mrf.mxu1  ;;  %v1071_v47 = vsel %vm1070_vm2, %v4929_v31, %v1067_v32  ;;  %v1086_v44 = vsub.f32 1.5, %v1085_v56  ;;  %v690_v1 = vmul.f32 %v6533_v38, %v6533_v38  ;;  %v691_v57 = vmul.f32 %v6536_v16, %v6536_v16  ;;  %v4463_v31 = vld [vmem:[#allocation8 + $0x24c] sm:$0xf]  ;;  %v4198_v32 = vld [vmem:[#allocation8 + $0x260] sm:$0xf0]  ;;  %vm1080_vm8 = vmor %vm1078_vm7, %vm1079_vm6 }
 0x279   : > { %v1214_v49 = vmul.f32 %v1071_v47, %v6158_v7  ;;  %v1215_v8 = vmul.f32 %v1071_v47, %v6185_v34  ;;  %v1074_v20 = vmul.f32 %v6530_v30, %v1073_v18  ;;  %v4009_v47 = vor.u32 %v4415_v54, %v4006_v11 }
 0x27a   : > { %v6552_v23 = vpop.eup %4934  ;;  %v785_v52 = vadd.f32 %v691_v57, %v690_v1  ;;  %v1351_v18 = vadd.f32 %v5688_v9, %v1282_v50  ;;  %v1087_v37 = vmul.f32 %v6512_v43, %v1086_v44  ;;  %v4201_v59 = vor.u32 %v4463_v31, %v4198_v32 }
 0x27b   : > { %v1093_v41 = vmul.f32 %v6552_v23, %v6515_v0  ;;  %v1283_v36 = vmul.f32 %v5671_v10, %v1214_v49  ;;  %v1284_v7 = vmul.f32 %v5673_v17, %v1215_v8  ;;  %v1075_v56 = vmul.f32 0.5, %v1074_v20  ;;  %v772_v34 = vpop.xlane.xlu1 %771  ;;  %2519 = vmatpush.bf16.msrb.mxu2 %v4009_v47 }
 0x27c   : > { %786 = vadd.xlane.f32.xlu0 %v785_v52  ;;  %v2286_v19 = vadd.f32 %v2285_v12, %v2196_v58  ;;  %v814_v49 = vmul.f32 %v772_v34, %v5448_v33  ;;  %2608 = vmatpush.bf16.msrb.mxu3 %v4201_v59  ;;  %vm1099_vm12 = vweird.f32 %v6552_v23 }
 0x27d   : > { %v6566_v63 = vpop.eup %4936  ;;  %v1352_v60 = vadd.f32 %v5684_v21, %v1283_v36  ;;  %v1353_v1 = vadd.f32 %v5688_v9, %v1284_v7  ;;  %v1094_v57 = vmul.f32 %v6552_v23, %v1093_v41  ;;  %v1076_v50 = vsub.f32 1.5, %v1075_v56  ;;  %v4466_v56 = vld [vmem:[#allocation8 + $0x25c] sm:$0xf0]  ;;  %vm1100_vm14 = vmor %vm1098_vm11, %vm1099_vm12 }
 0x27e   : > { %v2199_v8 = vpop.f32.mrf.mxu2  ;;  %v1103_v58 = vmul.f32 %v6566_v63, %v6525_v39  ;;  %v1091_v41 = vsel %vm1090_vm5, %v6512_v43, %v1087_v37  ;;  %v6587_v32 = vadd.f32 1e-05, %v814_v49  ;;  %v3083_v59 = vpack.c.bf16 %v2286_v19, %v6510_v24  ;;  %v4004_v37 = vld [vmem:[#allocation8 + $0xc8] sm:$0xf] }
 0x27f   : > { %v2023_v44 = vpop.f32.mrf.mxu0  ;;  %v6579_v20 = vpack.c.bf16 %v1352_v60, %v1350_v4  ;;  %v6581_v54 = vpack.c.bf16 %v1353_v1, %v1351_v18  ;;  %v1077_v31 = vmul.f32 %v6530_v30, %v1076_v50  ;;  %v1095_v52 = vmul.f32 0.5, %v1094_v57  ;;  %v775_v60 = vpop.xlane.xlu2 %774  ;;  %v4196_v24 = vld [vmem:[#allocation8 + $0x248] sm:$0xf] }
 0x280   : > { %v2288_v12 = vpop.f32.mrf.mxu3  ;;  %v2112_v11 = vpop.f32.mrf.mxu1  ;;  %v1104_v2 = vmul.f32 %v6566_v63, %v1103_v58  ;;  %v3285_v19 = vrot.slane %v3083_v59, 4  ;;  %v1218_v34 = vmul.f32 %v1091_v41, %v6191_v15  ;;  %v1219_v47 = vmul.f32 %v1091_v41, %v6215_v13 }
 0x281   : > { %2040 = vmatmul.bf16.gmra.mxu0 %v6579_v20  ;;  %2129 = vmatmul.bf16.gmra.mxu1 %v6581_v54  ;;  %v1081_v4 = vsel %vm1080_vm8, %v6530_v30, %v1077_v31  ;;  %v815_v30 = vmul.f32 %v775_v60, %v5448_v33  ;;  %v1096_v18 = vsub.f32 1.5, %v1095_v52  ;;  %4938 = vrsqrt.f32 %v6587_v32 }
 0x282   : > { %v1105_v36 = vmul.f32 0.5, %v1104_v2  ;;  %2218 = vmatmul.bf16.gmra.mxu2 %v6579_v20  ;;  %2307 = vmatmul.bf16.gmra.mxu3 %v6581_v54  ;;  %v1216_v43 = vmul.f32 %v1081_v4, %v6240_v40  ;;  %v1217_v7 = vmul.f32 %v1081_v4, %v6243_v22  ;;  %4293 = vst [vmem:[%s6107_s2 + $0xac] sm:$0xf] %v3285_v19  ;;  %vm1109_vm10 = vweird.f32 %v6566_v63  ;;  %v3982_v19 = vld [vmem:[#allocation8 + $0xb0] sm:$0xf0] }
 0x283   : > { %v6603_v40 = vadd.f32 1e-05, %v815_v30  ;;  %v4005_v22 = vor.u32 %v4418_v53, %v4004_v37  ;;  %v4197_v50 = vor.u32 %v4466_v56, %v4196_v24  ;;  %v1287_v2 = vmul.f32 %v5671_v10, %v1218_v34  ;;  %vm1110_vm13 = vmor %vm1108_vm9, %vm1109_vm10 }
 0x284   : > { %v1106_v1 = vsub.f32 1.5, %v1105_v36  ;;  %v1285_v49 = vmul.f32 %v5671_v10, %v1216_v43  ;;  %v1286_v15 = vmul.f32 %v5673_v17, %v1217_v7  ;;  %v1288_v41 = vmul.f32 %v5673_v17, %v1219_v47  ;;  %v4409_v7 = vld [vmem:[#allocation8 + $0x9c] sm:$0xf] }
 0x285   : > { %4940 = vrsqrt.f32 %v6603_v40  ;;  %2341 = vmatpush.bf16.msrb.mxu0 %v4005_v22  ;;  %2430 = vmatpush.bf16.msrb.mxu1 %v4197_v50  ;;  %v2289_v52 = vadd.f32 %v2288_v12, %v2199_v8  ;;  %v2111_v60 = vadd.f32 %v6546_v29, %v6539_v28  ;;  %v1097_v36 = vmul.f32 %v6552_v23, %v1096_v18 }
 0x286   : > { %v2201_v57 = vpop.f32.mrf.mxu2  ;;  %v1107_v59 = vmul.f32 %v6566_v63, %v1106_v1  ;;  %v1354_v4 = vadd.f32 %v5684_v21, %v1285_v49  ;;  %v1355_v8 = vadd.f32 %v5688_v9, %v1286_v15  ;;  %v2113_v53 = vadd.f32 %v2112_v11, %v2023_v44  ;;  %v4174_v49 = vld [vmem:[#allocation8 + $0x230] sm:$0xf0]  ;;  %v3980_v15 = vld [vmem:[#allocation8 + $0x98] sm:$0xf] }
 0x287   : > { %v2026_v31 = vpop.f32.mrf.mxu0  ;;  %v6620_v37 = vpop.eup %4938  ;;  %v3086_v12 = vpack.c.bf16 %v2289_v52, %v2111_v60  ;;  %v1356_v24 = vadd.f32 %v5684_v21, %v1287_v2  ;;  %v1357_v28 = vadd.f32 %v5688_v9, %v1288_v41  ;;  %v3985_v1 = vor.u32 %v4409_v7, %v3982_v19  ;;  %v4412_v2 = vld [vmem:[#allocation8 + $0xac] sm:$0xf0] }
 0x288   : > { %v2290_v58 = vpop.f32.mrf.mxu3  ;;  %v2115_v13 = vpop.f32.mrf.mxu1  ;;  %v1111_v39 = vsel %vm1110_vm13, %v6566_v63, %v1107_v59  ;;  %v4522_v56 = vpack.c.bf16 %v2113_v53, %v2111_v60  ;;  %v1113_v11 = vmul.f32 %v6620_v37, %v6587_v32  ;;  %v1101_v63 = vsel %vm1100_vm14, %v6552_v23, %v1097_v36 }
 0x289   : > { %v2291_v43 = vadd.f32 %v2290_v58, %v2201_v57  ;;  %v3286_v29 = vrot.slane %v3086_v12, 4  ;;  %v4457_v57 = vld [vmem:[#allocation8 + $0x21c] sm:$0xf]  ;;  %v6634_v0 = vpack.c.bf16 %v1356_v24, %v1354_v4  ;;  %v6636_v22 = vpack.c.bf16 %v1357_v28, %v1355_v8  ;;  %2520 = vmatpush.bf16.msrb.mxu2 %v3985_v1  ;;  %v4172_v4 = vld [vmem:[#allocation8 + $0x218] sm:$0xf] }
 0x28a   : > { %v1222_v41 = vmul.f32 %v1111_v39, %v6290_v55  ;;  %v1223_v52 = vmul.f32 %v1111_v39, %v6299_v35  ;;  %4734 = vst [vmem:[%s6107_s2 + $0x30] sm:$0xff] %v4522_v56   ;;  %v2116_v60 = vadd.f32 %v2115_v13, %v2026_v31  ;;  %v4460_v8 = vld [vmem:[#allocation8 + $0x22c] sm:$0xf0]  ;;  %v4177_v55 = vor.u32 %v4457_v57, %v4174_v49  ;;  %v4403_v31 = vld [vmem:[#allocation8 + $0x6c] sm:$0xf] }
 0x28b   : > { %v3089_v34 = vpack.c.bf16 %v2291_v43, %v2113_v53  ;;  %v6630_v44 = vpop.eup %4940  ;;  %4294 = vst [vmem:[%s6107_s2 + $0xb0] sm:$0xf] %v3286_v29  ;;  %v1114_v53 = vmul.f32 %v6620_v37, %v1113_v11  ;;  %v3981_v35 = vor.u32 %v4412_v2, %v3980_v15  ;;  %v3958_v13 = vld [vmem:[#allocation8 + $0x80] sm:$0xf0]  ;;  %v4173_v24 = vor.u32 %v4460_v8, %v4172_v4  ;;  %v4451_v28 = vld [vmem:[#allocation8 + $0x1ec] sm:$0xf] }
 0x28c   : > { %v1123_v50 = vmul.f32 %v6630_v44, %v6603_v40  ;;  %v4150_v39 = vld [vmem:[#allocation8 + $0x200] sm:$0xf0]  ;;  %2609 = vmatpush.bf16.msrb.mxu3 %v4177_v55  ;;  %v3961_v29 = vor.u32 %v4403_v31, %v3958_v13  ;;  %v4148_v11 = vld [vmem:[#allocation8 + $0x1e8] sm:$0xf]  ;;  %v4454_v49 = vld [vmem:[#allocation8 + $0x1fc] sm:$0xf0]  ;;  %v1291_v8 = vmul.f32 %v5671_v10, %v1222_v41  ;;  %vm1128_vm15 = vweird.f32 %v6603_v40 }
 0x28d   : > { %v3287_v59 = vrot.slane %v3089_v34, 4  ;;  %2342 = vmatpush.bf16.msrb.mxu0 %v3981_v35  ;;  %v4153_v56 = vor.u32 %v4451_v28, %v4150_v39  ;;  %v3956_v34 = vld [vmem:[#allocation8 + $0x68] sm:$0xf]  ;;  %2431 = vmatpush.bf16.msrb.mxu1 %v4173_v24  ;;  %v3934_v4 = vld [vmem:[#allocation8 + $0x50] sm:$0xf0]  ;;  %vm1129_vm0 = vweird.f32 %v6630_v44  ;;  %vm1118_vm1 = vweird.f32 %v6587_v32 }
 0x28e   : > { %v2204_v47 = vpop.f32.mrf.mxu2  ;;  %v1124_v23 = vmul.f32 %v6630_v44, %v1123_v50  ;;  %v1115_v50 = vmul.f32 0.5, %v1114_v53  ;;  %2521 = vmatpush.bf16.msrb.mxu2 %v3961_v29  ;;  %vm1119_vm2 = vweird.f32 %v6620_v37  ;;  %vm1130_vm3 = vmor %vm1128_vm15, %vm1129_vm0 }
 0x28f   : > { %v2028_v18 = vpop.f32.mrf.mxu0  ;;  %4295 = vst [vmem:[%s6107_s2 + $0xb4] sm:$0xf] %v3287_v59  ;;  %v4149_v59 = vor.u32 %v4454_v49, %v4148_v11  ;;  %vm1120_vm4 = vmor %vm1118_vm1, %vm1119_vm2 }
 0x290   : > { %v2293_v30 = vpop.f32.mrf.mxu3  ;;  %v2117_v58 = vpop.f32.mrf.mxu1  ;;  %v1125_v43 = vmul.f32 0.5, %v1124_v23  ;;  %v4445_v23 = vld [vmem:[#allocation8 + $0x1bc] sm:$0xf]  ;;  %2610 = vmatpush.bf16.msrb.mxu3 %v4153_v56 }
 0x291   : > { %2045 = vmatmul.bf16.gmra.mxu0 %v6634_v0  ;;  %2134 = vmatmul.bf16.gmra.mxu1 %v6636_v22  ;;  %v2294_v36 = vadd.f32 %v2293_v30, %v2204_v47  ;;  %v2118_v12 = vadd.f32 %v2117_v58, %v2028_v18  ;;  %v4406_v47 = vld [vmem:[#allocation8 + $0x7c] sm:$0xf0]  ;;  %v1220_v30 = vmul.f32 %v1101_v63, %v6253_v26 }
 0x292   : > { %2223 = vmatmul.bf16.gmra.mxu2 %v6634_v0  ;;  %2312 = vmatmul.bf16.gmra.mxu3 %v6636_v22  ;;  %v1221_v18 = vmul.f32 %v1101_v63, %v6256_v25  ;;  %v3957_v2 = vor.u32 %v4406_v47, %v3956_v34  ;;  %v1292_v26 = vmul.f32 %v5673_v17, %v1223_v52  ;;  %v1126_v55 = vsub.f32 1.5, %v1125_v43 }
 0x293   : > { %v3092_v7 = vpack.c.bf16 %v2294_v36, %v2116_v60  ;;  %v4527_v19 = vpack.c.bf16 %v2118_v12, %v2116_v60  ;;  %v4397_v60 = vld [vmem:[#allocation8 + $0x3c] sm:$0xf]  ;;  %v4126_v36 = vld [vmem:[#allocation8 + $0x1d0] sm:$0xf0]  ;;  %v1289_v35 = vmul.f32 %v5671_v10, %v1220_v30  ;;  %2432 = vmatpush.bf16.msrb.mxu1 %v4149_v59  ;;  %v1360_v52 = vadd.f32 %v5684_v21, %v1291_v8 }
 0x294   : > { %2343 = vmatpush.bf16.msrb.mxu0 %v3957_v2  ;;  %v3937_v53 = vor.u32 %v4397_v60, %v3934_v4  ;;  %v1290_v31 = vmul.f32 %v5673_v17, %v1221_v18  ;;  %v4129_v41 = vor.u32 %v4445_v23, %v4126_v36  ;;  %v1361_v43 = vadd.f32 %v5688_v9, %v1292_v26 }
 0x295   : > { %v3288_v1 = vrot.slane %v3092_v7, 4  ;;  %4735 = vst [vmem:[%s6107_s2 + $0x38] sm:$0xff] %v4527_v19   ;;  %v1116_v7 = vsub.f32 1.5, %v1115_v50  ;;  %v1358_v24 = vadd.f32 %v5684_v21, %v1289_v35 }
 0x296   : > { %v2206_v57 = vpop.f32.mrf.mxu2  ;;  %2522 = vmatpush.bf16.msrb.mxu2 %v3937_v53  ;;  %2611 = vmatpush.bf16.msrb.mxu3 %v4129_v41  ;;  %v1359_v40 = vadd.f32 %v5688_v9, %v1290_v31 }
 0x297   : > { %v2031_v15 = vpop.f32.mrf.mxu0  ;;  %4296 = vst [vmem:[%s6107_s2 + $0xb8] sm:$0xf] %v3288_v1  ;;  %v1117_v39 = vmul.f32 %v6620_v37, %v1116_v7  ;;  %v6671_v34 = vpack.c.bf16 %v1360_v52, %v1358_v24  ;;  %v3932_v52 = vld [vmem:[#allocation8 + $0x38] sm:$0xf]  ;;  %v4448_v24 = vld [vmem:[#allocation8 + $0x1cc] sm:$0xf0] }
 0x298   : > { %v2295_v58 = vpop.f32.mrf.mxu3  ;;  %v2120_v63 = vpop.f32.mrf.mxu1  ;;  %v6673_v47 = vpack.c.bf16 %v1361_v43, %v1359_v40  ;;  %v4400_v43 = vld [vmem:[#allocation8 + $0x4c] sm:$0xf0] }
 0x299   : > { %v2296_v25 = vadd.f32 %v2295_v58, %v2206_v57  ;;  %v2121_v32 = vadd.f32 %v2120_v63, %v2031_v15  ;;  %v1121_v49 = vsel %vm1120_vm4, %v6620_v37, %v1117_v39 }
 0x29a   : > { %v1225_v59 = vmul.f32 %v1121_v49, %v6339_v3  ;;  %v778_v3 = vpop.xlane.xlu0 %777 }
 0x29b   : > { %v3095_v13 = vpack.c.bf16 %v2296_v25, %v2118_v12  ;;  %v1127_v12 = vmul.f32 %v6630_v44, %v1126_v55  ;;  %v816_v31 = vmul.f32 %v778_v3, %v5448_v33 }
 0x29d   : > { %v3289_v19 = vrot.slane %v3095_v13, 4  ;;  %v1131_v18 = vsel %vm1130_vm3, %v6630_v44, %v1127_v12  ;;  %v1224_v44 = vmul.f32 %v1121_v49, %v6320_v48  ;;  %v848_v13 = vadd.f32 1e-05, %v816_v31 }
 0x29e   : > { %v2209_v28 = vpop.f32.mrf.mxu2  ;;  %v1226_v58 = vmul.f32 %v1131_v18, %v6355_v27  ;;  %v1227_v15 = vmul.f32 %v1131_v18, %v6358_v51  ;;  %v1294_v27 = vmul.f32 %v5673_v17, %v1225_v59  ;;  %v3933_v12 = vor.u32 %v4400_v43, %v3932_v52 }
 0x29f   : > { %4297 = vst [vmem:[%s6107_s2 + $0xbc] sm:$0xf] %v3289_v19  ;;  %v2033_v56 = vpop.f32.mrf.mxu0  ;;  %v1293_v25 = vmul.f32 %v5671_v10, %v1224_v44  ;;  %4942 = vrsqrt.f32 %v848_v13  ;;  %v4124_v19 = vld [vmem:[#allocation8 + $0x1b8] sm:$0xf]  ;;  %vm1138_vm5 = vweird.f32 %v848_v13 }
 0x2a0   : > { %v2298_v29 = vpop.f32.mrf.mxu3  ;;  %v2122_v30 = vpop.f32.mrf.mxu1  ;;  %v1295_v37 = vmul.f32 %v5671_v10, %v1226_v58  ;;  %v1296_v8 = vmul.f32 %v5673_v17, %v1227_v15  ;;  %v1363_v55 = vadd.f32 %v5688_v9, %v1294_v27  ;;  %2344 = vmatpush.bf16.msrb.mxu0 %v3933_v12 }
 0x2a1   : > { %v2299_v11 = vadd.f32 %v2298_v29, %v2209_v28  ;;  %v2123_v1 = vadd.f32 %v2122_v30, %v2033_v56  ;;  %2050 = vmatmul.bf16.gmra.mxu0 %v6671_v34  ;;  %2139 = vmatmul.bf16.gmra.mxu1 %v6673_v47  ;;  %v1362_v36 = vadd.f32 %v5684_v21, %v1293_v25 }
 0x2a2   : > { %2228 = vmatmul.bf16.gmra.mxu2 %v6671_v34  ;;  %2317 = vmatmul.bf16.gmra.mxu3 %v6673_v47  ;;  %v1364_v63 = vadd.f32 %v5684_v21, %v1295_v37  ;;  %v1365_v48 = vadd.f32 %v5688_v9, %v1296_v8  ;;  %v4125_v28 = vor.u32 %v4448_v24, %v4124_v19 }
 0x2a3   : > { %v3098_v57 = vpack.c.bf16 %v2299_v11, %v2121_v32  ;;  %v4532_v50 = vpack.c.bf16 %v2123_v1, %v2121_v32 }
 0x2a4   : > { %v6696_v53 = vpack.c.bf16 %v1364_v63, %v1362_v36  ;;  %v6698_v35 = vpack.c.bf16 %v1365_v48, %v1363_v55  ;;  %2433 = vmatpush.bf16.msrb.mxu1 %v4125_v28 }
 0x2a5   : > { %v3290_v2 = vrot.slane %v3098_v57, 4  ;;  %4736 = vst [vmem:[%s6107_s2 + $0x40] sm:$0xff] %v4532_v50   ;;  %v4943_v7 = vpop.eup %4942 }
 0x2a6   : > { %v2211_v60 = vpop.f32.mrf.mxu2  ;;  %v1133_v41 = vmul.f32 %v4943_v7, %v848_v13  ;;  %vm1139_vm6 = vweird.f32 %v4943_v7 }
 0x2a7   : > { %4298 = vst [vmem:[%s6107_s2 + $0xc0] sm:$0xf] %v3290_v2  ;;  %vm1140_vm7 = vmor %vm1138_vm5, %vm1139_vm6 }
 0x2a8   : > { %v2300_v4 = vpop.f32.mrf.mxu3  ;;  %v1134_v40 = vmul.f32 %v4943_v7, %v1133_v41 }
 0x2a9   : > { %v2301_v26 = vadd.f32 %v2300_v4, %v2211_v60 }
 0x2aa   : > { %v1135_v56 = vmul.f32 0.5, %v1134_v40 }
 0x2ab   : > { %v3101_v51 = vpack.c.bf16 %v2301_v26, %v2123_v1 }
 0x2ac   : > { %v1136_v11 = vsub.f32 1.5, %v1135_v56 }
 0x2ad   : > { %v3291_v23 = vrot.slane %v3101_v51, 4 }
 0x2ae   : > { %v1137_v18 = vmul.f32 %v4943_v7, %v1136_v11  ;;  %v3910_v11 = vld [vmem:[#allocation8 + $0x20] sm:$0xf0] }
 0x2af   : > { %4299 = vst [vmem:[%s6107_s2 + $0xc4] sm:$0xf] %v3291_v23 }
 0x2b0   : > { %v1141_v49 = vsel %vm1140_vm7, %v4943_v7, %v1137_v18  ;;  %v4439_v18 = vld [vmem:[#allocation8 + $0x18c] sm:$0xf] }
 0x2b1   : > { %2055 = vmatmul.bf16.gmra.mxu0 %v6696_v53  ;;  %2144 = vmatmul.bf16.gmra.mxu1 %v6698_v35  ;;  %v1228_v2 = vmul.f32 %v1141_v49, %v6385_v14  ;;  %v1229_v59 = vmul.f32 %v1141_v49, %v6388_v61 }
 0x2b2   : > { %2233 = vmatmul.bf16.gmra.mxu2 %v6696_v53  ;;  %2322 = vmatmul.bf16.gmra.mxu3 %v6698_v35 }
 0x2b3   : > { %v1297_v4 = vmul.f32 %v5671_v10, %v1228_v2  ;;  %v1298_v8 = vmul.f32 %v5673_v17, %v1229_v59 }
 0x2b5   : > { %v1366_v55 = vadd.f32 %v5684_v21, %v1297_v4 }
 0x2c8   : > { %v781_v39 = vpop.xlane.xlu1 %780 }
 0x2c9   : > { %v817_v29 = vmul.f32 %v781_v39, %v5448_v33 }
 0x2cb   : > { %v849_v32 = vadd.f32 1e-05, %v817_v29 }
 0x2cd   : > { %4944 = vrsqrt.f32 %v849_v32  ;;  %vm1148_vm9 = vweird.f32 %v849_v32 }
 0x2d3   : > { %v4945_v30 = vpop.eup %4944 }
 0x2d4   : > { %v1143_v1 = vmul.f32 %v4945_v30, %v849_v32  ;;  %vm1149_vm8 = vweird.f32 %v4945_v30  ;;  %v4391_v32 = vld [vmem:[#allocation8 + $0xc] sm:$0xf] }
 0x2d5   : > { %vm1150_vm10 = vmor %vm1148_vm9, %vm1149_vm8 }
 0x2d6   : > { %v1144_v57 = vmul.f32 %v4945_v30, %v1143_v1  ;;  %v4102_v1 = vld [vmem:[#allocation8 + $0x1a0] sm:$0xf0] }
 0x2d7   : > { %v2036_v58 = vpop.f32.mrf.mxu0  ;;  %v2125_v15 = vpop.f32.mrf.mxu1  ;;  %v4105_v49 = vor.u32 %v4439_v18, %v4102_v1 }
 0x2d8   : > { %v1145_v50 = vmul.f32 0.5, %v1144_v57  ;;  %v2126_v63 = vadd.f32 %v2125_v15, %v2036_v58  ;;  %v3908_v57 = vld [vmem:[#allocation8 + $0x8] sm:$0xf]  ;;  %v4442_v15 = vld [vmem:[#allocation8 + $0x19c] sm:$0xf0] }
 0x2d9   : > { %v4100_v58 = vld [vmem:[#allocation8 + $0x188] sm:$0xf]  ;;  %2612 = vmatpush.bf16.msrb.mxu3 %v4105_v49  ;;  %v4485_v49 = vld [vmem:[#allocation8 + $0x2f4] sm:$0xf0] }
 0x2da   : > { %v1146_v44 = vsub.f32 1.5, %v1145_v50  ;;  %v4394_v50 = vld [vmem:[#allocation8 + $0x1c] sm:$0xf0] }
 0x2db   : > { %v3909_v59 = vor.u32 %v4394_v50, %v3908_v57  ;;  %v4276_v57 = vld [vmem:[#allocation8 + $0x2e0] sm:$0xf] }
 0x2dc   : > { %v1147_v60 = vmul.f32 %v4945_v30, %v1146_v44 }
 0x2dd   : > { %2345 = vmatpush.bf16.msrb.mxu0 %v3909_v59 }
 0x2de   : > { %v1151_v37 = vsel %vm1150_vm10, %v4945_v30, %v1147_v60  ;;  %v2214_v27 = vpop.f32.mrf.mxu2  ;;  %v2303_v51 = vpop.f32.mrf.mxu3  ;;  %v3913_v30 = vor.u32 %v4391_v32, %v3910_v11  ;;  %v4101_v60 = vor.u32 %v4442_v15, %v4100_v58  ;;  %v4277_v15 = vor.u32 %v4485_v49, %v4276_v57 }
 0x2df   : > { %v1230_v26 = vmul.f32 %v1151_v37, %v6450_v45  ;;  %v1231_v25 = vmul.f32 %v1151_v37, %v6453_v46  ;;  %v2304_v14 = vadd.f32 %v2303_v51, %v2214_v27  ;;  %v2038_v48 = vpop.f32.mrf.mxu0  ;;  %v2127_v61 = vpop.f32.mrf.mxu1  ;;  %v1367_v45 = vadd.f32 %v5688_v9, %v1298_v8 }
 0x2e0   : > { %v2128_v36 = vadd.f32 %v2127_v61, %v2038_v48  ;;  %2523 = vmatpush.bf16.msrb.mxu2 %v3913_v30  ;;  %2434 = vmatpush.bf16.msrb.mxu1 %v4101_v60 }
 0x2e1   : > { %v1299_v23 = vmul.f32 %v5671_v10, %v1230_v26  ;;  %v1300_v3 = vmul.f32 %v5673_v17, %v1231_v25  ;;  %v3104_v31 = vpack.c.bf16 %v2304_v14, %v2126_v63 }
 0x2e2   : > { %v4537_v7 = vpack.c.bf16 %v2128_v36, %v2126_v63 }
 0x2e3   : > { %v1368_v46 = vadd.f32 %v5684_v21, %v1299_v23  ;;  %v1369_v13 = vadd.f32 %v5688_v9, %v1300_v3  ;;  %v3292_v41 = vrot.slane %v3104_v31, 4 }
 0x2e4   : > { %4737 = vst [vmem:[%s6107_s2 + $0x48] sm:$0xff] %v4537_v7   ;;  %v784_v19 = vpop.xlane.xlu2 %783  ;;  %v4086_v7 = vld [vmem:[#allocation8 + $0x178] sm:$0xf0]  ;;  %2783 = vmatpush.bf16.msra.mxu1 %v4277_v15  ;;  %v4252_v15 = vld [vmem:[#allocation8 + $0x2b0] sm:$0xf] }
 0x2e5   : > { %v6718_v52 = vpack.c.bf16 %v1368_v46, %v1366_v55  ;;  %v6720_v43 = vpack.c.bf16 %v1369_v13, %v1367_v45  ;;  %4300 = vst [vmem:[%s6107_s2 + $0xc8] sm:$0xf] %v3292_v41  ;;  %v818_v24 = vmul.f32 %v784_v19, %v5448_v33  ;;  %v4434_v13 = vld [vmem:[#allocation8 + $0x164] sm:$0xf] }
 0x2e6   : > { %v2216_v12 = vpop.f32.mrf.mxu2  ;;  %v2305_v40 = vpop.f32.mrf.mxu3  ;;  %v4482_v41 = vld [vmem:[#allocation8 + $0x2e4] sm:$0xf] }
 0x2e7   : > { %2060 = vmatmul.bf16.gmra.mxu0 %v6718_v52  ;;  %2149 = vmatmul.bf16.gmra.mxu1 %v6720_v43  ;;  %v2306_v28 = vadd.f32 %v2305_v40, %v2216_v12  ;;  %v850_v39 = vadd.f32 1e-05, %v818_v24 }
 0x2e8   : > { %2238 = vmatmul.bf16.gmra.mxu2 %v6718_v52  ;;  %2327 = vmatmul.bf16.gmra.mxu3 %v6720_v43 }
 0x2e9   : > { %v3107_v29 = vpack.c.bf16 %v2306_v28, %v2128_v36  ;;  %4946 = vrsqrt.f32 %v850_v39  ;;  %vm1158_vm11 = vweird.f32 %v850_v39 }
 0x2eb   : > { %v3293_v56 = vrot.slane %v3107_v29, 4  ;;  %v4084_v29 = vld [vmem:[#allocation8 + $0x160] sm:$0xf] }
 0x2ed   : > { %4301 = vst [vmem:[%s6107_s2 + $0xcc] sm:$0xf] %v3293_v56  ;;  %v4437_v56 = vld [vmem:[#allocation8 + $0x174] sm:$0xf0] }
 0x2ee   : > { %v4085_v58 = vor.u32 %v4437_v56, %v4084_v29 }
 0x2ef   : > { %v4947_v2 = vpop.eup %4946  ;;  %v787_v44 = vpop.xlane.xlu0 %786 }
 0x2f0   : > { %v1153_v4 = vmul.f32 %v4947_v2, %v850_v39  ;;  %v819_v37 = vmul.f32 %v787_v44, %v5448_v33  ;;  %vm1159_vm12 = vweird.f32 %v4947_v2  ;;  %v4089_v39 = vor.u32 %v4434_v13, %v4086_v7  ;;  %2694 = vmatpush.bf16.msra.mxu0 %v4085_v58  ;;  %v4431_v58 = vld [vmem:[#allocation8 + $0x144] sm:$0xf0] }
 0x2f1   : > { %vm1160_vm13 = vmor %vm1158_vm11, %vm1159_vm12 }
 0x2f2   : > { %v1154_v8 = vmul.f32 %v4947_v2, %v1153_v4  ;;  %v851_v26 = vadd.f32 1e-05, %v819_v37  ;;  %2872 = vmatpush.bf16.msra.mxu2 %v4089_v39  ;;  %v4428_v39 = vld [vmem:[#allocation8 + $0x134] sm:$0xf] }
 0x2f4   : > { %v1155_v25 = vmul.f32 0.5, %v1154_v8  ;;  %4948 = vrsqrt.f32 %v851_v26  ;;  %vm1168_vm15 = vweird.f32 %v851_v26 }
 0x2f6   : > { %v1156_v27 = vsub.f32 1.5, %v1155_v25 }
 0x2f8   : > { %v1157_v51 = vmul.f32 %v4947_v2, %v1156_v27 }
 0x2fa   : > { %v4949_v63 = vpop.eup %4948  ;;  %v1161_v48 = vsel %vm1160_vm13, %v4947_v2, %v1157_v51 }
 0x2fb   : > { %v1163_v14 = vmul.f32 %v4949_v63, %v851_v26  ;;  %v1232_v33 = vmul.f32 %v1161_v48, %v6494_v62  ;;  %vm1169_vm14 = vweird.f32 %v4949_v63  ;;  %v1233_v55 = vmul.f32 %v1161_v48, %v6497_v42  ;;  %v4278_v62 = vld [vmem:[#allocation8 + $0x2f8] sm:$0xf0] }
 0x2fc   : > { %vm1170_vm0 = vmor %vm1168_vm15, %vm1169_vm14  ;;  %v4281_v1 = vor.u32 %v4482_v41, %v4278_v62  ;;  %v7234_v41 = vld [vmem:[#allocation29_spill] sm:$0xff] }
 0x2fd   : > { %v1164_v61 = vmul.f32 %v4949_v63, %v1163_v14  ;;  %v1301_v46 = vmul.f32 %v5671_v10, %v1232_v33  ;;  %v1302_v19 = vmul.f32 %v5673_v17, %v1233_v55  ;;  %v4062_v62 = vld [vmem:[#allocation8 + $0x148] sm:$0xf0] }
 0x2fe   : > { %v2041_v23 = vpop.f32.mrf.mxu0  ;;  %v2130_v3 = vpop.f32.mrf.mxu1  ;;  %2961 = vmatpush.bf16.msra.mxu3 %v4281_v1 }
 0x2ff   : > { %v1165_v36 = vmul.f32 0.5, %v1164_v61  ;;  %v2131_v24 = vadd.f32 %v2130_v3, %v2041_v23  ;;  %v1371_v60 = vadd.f32 %v5688_v9, %v1302_v19  ;;  %v7235_v19 = vld [vmem:[#allocation30_spill] sm:$0xff] }
 0x301   : > { %v1166_v31 = vsub.f32 1.5, %v1165_v36 }
 0x303   : > { %v1167_v45 = vmul.f32 %v4949_v63, %v1166_v31 }
 0x305   : > { %v1171_v12 = vsel %vm1170_vm0, %v4949_v63, %v1167_v45  ;;  %v2219_v40 = vpop.f32.mrf.mxu2  ;;  %v2308_v28 = vpop.f32.mrf.mxu3 }
 0x306   : > { %v1234_v42 = vmul.f32 %v1171_v12, %v6533_v38  ;;  %v1235_v32 = vmul.f32 %v1171_v12, %v6536_v16  ;;  %v2309_v11 = vadd.f32 %v2308_v28, %v2219_v40  ;;  %v2043_v30 = vpop.f32.mrf.mxu0  ;;  %v2132_v18 = vpop.f32.mrf.mxu1  ;;  %v1370_v38 = vadd.f32 %v5684_v21, %v1301_v46 }
 0x307   : > { %v2133_v50 = vadd.f32 %v2132_v18, %v2043_v30  ;;  %v4060_v30 = vld [vmem:[#allocation8 + $0x130] sm:$0xf] }
 0x308   : > { %v1303_v2 = vmul.f32 %v5671_v10, %v1234_v42  ;;  %v1304_v44 = vmul.f32 %v5673_v17, %v1235_v32  ;;  %v3110_v59 = vpack.c.bf16 %v2309_v11, %v2131_v24  ;;  %v4065_v42 = vor.u32 %v4428_v39, %v4062_v62  ;;  %v4476_v32 = vld [vmem:[#allocation8 + $0x2b4] sm:$0xf]  ;;  %v4254_v11 = vld [vmem:[#allocation8 + $0x2c8] sm:$0xf0]  ;;  %v4470_v39 = vld [vmem:[#allocation8 + $0x284] sm:$0xf] }
 0x309   : > { %v4542_v16 = vpack.c.bf16 %v2133_v50, %v2131_v24 }
 0x30a   : > { %v1372_v4 = vadd.f32 %v5684_v21, %v1303_v2  ;;  %v1373_v37 = vadd.f32 %v5688_v9, %v1304_v44  ;;  %v3294_v8 = vrot.slane %v3110_v59, 4  ;;  %v4479_v2 = vld [vmem:[#allocation8 + $0x2c4] sm:$0xf0]  ;;  %2873 = vmatpush.bf16.msra.mxu2 %v4065_v42  ;;  %v4061_v59 = vor.u32 %v4431_v58, %v4060_v30  ;;  %v4036_v42 = vld [vmem:[#allocation8 + $0x100] sm:$0xf] }
 0x30b   : > { %4738 = vst [vmem:[%s6107_s2 + $0x50] sm:$0xff] %v4542_v16   ;;  %v7241_v58 = vld [vmem:[#allocation41_spill] sm:$0xff] }
 0x30c   : > { %v6744_v26 = vpack.c.bf16 %v1372_v4, %v1370_v38  ;;  %v6746_v10 = vpack.c.bf16 %v1373_v37, %v1371_v60  ;;  %4302 = vst [vmem:[%s6107_s2 + $0xd0] sm:$0xf] %v3294_v8  ;;  %v4253_v38 = vor.u32 %v4479_v2, %v4252_v15  ;;  %2695 = vmatpush.bf16.msra.mxu0 %v4061_v59  ;;  %v7242_v15 = vld [vmem:[#allocation22_spill] sm:$0xff]  ;;  %v7243_v2 = vld [vmem:[#allocation27_spill] sm:$0xff]  ;;  %v4014_v59 = vld [vmem:[#allocation8 + $0xe8] sm:$0xf0] }
 0x30d   : > { %v2221_v17 = vpop.f32.mrf.mxu2  ;;  %v2310_v25 = vpop.f32.mrf.mxu3 }
 0x30e   : > { %v2311_v27 = vadd.f32 %v2310_v25, %v2221_v17  ;;  %2065 = vmatmul.bf16.gmra.mxu0 %v6744_v26  ;;  %2154 = vmatmul.bf16.gmra.mxu1 %v6746_v10  ;;  %v2046_v51 = vpop.f32.mrf.mxu0  ;;  %v2135_v63 = vpop.f32.mrf.mxu1  ;;  %v7236_v25 = vld [vmem:[#allocation31_spill] sm:$0xff] }
 0x30f   : > { %2243 = vmatmul.bf16.gmra.mxu2 %v6744_v26  ;;  %2332 = vmatmul.bf16.gmra.mxu3 %v6746_v10  ;;  %v2136_v61 = vadd.f32 %v2135_v63, %v2046_v51 }
 0x310   : > { %v3113_v21 = vpack.c.bf16 %v2311_v27, %v2133_v50  ;;  %v4257_v50 = vor.u32 %v4476_v32, %v4254_v11  ;;  %2784 = vmatpush.bf16.msra.mxu1 %v4253_v38  ;;  %v7237_v27 = vld [vmem:[#allocation32_spill] sm:$0xff]  ;;  %v4425_v32 = vld [vmem:[#allocation8 + $0x114] sm:$0xf0]  ;;  %v4464_v38 = vld [vmem:[#allocation8 + $0x254] sm:$0xf] }
 0x311   : > { %v4037_v30 = vor.u32 %v4425_v32, %v4036_v42  ;;  %v4410_v42 = vld [vmem:[#allocation8 + $0xa4] sm:$0xf]  ;;  %v3990_v32 = vld [vmem:[#allocation8 + $0xb8] sm:$0xf0] }
 0x312   : > { %v3295_v9 = vrot.slane %v3113_v21, 4  ;;  %2962 = vmatpush.bf16.msra.mxu3 %v4257_v50  ;;  %v7240_v50 = vld [vmem:[#allocation40_spill] sm:$0xff] }
 0x313   : > { %2696 = vmatpush.bf16.msra.mxu0 %v4037_v30  ;;  %v3993_v30 = vor.u32 %v4410_v42, %v3990_v32 }
 0x314   : > { %4303 = vst [vmem:[%s6107_s2 + $0xd4] sm:$0xf] %v3295_v9 }
 0x315   : > { %v2224_v14 = vpop.f32.mrf.mxu2  ;;  %v2313_v48 = vpop.f32.mrf.mxu3 }
 0x316   : > { %v2314_v23 = vadd.f32 %v2313_v48, %v2224_v14  ;;  %v2048_v3 = vpop.f32.mrf.mxu0  ;;  %v2137_v36 = vpop.f32.mrf.mxu1 }
 0x317   : > { %v2138_v33 = vadd.f32 %v2137_v36, %v2048_v3 }
 0x318   : > { %v3116_v55 = vpack.c.bf16 %v2314_v23, %v2136_v61 }
 0x319   : > { %v4547_v31 = vpack.c.bf16 %v2138_v33, %v2136_v61 }
 0x31a   : > { %v3296_v45 = vrot.slane %v3116_v55, 4 }
 0x31b   : > { %4739 = vst [vmem:[%s6107_s2 + $0x58] sm:$0xff] %v4547_v31  }
 0x31c   : > { %4304 = vst [vmem:[%s6107_s2 + $0xd8] sm:$0xf] %v3296_v45 }
 0x31d   : > { %v2226_v46 = vpop.f32.mrf.mxu2  ;;  %v2315_v13 = vpop.f32.mrf.mxu3 }
 0x31e   : > { %v2316_v7 = vadd.f32 %v2315_v13, %v2226_v46  ;;  %2346 = vmatmul.bf16.vlgmr.msrb.gmra.mxu0 %v7234_v41  ;;  %2435 = vmatmul.bf16.vlgmr.msrb.gmra.mxu1 %v7235_v19  ;;  %v2051_v12 = vpop.f32.mrf.mxu0  ;;  %v2140_v24 = vpop.f32.mrf.mxu1 }
 0x31f   : > { %2524 = vmatmul.bf16.vlgmr.msrb.gmra.mxu2 %v7234_v41  ;;  %2613 = vmatmul.bf16.vlgmr.msrb.gmra.mxu3 %v7235_v19  ;;  %v2141_v18 = vadd.f32 %v2140_v24, %v2051_v12  ;;  %v7238_v12 = vld [vmem:[#allocation36_spill] sm:$0xff]  ;;  %v7239_v24 = vld [vmem:[#allocation37_spill] sm:$0xff] }
 0x320   : > { %v3119_v40 = vpack.c.bf16 %v2316_v7, %v2138_v33 }
 0x322   : > { %v3297_v28 = vrot.slane %v3119_v40, 4  ;;  %v4422_v40 = vld [vmem:[#allocation8 + $0x104] sm:$0xf] }
 0x324   : > { %4305 = vst [vmem:[%s6107_s2 + $0xdc] sm:$0xf] %v3297_v28  ;;  %v4038_v28 = vld [vmem:[#allocation8 + $0x118] sm:$0xf0] }
 0x325   : > { %v2229_v29 = vpop.f32.mrf.mxu2  ;;  %v2318_v56 = vpop.f32.mrf.mxu3 }
 0x326   : > { %v2319_v1 = vadd.f32 %v2318_v56, %v2229_v29  ;;  %v2053_v57 = vpop.f32.mrf.mxu0  ;;  %v2142_v49 = vpop.f32.mrf.mxu1  ;;  %v4041_v29 = vor.u32 %v4422_v40, %v4038_v28  ;;  %v4230_v56 = vld [vmem:[#allocation8 + $0x298] sm:$0xf0] }
 0x327   : > { %v2143_v44 = vadd.f32 %v2142_v49, %v2053_v57  ;;  %v4233_v11 = vor.u32 %v4470_v39, %v4230_v56  ;;  %v7246_v56 = vld [vmem:[#allocation43_spill] sm:$0xff] }
 0x328   : > { %v3122_v16 = vpack.c.bf16 %v2319_v1, %v2141_v18  ;;  %v4473_v1 = vld [vmem:[#allocation8 + $0x294] sm:$0xf0]  ;;  %2874 = vmatpush.bf16.msra.mxu2 %v4041_v29  ;;  %v7245_v29 = vld [vmem:[#allocation24_spill] sm:$0xff] }
 0x329   : > { %v4552_v60 = vpack.c.bf16 %v2143_v44, %v2141_v18  ;;  %v4228_v18 = vld [vmem:[#allocation8 + $0x280] sm:$0xf]  ;;  %2963 = vmatpush.bf16.msra.mxu3 %v4233_v11  ;;  %v4458_v11 = vld [vmem:[#allocation8 + $0x224] sm:$0xf] }
 0x32a   : > { %v3298_v4 = vrot.slane %v3122_v16, 4  ;;  %v4229_v49 = vor.u32 %v4473_v1, %v4228_v18  ;;  %v4182_v18 = vld [vmem:[#allocation8 + $0x238] sm:$0xf0] }
 0x32b   : > { %4740 = vst [vmem:[%s6107_s2 + $0x60] sm:$0xff] %v4552_v60   ;;  %v4206_v60 = vld [vmem:[#allocation8 + $0x268] sm:$0xf0]  ;;  %v4185_v1 = vor.u32 %v4458_v11, %v4182_v18  ;;  %v4452_v11 = vld [vmem:[#allocation8 + $0x1f4] sm:$0xf] }
 0x32c   : > { %4306 = vst [vmem:[%s6107_s2 + $0xe0] sm:$0xf] %v3298_v4  ;;  %2785 = vmatpush.bf16.msra.mxu1 %v4229_v49  ;;  %v4012_v4 = vld [vmem:[#allocation8 + $0xd0] sm:$0xf]  ;;  %v4413_v49 = vld [vmem:[#allocation8 + $0xb4] sm:$0xf0] }
 0x32d   : > { %v2231_v37 = vpop.f32.mrf.mxu2  ;;  %v2320_v8 = vpop.f32.mrf.mxu3 }
 0x32e   : > { %v2321_v17 = vadd.f32 %v2320_v8, %v2231_v37  ;;  %2351 = vmatmul.bf16.gmra.mxu0 %v7236_v25  ;;  %2440 = vmatmul.bf16.gmra.mxu1 %v7237_v27  ;;  %v2056_v51 = vpop.f32.mrf.mxu0  ;;  %v2145_v63 = vpop.f32.mrf.mxu1  ;;  %v4419_v37 = vld [vmem:[#allocation8 + $0xe4] sm:$0xf0] }
 0x32f   : > { %2529 = vmatmul.bf16.gmra.mxu2 %v7236_v25  ;;  %2618 = vmatmul.bf16.gmra.mxu3 %v7237_v27  ;;  %v2146_v61 = vadd.f32 %v2145_v63, %v2056_v51  ;;  %v4209_v51 = vor.u32 %v4464_v38, %v4206_v60  ;;  %v4013_v63 = vor.u32 %v4419_v37, %v4012_v4  ;;  %v4461_v38 = vld [vmem:[#allocation8 + $0x234] sm:$0xf0]  ;;  %v7247_v37 = vld [vmem:[#allocation44_spill] sm:$0xff] }
 0x330   : > { %v3125_v21 = vpack.c.bf16 %v2321_v17, %v2143_v44  ;;  %v4416_v44 = vld [vmem:[#allocation8 + $0xd4] sm:$0xf] }
 0x331   : > { %v4017_v16 = vor.u32 %v4416_v44, %v4014_v59  ;;  %2964 = vmatpush.bf16.msra.mxu3 %v4209_v51  ;;  %2697 = vmatpush.bf16.msra.mxu0 %v4013_v63  ;;  %v4180_v44 = vld [vmem:[#allocation8 + $0x220] sm:$0xf] }
 0x332   : > { %v3299_v9 = vrot.slane %v3125_v21, 4  ;;  %v4204_v21 = vld [vmem:[#allocation8 + $0x250] sm:$0xf]  ;;  %v4181_v4 = vor.u32 %v4461_v38, %v4180_v44 }
 0x333   : > { %2875 = vmatpush.bf16.msra.mxu2 %v4017_v16 }
 0x334   : > { %4307 = vst [vmem:[%s6107_s2 + $0xe4] sm:$0xf] %v3299_v9  ;;  %v4467_v9 = vld [vmem:[#allocation8 + $0x264] sm:$0xf0] }
 0x335   : > { %v2234_v14 = vpop.f32.mrf.mxu2  ;;  %v2323_v48 = vpop.f32.mrf.mxu3  ;;  %2965 = vmatpush.bf16.msra.mxu3 %v4185_v1 }
 0x336   : > { %v2324_v23 = vadd.f32 %v2323_v48, %v2234_v14  ;;  %v2058_v3 = vpop.f32.mrf.mxu0  ;;  %v2147_v36 = vpop.f32.mrf.mxu1  ;;  %v4205_v14 = vor.u32 %v4467_v9, %v4204_v21 }
 0x337   : > { %v2148_v33 = vadd.f32 %v2147_v36, %v2058_v3  ;;  %2876 = vmatpush.bf16.msra.mxu2 %v3993_v30  ;;  %v4158_v30 = vld [vmem:[#allocation8 + $0x208] sm:$0xf0] }
 0x338   : > { %v3128_v55 = vpack.c.bf16 %v2324_v23, %v2146_v61  ;;  %2786 = vmatpush.bf16.msra.mxu1 %v4205_v14  ;;  %v4161_v44 = vor.u32 %v4452_v11, %v4158_v30 }
 0x339   : > { %v4557_v31 = vpack.c.bf16 %v2148_v33, %v2146_v61 }
 0x33a   : > { %v3300_v45 = vrot.slane %v3128_v55, 4  ;;  %2966 = vmatpush.bf16.msra.mxu3 %v4161_v44 }
 0x33b   : > { %4741 = vst [vmem:[%s6107_s2 + $0x68] sm:$0xff] %v4557_v31  }
 0x33c   : > { %4308 = vst [vmem:[%s6107_s2 + $0xe8] sm:$0xf] %v3300_v45  ;;  %2787 = vmatpush.bf16.msra.mxu1 %v4181_v4  ;;  %v3964_v4 = vld [vmem:[#allocation8 + $0x70] sm:$0xf] }
 0x33d   : > { %v2236_v46 = vpop.f32.mrf.mxu2  ;;  %v2325_v13 = vpop.f32.mrf.mxu3 }
 0x33e   : > { %v2326_v7 = vadd.f32 %v2325_v13, %v2236_v46  ;;  %2356 = vmatmul.bf16.gmra.mxu0 %v7238_v12  ;;  %2445 = vmatmul.bf16.gmra.mxu1 %v7239_v24  ;;  %v7244_v13 = vld [vmem:[#allocation23_spill] sm:$0xff] }
 0x33f   : > { %2534 = vmatmul.bf16.gmra.mxu2 %v7238_v12  ;;  %2623 = vmatmul.bf16.gmra.mxu3 %v7239_v24 }
 0x340   : > { %v3131_v62 = vpack.c.bf16 %v2326_v7, %v2148_v33 }
 0x342   : > { %v3301_v57 = vrot.slane %v3131_v62, 4 }
 0x344   : > { %4309 = vst [vmem:[%s6107_s2 + $0xec] sm:$0xf] %v3301_v57  ;;  %v3988_v57 = vld [vmem:[#allocation8 + $0xa0] sm:$0xf] }
 0x345   : > { %v3989_v59 = vor.u32 %v4413_v49, %v3988_v57 }
 0x347   : > { %2698 = vmatpush.bf16.msra.mxu0 %v3989_v59 }
 0x34e   : > { %2361 = vmatmul.bf16.gmra.mxu0 %v7240_v50  ;;  %2450 = vmatmul.bf16.gmra.mxu1 %v7241_v58 }
 0x34f   : > { %2539 = vmatmul.bf16.gmra.mxu2 %v7240_v50  ;;  %2628 = vmatmul.bf16.gmra.mxu3 %v7241_v58 }
 0x35e   : > { %2366 = vmatmul.bf16.gmra.mxu0 %v7242_v15  ;;  %2455 = vmatmul.bf16.gmra.mxu1 %v7243_v2 }
 0x35f   : > { %2544 = vmatmul.bf16.gmra.mxu2 %v7242_v15  ;;  %2633 = vmatmul.bf16.gmra.mxu3 %v7243_v2 }
 0x364   : > { %v2061_v8 = vpop.f32.mrf.mxu0  ;;  %v2150_v17 = vpop.f32.mrf.mxu1 }
 0x365   : > { %v2151_v23 = vadd.f32 %v2150_v17, %v2061_v8 }
 0x36b   : > { %v2239_v48 = vpop.f32.mrf.mxu2  ;;  %v2328_v61 = vpop.f32.mrf.mxu3 }
 0x36c   : > { %v2329_v3 = vadd.f32 %v2328_v61, %v2239_v48  ;;  %v2063_v36 = vpop.f32.mrf.mxu0  ;;  %v2152_v33 = vpop.f32.mrf.mxu1 }
 0x36d   : > { %v2153_v55 = vadd.f32 %v2152_v33, %v2063_v36 }
 0x36e   : > { %v3134_v31 = vpack.c.bf16 %v2329_v3, %v2151_v23  ;;  %2371 = vmatmul.bf16.gmra.mxu0 %v6176_v6  ;;  %2460 = vmatmul.bf16.gmra.mxu1 %v7244_v13 }
 0x36f   : > { %v4562_v45 = vpack.c.bf16 %v2153_v55, %v2151_v23  ;;  %2549 = vmatmul.bf16.gmra.mxu2 %v6176_v6  ;;  %2638 = vmatmul.bf16.gmra.mxu3 %v7244_v13 }
 0x370   : > { %v3302_v46 = vrot.slane %v3134_v31, 4 }
 0x371   : > { %4742 = vst [vmem:[%s6107_s2 + $0x70] sm:$0xff] %v4562_v45  }
 0x372   : > { %4310 = vst [vmem:[%s6107_s2 + $0xf0] sm:$0xf] %v3302_v46  ;;  %v7248_v46 = vld [vmem:[#allocation35_spill] sm:$0xff] }
 0x373   : > { %v2241_v7 = vpop.f32.mrf.mxu2  ;;  %v2330_v40 = vpop.f32.mrf.mxu3 }
 0x374   : > { %v2331_v28 = vadd.f32 %v2330_v40, %v2241_v7  ;;  %v7249_v7 = vld [vmem:[#allocation33_spill] sm:$0xff] }
 0x376   : > { %v3137_v39 = vpack.c.bf16 %v2331_v28, %v2153_v55  ;;  %v4404_v28 = vld [vmem:[#allocation8 + $0x74] sm:$0xf] }
 0x378   : > { %v3303_v62 = vrot.slane %v3137_v39, 4  ;;  %v3966_v39 = vld [vmem:[#allocation8 + $0x88] sm:$0xf0] }
 0x379   : > { %v3969_v32 = vor.u32 %v4404_v28, %v3966_v39 }
 0x37a   : > { %4311 = vst [vmem:[%s6107_s2 + $0xf4] sm:$0xf] %v3303_v62 }
 0x37b   : > { %2877 = vmatpush.bf16.msra.mxu2 %v3969_v32 }
 0x37e   : > { %2376 = vmatmul.bf16.gmra.mxu0 %v7245_v29  ;;  %2465 = vmatmul.bf16.gmra.mxu1 %v7246_v56 }
 0x37f   : > { %2554 = vmatmul.bf16.gmra.mxu2 %v7245_v29  ;;  %2643 = vmatmul.bf16.gmra.mxu3 %v7246_v56 }
 0x38b   : > { %v2066_v16 = vpop.f32.mrf.mxu0  ;;  %v2155_v60 = vpop.f32.mrf.mxu1 }
 0x38c   : > { %v2156_v51 = vadd.f32 %v2155_v60, %v2066_v16 }
 0x38e   : > { %2381 = vmatmul.bf16.gmra.mxu0 %v6368_v5  ;;  %2470 = vmatmul.bf16.gmra.mxu1 %v7247_v37 }
 0x38f   : > { %2559 = vmatmul.bf16.gmra.mxu2 %v6368_v5  ;;  %2648 = vmatmul.bf16.gmra.mxu3 %v7247_v37 }
 0x392   : > { %v2244_v8 = vpop.f32.mrf.mxu2  ;;  %v2333_v17 = vpop.f32.mrf.mxu3 }
 0x393   : > { %v2334_v63 = vadd.f32 %v2333_v17, %v2244_v8  ;;  %v2068_v21 = vpop.f32.mrf.mxu0  ;;  %v2157_v9 = vpop.f32.mrf.mxu1  ;;  %v4407_v8 = vld [vmem:[#allocation8 + $0x84] sm:$0xf0] }
 0x394   : > { %v2158_v14 = vadd.f32 %v2157_v9, %v2068_v21  ;;  %v4156_v21 = vld [vmem:[#allocation8 + $0x1f0] sm:$0xf]  ;;  %v4455_v9 = vld [vmem:[#allocation8 + $0x204] sm:$0xf0] }
 0x395   : > { %v3140_v48 = vpack.c.bf16 %v2334_v63, %v2156_v51  ;;  %v3965_v63 = vor.u32 %v4407_v8, %v3964_v4 }
 0x396   : > { %v4567_v61 = vpack.c.bf16 %v2158_v14, %v2156_v51 }
 0x397   : > { %v3304_v23 = vrot.slane %v3140_v48, 4  ;;  %2699 = vmatpush.bf16.msra.mxu0 %v3965_v63  ;;  %v4134_v63 = vld [vmem:[#allocation8 + $0x1d8] sm:$0xf0] }
 0x398   : > { %4743 = vst [vmem:[%s6107_s2 + $0x78] sm:$0xff] %v4567_v61  }
 0x399   : > { %4312 = vst [vmem:[%s6107_s2 + $0xf8] sm:$0xf] %v3304_v23  ;;  %v4157_v23 = vor.u32 %v4455_v9, %v4156_v21 }
 0x39a   : > { %v2246_v3 = vpop.f32.mrf.mxu2  ;;  %v2335_v36 = vpop.f32.mrf.mxu3 }
 0x39b   : > { %v2336_v33 = vadd.f32 %v2335_v36, %v2246_v3  ;;  %v2347_v55 = vpop.f32.mrf.mxu0  ;;  %v2436_v31 = vpop.f32.mrf.mxu1  ;;  %2788 = vmatpush.bf16.msra.mxu1 %v4157_v23  ;;  %v7250_v36 = vld [vmem:[#allocation34_spill] sm:$0xff] }
 0x39c   : > { %v2437_v18 = vadd.f32 %v2436_v31, %v2347_v55 }
 0x39d   : > { %v3143_v45 = vpack.c.bf16 %v2336_v33, %v2158_v14  ;;  %v7251_v33 = vld [vmem:[#allocation38_spill] sm:$0xff] }
 0x39e   : > { %2386 = vmatmul.bf16.gmra.mxu0 %v7248_v46  ;;  %2475 = vmatmul.bf16.gmra.mxu1 %v7249_v7 }
 0x39f   : > { %v3305_v40 = vrot.slane %v3143_v45, 4  ;;  %2564 = vmatmul.bf16.gmra.mxu2 %v7248_v46  ;;  %2653 = vmatmul.bf16.gmra.mxu3 %v7249_v7 }
 0x3a1   : > { %4313 = vst [vmem:[%s6107_s2 + $0xfc] sm:$0xf] %v3305_v40 }
 0x3a2   : > { %v2525_v62 = vpop.f32.mrf.mxu2  ;;  %v2614_v42 = vpop.f32.mrf.mxu3 }
 0x3a3   : > { %v2615_v1 = vadd.f32 %v2614_v42, %v2525_v62  ;;  %v2349_v57 = vpop.f32.mrf.mxu0  ;;  %v2438_v49 = vpop.f32.mrf.mxu1 }
 0x3a4   : > { %v2439_v59 = vadd.f32 %v2438_v49, %v2349_v57 }
 0x3a5   : > { %v3051_v38 = vpack.c.bf16 %v2615_v1, %v2437_v18 }
 0x3a6   : > { %v4572_v16 = vpack.c.bf16 %v2439_v59, %v2437_v18 }
 0x3a7   : > { %v3403_v60 = vrot.slane %v3051_v38, 4 }
 0x3a8   : > { %4573 = vst [vmem:[%s6806_s3] sm:$0xff] %v4572_v16   ;;  %v4398_v16 = vld [vmem:[#allocation8 + $0x44] sm:$0xf] }
 0x3a9   : > { %4314 = vst [vmem:[%s6806_s3 + $0x80] sm:$0xf] %v3403_v60  ;;  %v3942_v60 = vld [vmem:[#allocation8 + $0x58] sm:$0xf0] }
 0x3aa   : > { %v2527_v17 = vpop.f32.mrf.mxu2  ;;  %v2616_v51 = vpop.f32.mrf.mxu3 }
 0x3ab   : > { %v2617_v14 = vadd.f32 %v2616_v51, %v2527_v17  ;;  %v2352_v48 = vpop.f32.mrf.mxu0  ;;  %v2441_v61 = vpop.f32.mrf.mxu1  ;;  %v3945_v17 = vor.u32 %v4398_v16, %v3942_v60  ;;  %v4446_v51 = vld [vmem:[#allocation8 + $0x1c4] sm:$0xf] }
 0x3ac   : > { %v2442_v40 = vadd.f32 %v2441_v61, %v2352_v48  ;;  %v4137_v61 = vor.u32 %v4446_v51, %v4134_v63 }
 0x3ad   : > { %v3054_v3 = vpack.c.bf16 %v2617_v14, %v2439_v59  ;;  %2878 = vmatpush.bf16.msra.mxu2 %v3945_v17 }
 0x3ae   : > { %2391 = vmatmul.bf16.gmra.mxu0 %v7250_v36  ;;  %2480 = vmatmul.bf16.gmra.mxu1 %v7251_v33 }
 0x3af   : > { %v3404_v55 = vrot.slane %v3054_v3, 4  ;;  %2569 = vmatmul.bf16.gmra.mxu2 %v7250_v36  ;;  %2658 = vmatmul.bf16.gmra.mxu3 %v7251_v33 }
 0x3b0   : > { %2967 = vmatpush.bf16.msra.mxu3 %v4137_v61 }
 0x3b1   : > { %4315 = vst [vmem:[%s6806_s3 + $0x84] sm:$0xf] %v3404_v55 }
 0x3b2   : > { %v2530_v31 = vpop.f32.mrf.mxu2  ;;  %v2619_v45 = vpop.f32.mrf.mxu3 }
 0x3b3   : > { %v2620_v28 = vadd.f32 %v2619_v45, %v2530_v31  ;;  %v2354_v39 = vpop.f32.mrf.mxu0  ;;  %v2443_v62 = vpop.f32.mrf.mxu1  ;;  %v3940_v45 = vld [vmem:[#allocation8 + $0x40] sm:$0xf] }
 0x3b4   : > { %v2444_v42 = vadd.f32 %v2443_v62, %v2354_v39 }
 0x3b5   : > { %v3057_v32 = vpack.c.bf16 %v2620_v28, %v2442_v40 }
 0x3b6   : > { %v4577_v11 = vpack.c.bf16 %v2444_v42, %v2442_v40  ;;  %v4401_v40 = vld [vmem:[#allocation8 + $0x54] sm:$0xf0] }
 0x3b7   : > { %v3405_v30 = vrot.slane %v3057_v32, 4  ;;  %v3941_v62 = vor.u32 %v4401_v40, %v3940_v45  ;;  %v4449_v32 = vld [vmem:[#allocation8 + $0x1d4] sm:$0xf0] }
 0x3b8   : > { %4744 = vst [vmem:[%s6806_s3 + $0x8] sm:$0xff] %v4577_v11  }
 0x3b9   : > { %4316 = vst [vmem:[%s6806_s3 + $0x88] sm:$0xf] %v3405_v30  ;;  %2700 = vmatpush.bf16.msra.mxu0 %v3941_v62  ;;  %v4110_v62 = vld [vmem:[#allocation8 + $0x1a8] sm:$0xf0] }
 0x3ba   : > { %v2532_v18 = vpop.f32.mrf.mxu2  ;;  %v2621_v1 = vpop.f32.mrf.mxu3 }
 0x3bb   : > { %v2622_v57 = vadd.f32 %v2621_v1, %v2532_v18  ;;  %v2357_v49 = vpop.f32.mrf.mxu0  ;;  %v2446_v44 = vpop.f32.mrf.mxu1 }
 0x3bc   : > { %v2447_v21 = vadd.f32 %v2446_v44, %v2357_v49 }
 0x3bd   : > { %v3060_v59 = vpack.c.bf16 %v2622_v57, %v2444_v42  ;;  %v4132_v42 = vld [vmem:[#allocation8 + $0x1c0] sm:$0xf] }
 0x3be   : > { %2396 = vmatmul.bf16.gmra.mxu0 %v6579_v20  ;;  %2485 = vmatmul.bf16.gmra.mxu1 %v6581_v54  ;;  %v4133_v1 = vor.u32 %v4449_v32, %v4132_v42 }
 0x3bf   : > { %v3406_v38 = vrot.slane %v3060_v59, 4  ;;  %2574 = vmatmul.bf16.gmra.mxu2 %v6579_v20  ;;  %2663 = vmatmul.bf16.gmra.mxu3 %v6581_v54 }
 0x3c0   : > { %2789 = vmatpush.bf16.msra.mxu1 %v4133_v1 }
 0x3c1   : > { %4317 = vst [vmem:[%s6806_s3 + $0x8c] sm:$0xf] %v3406_v38 }
 0x3c2   : > { %v2535_v4 = vpop.f32.mrf.mxu2  ;;  %v2624_v8 = vpop.f32.mrf.mxu3 }
 0x3c3   : > { %v2625_v9 = vadd.f32 %v2624_v8, %v2535_v4  ;;  %v2359_v14 = vpop.f32.mrf.mxu0  ;;  %v2448_v48 = vpop.f32.mrf.mxu1 }
 0x3c4   : > { %v2449_v23 = vadd.f32 %v2448_v48, %v2359_v14 }
 0x3c5   : > { %v3063_v3 = vpack.c.bf16 %v2625_v9, %v2447_v21 }
 0x3c6   : > { %v4582_v55 = vpack.c.bf16 %v2449_v23, %v2447_v21 }
 0x3c7   : > { %v3407_v31 = vrot.slane %v3063_v3, 4 }
 0x3c8   : > { %4745 = vst [vmem:[%s6806_s3 + $0x10] sm:$0xff] %v4582_v55   ;;  %v4392_v55 = vld [vmem:[#allocation8 + $0x14] sm:$0xf] }
 0x3c9   : > { %4318 = vst [vmem:[%s6806_s3 + $0x90] sm:$0xf] %v3407_v31  ;;  %v3918_v31 = vld [vmem:[#allocation8 + $0x28] sm:$0xf0] }
 0x3ca   : > { %v2537_v28 = vpop.f32.mrf.mxu2  ;;  %v2626_v39 = vpop.f32.mrf.mxu3 }
 0x3cb   : > { %v2627_v11 = vadd.f32 %v2626_v39, %v2537_v28  ;;  %v2362_v30 = vpop.f32.mrf.mxu0  ;;  %v2451_v18 = vpop.f32.mrf.mxu1  ;;  %v3921_v28 = vor.u32 %v4392_v55, %v3918_v31  ;;  %v4440_v39 = vld [vmem:[#allocation8 + $0x194] sm:$0xf] }
 0x3cc   : > { %v2452_v38 = vadd.f32 %v2451_v18, %v2362_v30  ;;  %v4113_v18 = vor.u32 %v4440_v39, %v4110_v62 }
 0x3cd   : > { %v3066_v57 = vpack.c.bf16 %v2627_v11, %v2449_v23  ;;  %2879 = vmatpush.bf16.msra.mxu2 %v3921_v28 }
 0x3ce   : > { %2401 = vmatmul.bf16.gmra.mxu0 %v6634_v0  ;;  %2490 = vmatmul.bf16.gmra.mxu1 %v6636_v22 }
 0x3cf   : > { %v3408_v49 = vrot.slane %v3066_v57, 4  ;;  %2579 = vmatmul.bf16.gmra.mxu2 %v6634_v0  ;;  %2668 = vmatmul.bf16.gmra.mxu3 %v6636_v22 }
 0x3d0   : > { %2968 = vmatpush.bf16.msra.mxu3 %v4113_v18 }
 0x3d1   : > { %4319 = vst [vmem:[%s6806_s3 + $0x94] sm:$0xf] %v3408_v49 }
 0x3d2   : > { %v2540_v44 = vpop.f32.mrf.mxu2  ;;  %v2629_v59 = vpop.f32.mrf.mxu3 }
 0x3d3   : > { %v2630_v16 = vadd.f32 %v2629_v59, %v2540_v44  ;;  %v2364_v60 = vpop.f32.mrf.mxu0  ;;  %v2453_v4 = vpop.f32.mrf.mxu1  ;;  %v3916_v59 = vld [vmem:[#allocation8 + $0x10] sm:$0xf] }
 0x3d4   : > { %v2454_v8 = vadd.f32 %v2453_v4, %v2364_v60 }
 0x3d5   : > { %v3069_v17 = vpack.c.bf16 %v2630_v16, %v2452_v38 }
 0x3d6   : > { %v4587_v51 = vpack.c.bf16 %v2454_v8, %v2452_v38  ;;  %v4395_v38 = vld [vmem:[#allocation8 + $0x24] sm:$0xf0] }
 0x3d7   : > { %v3409_v63 = vrot.slane %v3069_v17, 4  ;;  %v3917_v4 = vor.u32 %v4395_v38, %v3916_v59  ;;  %v4443_v17 = vld [vmem:[#allocation8 + $0x1a4] sm:$0xf0] }
 0x3d8   : > { %4746 = vst [vmem:[%s6806_s3 + $0x18] sm:$0xff] %v4587_v51  }
 0x3d9   : > { %4320 = vst [vmem:[%s6806_s3 + $0x98] sm:$0xf] %v3409_v63  ;;  %2701 = vmatpush.bf16.msra.mxu0 %v3917_v4 }
 0x3da   : > { %v2542_v21 = vpop.f32.mrf.mxu2  ;;  %v2631_v9 = vpop.f32.mrf.mxu3 }
 0x3db   : > { %v2632_v14 = vadd.f32 %v2631_v9, %v2542_v21  ;;  %v2367_v48 = vpop.f32.mrf.mxu0  ;;  %v2456_v61 = vpop.f32.mrf.mxu1 }
 0x3dc   : > { %v2457_v42 = vadd.f32 %v2456_v61, %v2367_v48 }
 0x3dd   : > { %v3072_v23 = vpack.c.bf16 %v2632_v14, %v2454_v8  ;;  %v4108_v8 = vld [vmem:[#allocation8 + $0x190] sm:$0xf] }
 0x3de   : > { %2406 = vmatmul.bf16.gmra.mxu0 %v6671_v34  ;;  %2495 = vmatmul.bf16.gmra.mxu1 %v6673_v47  ;;  %v4109_v9 = vor.u32 %v4443_v17, %v4108_v8 }
 0x3df   : > { %v3410_v3 = vrot.slane %v3072_v23, 4  ;;  %2584 = vmatmul.bf16.gmra.mxu2 %v6671_v34  ;;  %2673 = vmatmul.bf16.gmra.mxu3 %v6673_v47 }
 0x3e0   : > { %2790 = vmatpush.bf16.msra.mxu1 %v4109_v9 }
 0x3e1   : > { %4321 = vst [vmem:[%s6806_s3 + $0x9c] sm:$0xf] %v3410_v3 }
 0x3e2   : > { %v2545_v45 = vpop.f32.mrf.mxu2  ;;  %v2634_v40 = vpop.f32.mrf.mxu3 }
 0x3e3   : > { %v2635_v32 = vadd.f32 %v2634_v40, %v2545_v45  ;;  %v2369_v11 = vpop.f32.mrf.mxu0  ;;  %v2458_v30 = vpop.f32.mrf.mxu1 }
 0x3e4   : > { %v2459_v1 = vadd.f32 %v2458_v30, %v2369_v11 }
 0x3e5   : > { %v3075_v57 = vpack.c.bf16 %v2635_v32, %v2457_v42 }
 0x3e6   : > { %v4592_v49 = vpack.c.bf16 %v2459_v1, %v2457_v42 }
 0x3e7   : > { %v3411_v44 = vrot.slane %v3075_v57, 4 }
 0x3e8   : > { %4747 = vst [vmem:[%s6806_s3 + $0x20] sm:$0xff] %v4592_v49  }
 0x3e9   : > { %4322 = vst [vmem:[%s6806_s3 + $0xa0] sm:$0xf] %v3411_v44 }
 0x3ea   : > { %v2547_v16 = vpop.f32.mrf.mxu2  ;;  %v2636_v60 = vpop.f32.mrf.mxu3 }
 0x3eb   : > { %v2637_v51 = vadd.f32 %v2636_v60, %v2547_v16  ;;  %v2372_v63 = vpop.f32.mrf.mxu0  ;;  %v2461_v21 = vpop.f32.mrf.mxu1 }
 0x3ec   : > { %v2462_v3 = vadd.f32 %v2461_v21, %v2372_v63 }
 0x3ed   : > { %v3078_v14 = vpack.c.bf16 %v2637_v51, %v2459_v1 }
 0x3ee   : > { %2411 = vmatmul.bf16.gmra.mxu0 %v6696_v53  ;;  %2500 = vmatmul.bf16.gmra.mxu1 %v6698_v35 }
 0x3ef   : > { %v3412_v48 = vrot.slane %v3078_v14, 4  ;;  %2589 = vmatmul.bf16.gmra.mxu2 %v6696_v53  ;;  %2678 = vmatmul.bf16.gmra.mxu3 %v6698_v35 }
 0x3f1   : > { %4323 = vst [vmem:[%s6806_s3 + $0xa4] sm:$0xf] %v3412_v48 }
 0x3f2   : > { %v2550_v61 = vpop.f32.mrf.mxu2  ;;  %v2639_v23 = vpop.f32.mrf.mxu3 }
 0x3f3   : > { %v2640_v55 = vadd.f32 %v2639_v23, %v2550_v61  ;;  %v2374_v31 = vpop.f32.mrf.mxu0  ;;  %v2463_v45 = vpop.f32.mrf.mxu1 }
 0x3f4   : > { %v2464_v40 = vadd.f32 %v2463_v45, %v2374_v31 }
 0x3f5   : > { %v3081_v28 = vpack.c.bf16 %v2640_v55, %v2462_v3 }
 0x3f6   : > { %v4597_v39 = vpack.c.bf16 %v2464_v40, %v2462_v3 }
 0x3f7   : > { %v3413_v62 = vrot.slane %v3081_v28, 4 }
 0x3f8   : > { %4748 = vst [vmem:[%s6806_s3 + $0x28] sm:$0xff] %v4597_v39  }
 0x3f9   : > { %4324 = vst [vmem:[%s6806_s3 + $0xa8] sm:$0xf] %v3413_v62 }
 0x3fa   : > { %v2552_v42 = vpop.f32.mrf.mxu2  ;;  %v2641_v32 = vpop.f32.mrf.mxu3 }
 0x3fb   : > { %v2642_v11 = vadd.f32 %v2641_v32, %v2552_v42  ;;  %v2377_v30 = vpop.f32.mrf.mxu0  ;;  %v2466_v18 = vpop.f32.mrf.mxu1 }
 0x3fc   : > { %v2467_v59 = vadd.f32 %v2466_v18, %v2377_v30 }
 0x3fd   : > { %v3084_v1 = vpack.c.bf16 %v2642_v11, %v2464_v40 }
 0x3fe   : > { %2416 = vmatmul.bf16.gmra.mxu0 %v6718_v52  ;;  %2505 = vmatmul.bf16.gmra.mxu1 %v6720_v43 }
 0x3ff   : > { %v3414_v57 = vrot.slane %v3084_v1, 4  ;;  %2594 = vmatmul.bf16.gmra.mxu2 %v6718_v52  ;;  %2683 = vmatmul.bf16.gmra.mxu3 %v6720_v43 }
 0x401   : > { %4325 = vst [vmem:[%s6806_s3 + $0xac] sm:$0xf] %v3414_v57 }
 0x402   : > { %v2555_v49 = vpop.f32.mrf.mxu2  ;;  %v2644_v44 = vpop.f32.mrf.mxu3 }
 0x403   : > { %v2645_v38 = vadd.f32 %v2644_v44, %v2555_v49  ;;  %v2379_v16 = vpop.f32.mrf.mxu0  ;;  %v2468_v60 = vpop.f32.mrf.mxu1 }
 0x404   : > { %v2469_v4 = vadd.f32 %v2468_v60, %v2379_v16 }
 0x405   : > { %v3087_v8 = vpack.c.bf16 %v2645_v38, %v2467_v59 }
 0x406   : > { %v4602_v17 = vpack.c.bf16 %v2469_v4, %v2467_v59 }
 0x407   : > { %v3415_v51 = vrot.slane %v3087_v8, 4 }
 0x408   : > { %4749 = vst [vmem:[%s6806_s3 + $0x30] sm:$0xff] %v4602_v17  }
 0x409   : > { %4326 = vst [vmem:[%s6806_s3 + $0xb0] sm:$0xf] %v3415_v51 }
 0x40a   : > { %v2557_v63 = vpop.f32.mrf.mxu2  ;;  %v2646_v21 = vpop.f32.mrf.mxu3 }
 0x40b   : > { %v2647_v9 = vadd.f32 %v2646_v21, %v2557_v63  ;;  %v2382_v14 = vpop.f32.mrf.mxu0  ;;  %v2471_v48 = vpop.f32.mrf.mxu1 }
 0x40c   : > { %v2472_v31 = vadd.f32 %v2471_v48, %v2382_v14 }
 0x40d   : > { %v3090_v61 = vpack.c.bf16 %v2647_v9, %v2469_v4 }
 0x40e   : > { %2421 = vmatmul.bf16.gmra.mxu0 %v6744_v26  ;;  %2510 = vmatmul.bf16.gmra.mxu1 %v6746_v10 }
 0x40f   : > { %v3416_v23 = vrot.slane %v3090_v61, 4  ;;  %2599 = vmatmul.bf16.gmra.mxu2 %v6744_v26  ;;  %2688 = vmatmul.bf16.gmra.mxu3 %v6746_v10 }
 0x411   : > { %4327 = vst [vmem:[%s6806_s3 + $0xb4] sm:$0xf] %v3416_v23 }
 0x412   : > { %v2560_v3 = vpop.f32.mrf.mxu2  ;;  %v2649_v55 = vpop.f32.mrf.mxu3 }
 0x413   : > { %v2650_v45 = vadd.f32 %v2649_v55, %v2560_v3  ;;  %v2384_v40 = vpop.f32.mrf.mxu0  ;;  %v2473_v28 = vpop.f32.mrf.mxu1 }
 0x414   : > { %v2474_v39 = vadd.f32 %v2473_v28, %v2384_v40 }
 0x415   : > { %v3093_v62 = vpack.c.bf16 %v2650_v45, %v2472_v31 }
 0x416   : > { %v4607_v42 = vpack.c.bf16 %v2474_v39, %v2472_v31 }
 0x417   : > { %v3417_v32 = vrot.slane %v3093_v62, 4 }
 0x418   : > { %4750 = vst [vmem:[%s6806_s3 + $0x38] sm:$0xff] %v4607_v42  }
 0x419   : > { %4328 = vst [vmem:[%s6806_s3 + $0xb8] sm:$0xf] %v3417_v32 }
 0x41a   : > { %v2562_v11 = vpop.f32.mrf.mxu2  ;;  %v2651_v30 = vpop.f32.mrf.mxu3 }
 0x41b   : > { %v2652_v18 = vadd.f32 %v2651_v30, %v2562_v11  ;;  %v2387_v1 = vpop.f32.mrf.mxu0  ;;  %v2476_v57 = vpop.f32.mrf.mxu1 }
 0x41c   : > { %v2477_v16 = vadd.f32 %v2476_v57, %v2387_v1 }
 0x41d   : > { %v3096_v49 = vpack.c.bf16 %v2652_v18, %v2474_v39 }
 0x41e   : > { %2702 = vmatmul.bf16.vlgmr.msra.gmra.mxu0 %v7234_v41  ;;  %2791 = vmatmul.bf16.vlgmr.msra.gmra.mxu1 %v7235_v19 }
 0x41f   : > { %v3418_v44 = vrot.slane %v3096_v49, 4  ;;  %2880 = vmatmul.bf16.vlgmr.msra.gmra.mxu2 %v7234_v41  ;;  %2969 = vmatmul.bf16.vlgmr.msra.gmra.mxu3 %v7235_v19 }
 0x421   : > { %4329 = vst [vmem:[%s6806_s3 + $0xbc] sm:$0xf] %v3418_v44 }
 0x422   : > { %v2565_v59 = vpop.f32.mrf.mxu2  ;;  %v2654_v38 = vpop.f32.mrf.mxu3 }
 0x423   : > { %v2655_v60 = vadd.f32 %v2654_v38, %v2565_v59  ;;  %v2389_v4 = vpop.f32.mrf.mxu0  ;;  %v2478_v8 = vpop.f32.mrf.mxu1 }
 0x424   : > { %v2479_v17 = vadd.f32 %v2478_v8, %v2389_v4 }
 0x425   : > { %v3099_v51 = vpack.c.bf16 %v2655_v60, %v2477_v16 }
 0x426   : > { %v4612_v63 = vpack.c.bf16 %v2479_v17, %v2477_v16 }
 0x427   : > { %v3419_v21 = vrot.slane %v3099_v51, 4 }
 0x428   : > { %4751 = vst [vmem:[%s6806_s3 + $0x40] sm:$0xff] %v4612_v63  }
 0x429   : > { %4330 = vst [vmem:[%s6806_s3 + $0xc0] sm:$0xf] %v3419_v21 }
 0x42a   : > { %v2567_v9 = vpop.f32.mrf.mxu2  ;;  %v2656_v14 = vpop.f32.mrf.mxu3 }
 0x42b   : > { %v2657_v48 = vadd.f32 %v2656_v14, %v2567_v9  ;;  %v2392_v41 = vpop.f32.mrf.mxu0  ;;  %v2481_v61 = vpop.f32.mrf.mxu1 }
 0x42c   : > { %v2482_v31 = vadd.f32 %v2481_v61, %v2392_v41 }
 0x42d   : > { %v3102_v19 = vpack.c.bf16 %v2657_v48, %v2479_v17 }
 0x42e   : > { %2707 = vmatmul.bf16.gmra.mxu0 %v7236_v25  ;;  %2796 = vmatmul.bf16.gmra.mxu1 %v7237_v27 }
 0x42f   : > { %v3420_v23 = vrot.slane %v3102_v19, 4  ;;  %2885 = vmatmul.bf16.gmra.mxu2 %v7236_v25  ;;  %2974 = vmatmul.bf16.gmra.mxu3 %v7237_v27 }
 0x431   : > { %4331 = vst [vmem:[%s6806_s3 + $0xc4] sm:$0xf] %v3420_v23 }
 0x432   : > { %v2570_v3 = vpop.f32.mrf.mxu2  ;;  %v2659_v55 = vpop.f32.mrf.mxu3 }
 0x433   : > { %v2660_v45 = vadd.f32 %v2659_v55, %v2570_v3  ;;  %v2394_v40 = vpop.f32.mrf.mxu0  ;;  %v2483_v28 = vpop.f32.mrf.mxu1 }
 0x434   : > { %v2484_v39 = vadd.f32 %v2483_v28, %v2394_v40 }
 0x435   : > { %v3105_v62 = vpack.c.bf16 %v2660_v45, %v2482_v31 }
 0x436   : > { %v4617_v42 = vpack.c.bf16 %v2484_v39, %v2482_v31 }
 0x437   : > { %v3421_v32 = vrot.slane %v3105_v62, 4 }
 0x438   : > { %4752 = vst [vmem:[%s6806_s3 + $0x48] sm:$0xff] %v4617_v42  }
 0x439   : > { %4332 = vst [vmem:[%s6806_s3 + $0xc8] sm:$0xf] %v3421_v32 }
 0x43a   : > { %v2572_v11 = vpop.f32.mrf.mxu2  ;;  %v2661_v30 = vpop.f32.mrf.mxu3 }
 0x43b   : > { %v2662_v18 = vadd.f32 %v2661_v30, %v2572_v11  ;;  %v2397_v25 = vpop.f32.mrf.mxu0  ;;  %v2486_v1 = vpop.f32.mrf.mxu1 }
 0x43c   : > { %v2487_v59 = vadd.f32 %v2486_v1, %v2397_v25 }
 0x43d   : > { %v3108_v27 = vpack.c.bf16 %v2662_v18, %v2484_v39 }
 0x43e   : > { %2712 = vmatmul.bf16.gmra.mxu0 %v7238_v12  ;;  %2801 = vmatmul.bf16.gmra.mxu1 %v7239_v24 }
 0x43f   : > { %v3422_v57 = vrot.slane %v3108_v27, 4  ;;  %2890 = vmatmul.bf16.gmra.mxu2 %v7238_v12  ;;  %2979 = vmatmul.bf16.gmra.mxu3 %v7239_v24 }
 0x441   : > { %4333 = vst [vmem:[%s6806_s3 + $0xcc] sm:$0xf] %v3422_v57 }
 0x442   : > { %v2575_v49 = vpop.f32.mrf.mxu2  ;;  %v2664_v44 = vpop.f32.mrf.mxu3 }
 0x443   : > { %v2665_v38 = vadd.f32 %v2664_v44, %v2575_v49  ;;  %v2399_v16 = vpop.f32.mrf.mxu0  ;;  %v2488_v60 = vpop.f32.mrf.mxu1 }
 0x444   : > { %v2489_v4 = vadd.f32 %v2488_v60, %v2399_v16 }
 0x445   : > { %v3111_v8 = vpack.c.bf16 %v2665_v38, %v2487_v59 }
 0x446   : > { %v4622_v17 = vpack.c.bf16 %v2489_v4, %v2487_v59 }
 0x447   : > { %v3423_v51 = vrot.slane %v3111_v8, 4 }
 0x448   : > { %4753 = vst [vmem:[%s6806_s3 + $0x50] sm:$0xff] %v4622_v17  }
 0x449   : > { %4334 = vst [vmem:[%s6806_s3 + $0xd0] sm:$0xf] %v3423_v51 }
 0x44a   : > { %v2577_v63 = vpop.f32.mrf.mxu2  ;;  %v2666_v21 = vpop.f32.mrf.mxu3 }
 0x44b   : > { %v2667_v9 = vadd.f32 %v2666_v21, %v2577_v63  ;;  %v2402_v12 = vpop.f32.mrf.mxu0  ;;  %v2491_v14 = vpop.f32.mrf.mxu1 }
 0x44c   : > { %v2492_v19 = vadd.f32 %v2491_v14, %v2402_v12 }
 0x44d   : > { %v3114_v24 = vpack.c.bf16 %v2667_v9, %v2489_v4 }
 0x44e   : > { %2717 = vmatmul.bf16.gmra.mxu0 %v7240_v50  ;;  %2806 = vmatmul.bf16.gmra.mxu1 %v7241_v58 }
 0x44f   : > { %v3424_v48 = vrot.slane %v3114_v24, 4  ;;  %2895 = vmatmul.bf16.gmra.mxu2 %v7240_v50  ;;  %2984 = vmatmul.bf16.gmra.mxu3 %v7241_v58 }
 0x451   : > { %4335 = vst [vmem:[%s6806_s3 + $0xd4] sm:$0xf] %v3424_v48 }
 0x452   : > { %v2580_v41 = vpop.f32.mrf.mxu2  ;;  %v2669_v61 = vpop.f32.mrf.mxu3 }
 0x453   : > { %v2670_v23 = vadd.f32 %v2669_v61, %v2580_v41  ;;  %v2404_v3 = vpop.f32.mrf.mxu0  ;;  %v2493_v55 = vpop.f32.mrf.mxu1 }
 0x454   : > { %v2494_v31 = vadd.f32 %v2493_v55, %v2404_v3 }
 0x455   : > { %v3117_v45 = vpack.c.bf16 %v2670_v23, %v2492_v19 }
 0x456   : > { %v4627_v40 = vpack.c.bf16 %v2494_v31, %v2492_v19 }
 0x457   : > { %v3425_v28 = vrot.slane %v3117_v45, 4 }
 0x458   : > { %4754 = vst [vmem:[%s6806_s3 + $0x58] sm:$0xff] %v4627_v40  }
 0x459   : > { %4336 = vst [vmem:[%s6806_s3 + $0xd8] sm:$0xf] %v3425_v28 }
 0x45a   : > { %v2582_v39 = vpop.f32.mrf.mxu2  ;;  %v2671_v62 = vpop.f32.mrf.mxu3 }
 0x45b   : > { %v2672_v42 = vadd.f32 %v2671_v62, %v2582_v39  ;;  %v2407_v50 = vpop.f32.mrf.mxu0  ;;  %v2496_v32 = vpop.f32.mrf.mxu1 }
 0x45c   : > { %v2497_v25 = vadd.f32 %v2496_v32, %v2407_v50 }
 0x45d   : > { %v3120_v58 = vpack.c.bf16 %v2672_v42, %v2494_v31 }
 0x45e   : > { %2722 = vmatmul.bf16.gmra.mxu0 %v7242_v15  ;;  %2811 = vmatmul.bf16.gmra.mxu1 %v7243_v2 }
 0x45f   : > { %v3426_v11 = vrot.slane %v3120_v58, 4  ;;  %2900 = vmatmul.bf16.gmra.mxu2 %v7242_v15  ;;  %2989 = vmatmul.bf16.gmra.mxu3 %v7243_v2 }
 0x461   : > { %4337 = vst [vmem:[%s6806_s3 + $0xdc] sm:$0xf] %v3426_v11 }
 0x462   : > { %v2585_v30 = vpop.f32.mrf.mxu2  ;;  %v2674_v18 = vpop.f32.mrf.mxu3 }
 0x463   : > { %v2675_v1 = vadd.f32 %v2674_v18, %v2585_v30  ;;  %v2409_v27 = vpop.f32.mrf.mxu0  ;;  %v2498_v57 = vpop.f32.mrf.mxu1 }
 0x464   : > { %v2499_v49 = vadd.f32 %v2498_v57, %v2409_v27 }
 0x465   : > { %v3123_v44 = vpack.c.bf16 %v2675_v1, %v2497_v25 }
 0x466   : > { %v4632_v59 = vpack.c.bf16 %v2499_v49, %v2497_v25 }
 0x467   : > { %v3427_v38 = vrot.slane %v3123_v44, 4 }
 0x468   : > { %4755 = vst [vmem:[%s6806_s3 + $0x60] sm:$0xff] %v4632_v59  }
 0x469   : > { %4338 = vst [vmem:[%s6806_s3 + $0xe0] sm:$0xf] %v3427_v38 }
 0x46a   : > { %v2587_v16 = vpop.f32.mrf.mxu2  ;;  %v2676_v60 = vpop.f32.mrf.mxu3 }
 0x46b   : > { %v2677_v4 = vadd.f32 %v2676_v60, %v2587_v16  ;;  %v2412_v15 = vpop.f32.mrf.mxu0  ;;  %v2501_v8 = vpop.f32.mrf.mxu1 }
 0x46c   : > { %v2502_v21 = vadd.f32 %v2501_v8, %v2412_v15 }
 0x46d   : > { %v3126_v2 = vpack.c.bf16 %v2677_v4, %v2499_v49 }
 0x46e   : > { %2727 = vmatmul.bf16.gmra.mxu0 %v6176_v6  ;;  %2816 = vmatmul.bf16.gmra.mxu1 %v7244_v13 }
 0x46f   : > { %v3428_v17 = vrot.slane %v3126_v2, 4  ;;  %2905 = vmatmul.bf16.gmra.mxu2 %v6176_v6  ;;  %2994 = vmatmul.bf16.gmra.mxu3 %v7244_v13 }
 0x471   : > { %4339 = vst [vmem:[%s6806_s3 + $0xe4] sm:$0xf] %v3428_v17 }
 0x472   : > { %v2590_v51 = vpop.f32.mrf.mxu2  ;;  %v2679_v63 = vpop.f32.mrf.mxu3 }
 0x473   : > { %v2680_v9 = vadd.f32 %v2679_v63, %v2590_v51  ;;  %v2414_v12 = vpop.f32.mrf.mxu0  ;;  %v2503_v14 = vpop.f32.mrf.mxu1 }
 0x474   : > { %v2504_v24 = vadd.f32 %v2503_v14, %v2414_v12 }
 0x475   : > { %v3129_v48 = vpack.c.bf16 %v2680_v9, %v2502_v21 }
 0x476   : > { %v4637_v41 = vpack.c.bf16 %v2504_v24, %v2502_v21 }
 0x477   : > { %v3429_v61 = vrot.slane %v3129_v48, 4 }
 0x478   : > { %4756 = vst [vmem:[%s6806_s3 + $0x68] sm:$0xff] %v4637_v41  }
 0x479   : > { %4340 = vst [vmem:[%s6806_s3 + $0xe8] sm:$0xf] %v3429_v61 }
 0x47a   : > { %v2592_v19 = vpop.f32.mrf.mxu2  ;;  %v2681_v23 = vpop.f32.mrf.mxu3 }
 0x47b   : > { %v2682_v3 = vadd.f32 %v2681_v23, %v2592_v19  ;;  %v2417_v6 = vpop.f32.mrf.mxu0  ;;  %v2506_v55 = vpop.f32.mrf.mxu1 }
 0x47c   : > { %v2507_v28 = vadd.f32 %v2506_v55, %v2417_v6 }
 0x47d   : > { %v3132_v13 = vpack.c.bf16 %v2682_v3, %v2504_v24 }
 0x47e   : > { %2732 = vmatmul.bf16.gmra.mxu0 %v7245_v29  ;;  %2821 = vmatmul.bf16.gmra.mxu1 %v7246_v56 }
 0x47f   : > { %v3430_v31 = vrot.slane %v3132_v13, 4  ;;  %2910 = vmatmul.bf16.gmra.mxu2 %v7245_v29  ;;  %2999 = vmatmul.bf16.gmra.mxu3 %v7246_v56 }
 0x481   : > { %4341 = vst [vmem:[%s6806_s3 + $0xec] sm:$0xf] %v3430_v31 }
 0x482   : > { %v2595_v45 = vpop.f32.mrf.mxu2  ;;  %v2684_v40 = vpop.f32.mrf.mxu3 }
 0x483   : > { %v2685_v39 = vadd.f32 %v2684_v40, %v2595_v45  ;;  %v2419_v62 = vpop.f32.mrf.mxu0  ;;  %v2508_v42 = vpop.f32.mrf.mxu1 }
 0x484   : > { %v2509_v50 = vadd.f32 %v2508_v42, %v2419_v62 }
 0x485   : > { %v3135_v32 = vpack.c.bf16 %v2685_v39, %v2507_v28 }
 0x486   : > { %v4642_v58 = vpack.c.bf16 %v2509_v50, %v2507_v28 }
 0x487   : > { %v3431_v11 = vrot.slane %v3135_v32, 4 }
 0x488   : > { %4757 = vst [vmem:[%s6806_s3 + $0x70] sm:$0xff] %v4642_v58  }
 0x489   : > { %4342 = vst [vmem:[%s6806_s3 + $0xf0] sm:$0xf] %v3431_v11 }
 0x48a   : > { %v2597_v30 = vpop.f32.mrf.mxu2  ;;  %v2686_v18 = vpop.f32.mrf.mxu3 }
 0x48b   : > { %v2687_v25 = vadd.f32 %v2686_v18, %v2597_v30  ;;  %v2422_v29 = vpop.f32.mrf.mxu0  ;;  %v2511_v1 = vpop.f32.mrf.mxu1 }
 0x48c   : > { %v2512_v44 = vadd.f32 %v2511_v1, %v2422_v29 }
 0x48d   : > { %v3138_v56 = vpack.c.bf16 %v2687_v25, %v2509_v50 }
 0x48e   : > { %2737 = vmatmul.bf16.gmra.mxu0 %v6368_v5  ;;  %2826 = vmatmul.bf16.gmra.mxu1 %v7247_v37 }
 0x48f   : > { %v3432_v27 = vrot.slane %v3138_v56, 4  ;;  %2915 = vmatmul.bf16.gmra.mxu2 %v6368_v5  ;;  %3004 = vmatmul.bf16.gmra.mxu3 %v7247_v37 }
 0x491   : > { %4343 = vst [vmem:[%s6806_s3 + $0xf4] sm:$0xf] %v3432_v27 }
 0x492   : > { %v2600_v57 = vpop.f32.mrf.mxu2  ;;  %v2689_v49 = vpop.f32.mrf.mxu3 }
 0x493   : > { %v2690_v59 = vadd.f32 %v2689_v49, %v2600_v57  ;;  %v2424_v38 = vpop.f32.mrf.mxu0  ;;  %v2513_v16 = vpop.f32.mrf.mxu1 }
 0x494   : > { %v2514_v60 = vadd.f32 %v2513_v16, %v2424_v38 }
 0x495   : > { %v3141_v4 = vpack.c.bf16 %v2690_v59, %v2512_v44 }
 0x496   : > { %v4647_v15 = vpack.c.bf16 %v2514_v60, %v2512_v44 }
 0x497   : > { %v3433_v8 = vrot.slane %v3141_v4, 4 }
 0x498   : > { %4758 = vst [vmem:[%s6806_s3 + $0x78] sm:$0xff] %v4647_v15  }
 0x499   : > { %4344 = vst [vmem:[%s6806_s3 + $0xf8] sm:$0xf] %v3433_v8 }
 0x49a   : > { %v2602_v2 = vpop.f32.mrf.mxu2  ;;  %v2691_v17 = vpop.f32.mrf.mxu3 }
 0x49b   : > { %v2692_v51 = vadd.f32 %v2691_v17, %v2602_v2  ;;  %v2703_v5 = vpop.f32.mrf.mxu0  ;;  %v2792_v63 = vpop.f32.mrf.mxu1 }
 0x49c   : > { %v2793_v14 = vadd.f32 %v2792_v63, %v2703_v5 }
 0x49d   : > { %v3144_v37 = vpack.c.bf16 %v2692_v51, %v2514_v60 }
 0x49e   : > { %2742 = vmatmul.bf16.gmra.mxu0 %v7248_v46  ;;  %2831 = vmatmul.bf16.gmra.mxu1 %v7249_v7 }
 0x49f   : > { %v3434_v21 = vrot.slane %v3144_v37, 4  ;;  %2920 = vmatmul.bf16.gmra.mxu2 %v7248_v46  ;;  %3009 = vmatmul.bf16.gmra.mxu3 %v7249_v7 }
 0x4a1   : > { %4345 = vst [vmem:[%s6806_s3 + $0xfc] sm:$0xf] %v3434_v21 }
 0x4a2   : > { %v2881_v9 = vpop.f32.mrf.mxu2  ;;  %v2970_v12 = vpop.f32.mrf.mxu3 }
 0x4a3   : > { %v2971_v24 = vadd.f32 %v2970_v12, %v2881_v9  ;;  %v2705_v48 = vpop.f32.mrf.mxu0  ;;  %v2794_v41 = vpop.f32.mrf.mxu1 }
 0x4a4   : > { %v2795_v61 = vadd.f32 %v2794_v41, %v2705_v48 }
 0x4a5   : > { %v3052_v19 = vpack.c.bf16 %v2971_v24, %v2793_v14 }
 0x4a6   : > { %v4652_v23 = vpack.c.bf16 %v2795_v61, %v2793_v14 }
 0x4a7   : > { %v3532_v3 = vrot.slane %v3052_v19, 4 }
 0x4a8   : > { %4653 = vst [vmem:[%s6921_s28] sm:$0xff] %v4652_v23  }
 0x4a9   : > { %4346 = vst [vmem:[%s6921_s28 + $0x80] sm:$0xf] %v3532_v3 }
 0x4aa   : > { %v2883_v46 = vpop.f32.mrf.mxu2  ;;  %v2972_v7 = vpop.f32.mrf.mxu3 }
 0x4ab   : > { %v2973_v6 = vadd.f32 %v2972_v7, %v2883_v46  ;;  %v2708_v55 = vpop.f32.mrf.mxu0  ;;  %v2797_v13 = vpop.f32.mrf.mxu1 }
 0x4ac   : > { %v2798_v39 = vadd.f32 %v2797_v13, %v2708_v55 }
 0x4ad   : > { %v3055_v31 = vpack.c.bf16 %v2973_v6, %v2795_v61 }
 0x4ae   : > { %2747 = vmatmul.bf16.gmra.mxu0 %v7250_v36  ;;  %2836 = vmatmul.bf16.gmra.mxu1 %v7251_v33 }
 0x4af   : > { %v3533_v45 = vrot.slane %v3055_v31, 4  ;;  %2925 = vmatmul.bf16.gmra.mxu2 %v7250_v36  ;;  %3014 = vmatmul.bf16.gmra.mxu3 %v7251_v33 }
 0x4b1   : > { %4347 = vst [vmem:[%s6921_s28 + $0x84] sm:$0xf] %v3533_v45 }
 0x4b2   : > { %v2886_v40 = vpop.f32.mrf.mxu2  ;;  %v2975_v28 = vpop.f32.mrf.mxu3 }
 0x4b3   : > { %v2976_v62 = vadd.f32 %v2975_v28, %v2886_v40  ;;  %v2710_v42 = vpop.f32.mrf.mxu0  ;;  %v2799_v50 = vpop.f32.mrf.mxu1 }
 0x4b4   : > { %v2800_v32 = vadd.f32 %v2799_v50, %v2710_v42 }
 0x4b5   : > { %v3058_v58 = vpack.c.bf16 %v2976_v62, %v2798_v39 }
 0x4b6   : > { %v4657_v11 = vpack.c.bf16 %v2800_v32, %v2798_v39 }
 0x4b7   : > { %v3534_v30 = vrot.slane %v3058_v58, 4 }
 0x4b8   : > { %4759 = vst [vmem:[%s6921_s28 + $0x8] sm:$0xff] %v4657_v11  }
 0x4b9   : > { %4348 = vst [vmem:[%s6921_s28 + $0x88] sm:$0xf] %v3534_v30 }
 0x4ba   : > { %v2888_v18 = vpop.f32.mrf.mxu2  ;;  %v2977_v25 = vpop.f32.mrf.mxu3 }
 0x4bb   : > { %v2978_v29 = vadd.f32 %v2977_v25, %v2888_v18  ;;  %v2713_v36 = vpop.f32.mrf.mxu0  ;;  %v2802_v1 = vpop.f32.mrf.mxu1 }
 0x4bc   : > { %v2803_v49 = vadd.f32 %v2802_v1, %v2713_v36 }
 0x4bd   : > { %v3061_v33 = vpack.c.bf16 %v2978_v29, %v2800_v32 }
 0x4be   : > { %2752 = vmatmul.bf16.gmra.mxu0 %v6579_v20  ;;  %2841 = vmatmul.bf16.gmra.mxu1 %v6581_v54 }
 0x4bf   : > { %v3535_v56 = vrot.slane %v3061_v33, 4  ;;  %2930 = vmatmul.bf16.gmra.mxu2 %v6579_v20  ;;  %3019 = vmatmul.bf16.gmra.mxu3 %v6581_v54 }
 0x4c1   : > { %4349 = vst [vmem:[%s6921_s28 + $0x8c] sm:$0xf] %v3535_v56 }
 0x4c2   : > { %v2891_v27 = vpop.f32.mrf.mxu2  ;;  %v2980_v57 = vpop.f32.mrf.mxu3 }
 0x4c3   : > { %v2981_v44 = vadd.f32 %v2980_v57, %v2891_v27  ;;  %v2715_v59 = vpop.f32.mrf.mxu0  ;;  %v2804_v38 = vpop.f32.mrf.mxu1 }
 0x4c4   : > { %v2805_v16 = vadd.f32 %v2804_v38, %v2715_v59 }
 0x4c5   : > { %v3064_v60 = vpack.c.bf16 %v2981_v44, %v2803_v49 }
 0x4c6   : > { %v4662_v4 = vpack.c.bf16 %v2805_v16, %v2803_v49 }
 0x4c7   : > { %v3536_v15 = vrot.slane %v3064_v60, 4 }
 0x4c8   : > { %4760 = vst [vmem:[%s6921_s28 + $0x10] sm:$0xff] %v4662_v4  }
 0x4c9   : > { %4350 = vst [vmem:[%s6921_s28 + $0x90] sm:$0xf] %v3536_v15 }
 0x4ca   : > { %v2893_v8 = vpop.f32.mrf.mxu2  ;;  %v2982_v2 = vpop.f32.mrf.mxu3 }
 0x4cb   : > { %v2983_v17 = vadd.f32 %v2982_v2, %v2893_v8  ;;  %v2718_v20 = vpop.f32.mrf.mxu0  ;;  %v2807_v51 = vpop.f32.mrf.mxu1 }
 0x4cc   : > { %v2808_v21 = vadd.f32 %v2807_v51, %v2718_v20 }
 0x4cd   : > { %v3067_v54 = vpack.c.bf16 %v2983_v17, %v2805_v16 }
 0x4ce   : > { %2757 = vmatmul.bf16.gmra.mxu0 %v6634_v0  ;;  %2846 = vmatmul.bf16.gmra.mxu1 %v6636_v22 }
 0x4cf   : > { %v3537_v5 = vrot.slane %v3067_v54, 4  ;;  %2935 = vmatmul.bf16.gmra.mxu2 %v6634_v0  ;;  %3024 = vmatmul.bf16.gmra.mxu3 %v6636_v22 }
 0x4d1   : > { %4351 = vst [vmem:[%s6921_s28 + $0x94] sm:$0xf] %v3537_v5 }
 0x4d2   : > { %v2896_v63 = vpop.f32.mrf.mxu2  ;;  %v2985_v37 = vpop.f32.mrf.mxu3 }
 0x4d3   : > { %v2986_v9 = vadd.f32 %v2985_v37, %v2896_v63  ;;  %v2720_v12 = vpop.f32.mrf.mxu0  ;;  %v2809_v14 = vpop.f32.mrf.mxu1 }
 0x4d4   : > { %v2810_v24 = vadd.f32 %v2809_v14, %v2720_v12 }
 0x4d5   : > { %v3070_v48 = vpack.c.bf16 %v2986_v9, %v2808_v21 }
 0x4d6   : > { %v4667_v41 = vpack.c.bf16 %v2810_v24, %v2808_v21 }
 0x4d7   : > { %v3538_v61 = vrot.slane %v3070_v48, 4 }
 0x4d8   : > { %4761 = vst [vmem:[%s6921_s28 + $0x18] sm:$0xff] %v4667_v41  }
 0x4d9   : > { %4352 = vst [vmem:[%s6921_s28 + $0x98] sm:$0xf] %v3538_v61 }
 0x4da   : > { %v2898_v19 = vpop.f32.mrf.mxu2  ;;  %v2987_v23 = vpop.f32.mrf.mxu3 }
 0x4db   : > { %v2988_v3 = vadd.f32 %v2987_v23, %v2898_v19  ;;  %v2723_v0 = vpop.f32.mrf.mxu0  ;;  %v2812_v46 = vpop.f32.mrf.mxu1 }
 0x4dc   : > { %v2813_v13 = vadd.f32 %v2812_v46, %v2723_v0 }
 0x4dd   : > { %v3073_v22 = vpack.c.bf16 %v2988_v3, %v2810_v24 }
 0x4de   : > { %2762 = vmatmul.bf16.gmra.mxu0 %v6671_v34  ;;  %2851 = vmatmul.bf16.gmra.mxu1 %v6673_v47 }
 0x4df   : > { %v3539_v7 = vrot.slane %v3073_v22, 4  ;;  %2940 = vmatmul.bf16.gmra.mxu2 %v6671_v34  ;;  %3029 = vmatmul.bf16.gmra.mxu3 %v6673_v47 }
 0x4e1   : > { %4353 = vst [vmem:[%s6921_s28 + $0x9c] sm:$0xf] %v3539_v7 }
 0x4e2   : > { %v2901_v6 = vpop.f32.mrf.mxu2  ;;  %v2990_v55 = vpop.f32.mrf.mxu3 }
 0x4e3   : > { %v2991_v31 = vadd.f32 %v2990_v55, %v2901_v6  ;;  %v2725_v45 = vpop.f32.mrf.mxu0  ;;  %v2814_v40 = vpop.f32.mrf.mxu1 }
 0x4e4   : > { %v2815_v28 = vadd.f32 %v2814_v40, %v2725_v45 }
 0x4e5   : > { %v3076_v39 = vpack.c.bf16 %v2991_v31, %v2813_v13 }
 0x4e6   : > { %v4672_v62 = vpack.c.bf16 %v2815_v28, %v2813_v13 }
 0x4e7   : > { %v3540_v42 = vrot.slane %v3076_v39, 4 }
 0x4e8   : > { %4762 = vst [vmem:[%s6921_s28 + $0x20] sm:$0xff] %v4672_v62  }
 0x4e9   : > { %4354 = vst [vmem:[%s6921_s28 + $0xa0] sm:$0xf] %v3540_v42 }
 0x4ea   : > { %v2903_v50 = vpop.f32.mrf.mxu2  ;;  %v2992_v32 = vpop.f32.mrf.mxu3 }
 0x4eb   : > { %v2993_v58 = vadd.f32 %v2992_v32, %v2903_v50  ;;  %v2728_v34 = vpop.f32.mrf.mxu0  ;;  %v2817_v11 = vpop.f32.mrf.mxu1 }
 0x4ec   : > { %v2818_v29 = vadd.f32 %v2817_v11, %v2728_v34 }
 0x4ed   : > { %v3079_v47 = vpack.c.bf16 %v2993_v58, %v2815_v28 }
 0x4ee   : > { %2767 = vmatmul.bf16.gmra.mxu0 %v6696_v53  ;;  %2856 = vmatmul.bf16.gmra.mxu1 %v6698_v35 }
 0x4ef   : > { %v3541_v30 = vrot.slane %v3079_v47, 4  ;;  %2945 = vmatmul.bf16.gmra.mxu2 %v6696_v53  ;;  %3034 = vmatmul.bf16.gmra.mxu3 %v6698_v35 }
 0x4f1   : > { %4355 = vst [vmem:[%s6921_s28 + $0xa4] sm:$0xf] %v3541_v30 }
 0x4f2   : > { %v2906_v18 = vpop.f32.mrf.mxu2  ;;  %v2995_v25 = vpop.f32.mrf.mxu3 }
 0x4f3   : > { %v2996_v36 = vadd.f32 %v2995_v25, %v2906_v18  ;;  %v2730_v1 = vpop.f32.mrf.mxu0  ;;  %v2819_v33 = vpop.f32.mrf.mxu1 }
 0x4f4   : > { %v2820_v56 = vadd.f32 %v2819_v33, %v2730_v1 }
 0x4f5   : > { %v3082_v27 = vpack.c.bf16 %v2996_v36, %v2818_v29 }
 0x4f6   : > { %v4677_v57 = vpack.c.bf16 %v2820_v56, %v2818_v29 }
 0x4f7   : > { %v3542_v49 = vrot.slane %v3082_v27, 4 }
 0x4f8   : > { %4763 = vst [vmem:[%s6921_s28 + $0x28] sm:$0xff] %v4677_v57  }
 0x4f9   : > { %4356 = vst [vmem:[%s6921_s28 + $0xa8] sm:$0xf] %v3542_v49 }
 0x4fa   : > { %v2908_v44 = vpop.f32.mrf.mxu2  ;;  %v2997_v59 = vpop.f32.mrf.mxu3 }
 0x4fb   : > { %v2998_v38 = vadd.f32 %v2997_v59, %v2908_v44  ;;  %v2733_v53 = vpop.f32.mrf.mxu0  ;;  %v2822_v16 = vpop.f32.mrf.mxu1 }
 0x4fc   : > { %v2823_v8 = vadd.f32 %v2822_v16, %v2733_v53 }
 0x4fd   : > { %v3085_v35 = vpack.c.bf16 %v2998_v38, %v2820_v56 }
 0x4fe   : > { %2772 = vmatmul.bf16.gmra.mxu0 %v6718_v52  ;;  %2861 = vmatmul.bf16.gmra.mxu1 %v6720_v43 }
 0x4ff   : > { %v3543_v60 = vrot.slane %v3085_v35, 4  ;;  %2950 = vmatmul.bf16.gmra.mxu2 %v6718_v52  ;;  %3039 = vmatmul.bf16.gmra.mxu3 %v6720_v43 }
 0x501   : > { %4357 = vst [vmem:[%s6921_s28 + $0xac] sm:$0xf] %v3543_v60 }
 0x502   : > { %v2911_v4 = vpop.f32.mrf.mxu2  ;;  %v3000_v15 = vpop.f32.mrf.mxu3 }
 0x503   : > { %v3001_v2 = vadd.f32 %v3000_v15, %v2911_v4  ;;  %v2735_v17 = vpop.f32.mrf.mxu0  ;;  %v2824_v20 = vpop.f32.mrf.mxu1 }
 0x504   : > { %v2825_v51 = vadd.f32 %v2824_v20, %v2735_v17 }
 0x505   : > { %v3088_v54 = vpack.c.bf16 %v3001_v2, %v2823_v8 }
 0x506   : > { %v4682_v5 = vpack.c.bf16 %v2825_v51, %v2823_v8 }
 0x507   : > { %v3544_v63 = vrot.slane %v3088_v54, 4 }
 0x508   : > { %4764 = vst [vmem:[%s6921_s28 + $0x30] sm:$0xff] %v4682_v5  }
 0x509   : > { %4358 = vst [vmem:[%s6921_s28 + $0xb0] sm:$0xf] %v3544_v63 }
 0x50a   : > { %v2913_v37 = vpop.f32.mrf.mxu2  ;;  %v3002_v21 = vpop.f32.mrf.mxu3 }
 0x50b   : > { %v3003_v9 = vadd.f32 %v3002_v21, %v2913_v37  ;;  %v2738_v52 = vpop.f32.mrf.mxu0  ;;  %v2827_v12 = vpop.f32.mrf.mxu1 }
 0x50c   : > { %v2828_v41 = vadd.f32 %v2827_v12, %v2738_v52 }
 0x50d   : > { %v3091_v43 = vpack.c.bf16 %v3003_v9, %v2825_v51 }
 0x50e   : > { %2777 = vmatmul.bf16.gmra.mxu0 %v6744_v26  ;;  %2866 = vmatmul.bf16.gmra.mxu1 %v6746_v10 }
 0x50f   : > { %v3545_v14 = vrot.slane %v3091_v43, 4  ;;  %2955 = vmatmul.bf16.gmra.mxu2 %v6744_v26  ;;  %3044 = vmatmul.bf16.gmra.mxu3 %v6746_v10 }
 0x511   : > { %4359 = vst [vmem:[%s6921_s28 + $0xb4] sm:$0xf] %v3545_v14 }
 0x512   : > { %v2916_v24 = vpop.f32.mrf.mxu2  ;;  %v3005_v48 = vpop.f32.mrf.mxu3 }
 0x513   : > { %v3006_v61 = vadd.f32 %v3005_v48, %v2916_v24  ;;  %v2740_v19 = vpop.f32.mrf.mxu0  ;;  %v2829_v23 = vpop.f32.mrf.mxu1 }
 0x514   : > { %v2830_v3 = vadd.f32 %v2829_v23, %v2740_v19 }
 0x515   : > { %v3094_v0 = vpack.c.bf16 %v3006_v61, %v2828_v41 }
 0x516   : > { %v4687_v46 = vpack.c.bf16 %v2830_v3, %v2828_v41 }
 0x517   : > { %v3546_v22 = vrot.slane %v3094_v0, 4 }
 0x518   : > { %4765 = vst [vmem:[%s6921_s28 + $0x38] sm:$0xff] %v4687_v46  }
 0x519   : > { %4360 = vst [vmem:[%s6921_s28 + $0xb8] sm:$0xf] %v3546_v22 }
 0x51a   : > { %v2918_v7 = vpop.f32.mrf.mxu2  ;;  %v3007_v26 = vpop.f32.mrf.mxu3 }
 0x51b   : > { %v3008_v10 = vadd.f32 %v3007_v26, %v2918_v7  ;;  %v2743_v6 = vpop.f32.mrf.mxu0  ;;  %v2832_v55 = vpop.f32.mrf.mxu1 }
 0x51c   : > { %v2833_v28 = vadd.f32 %v2832_v55, %v2743_v6 }
 0x51d   : > { %v3097_v13 = vpack.c.bf16 %v3008_v10, %v2830_v3 }
 0x51f   : > { %v3547_v31 = vrot.slane %v3097_v13, 4 }
 0x521   : > { %4361 = vst [vmem:[%s6921_s28 + $0xbc] sm:$0xf] %v3547_v31 }
 0x522   : > { %v2921_v45 = vpop.f32.mrf.mxu2  ;;  %v3010_v40 = vpop.f32.mrf.mxu3 }
 0x523   : > { %v3011_v39 = vadd.f32 %v3010_v40, %v2921_v45  ;;  %v2745_v62 = vpop.f32.mrf.mxu0  ;;  %v2834_v42 = vpop.f32.mrf.mxu1 }
 0x524   : > { %v2835_v50 = vadd.f32 %v2834_v42, %v2745_v62 }
 0x525   : > { %v3100_v32 = vpack.c.bf16 %v3011_v39, %v2833_v28 }
 0x526   : > { %5097 = shalt.err (!%p5094_p0)
}
 0x527   : > { %s5230_s3 = smov 64   ;;  %s5231_s10 = smov 4   ;;  %v4692_v58 = vpack.c.bf16 %v2835_v50, %v2833_v28  ;;  %v3548_v34 = vrot.slane %v3100_v32, 4 }
 0x528   : > { %4789 = dma.vmem_to_hbm [thread:$0]  (%p5354_p3), %s3674_s8, 4096, %s3676_s11, %s6984_s24, %s5230_s3, %s5230_s3, %s5231_s10  }
 0x529   : > { %s3653_s15 = scalar_lea.hbm %s7091_s4, %s6975_s29  ;;  %4766 = vst [vmem:[%s6921_s28 + $0x40] sm:$0xff] %v4692_v58   ;;  %s3654_s13 = sshll.u32 %s6107_s2, 4  ;;  %s3655_s13 = int_to_ptr.vmem [resolvable:$true] %s3654_s13 }
 0x52a   : > { %4362 = vst [vmem:[%s6921_s28 + $0xc0] sm:$0xf] %v3548_v34  ;;  %s3656_s14 = sshll.u32 %s3653_s15, 4  ;;  %v2923_v11 = vpop.f32.mrf.mxu2  ;;  %v3012_v47 = vpop.f32.mrf.mxu3  ;;  %s3630_s27 = scalar_lea.sflag [#allocation4], %s5382_s17  ;;  %s3657_s14 = int_to_ptr.hbm [resolvable:$true] %s3656_s14 }
 0x52b   : > { %v3013_v30 = vadd.f32 %v3012_v47, %v2923_v11  ;;  %v2748_v18 = vpop.f32.mrf.mxu0  ;;  %v2837_v25 = vpop.f32.mrf.mxu1  ;;  %s5112_s8 = sshra.s32 %s3657_s14, 4  ;;  %s5118_s2 = scalar_lea.hbm %s7091_s4, 512  ;;  %s5113_s8 = int_to_ptr.hbm [resolvable:$true] %s5112_s8 }
 0x52c   : > { %s5114_s11 = scalar_lea.hbm %s5113_s8, 256  ;;  %p5119_p2 = scmp.lt.s32.totalorder %s5113_s8, %s7091_s4 }
 0x52d   : > { %p5115_p5 = scmp.ne.s32.totalorder %s5113_s8, %s5114_s11  ;;  %p5120_p1 = scmp.lt.s32.totalorder %s5118_s2, %s5114_s11 }
 0x52f   : > { %p5116_p7 = pnand %p5115_p5, %p5354_p3  ;;  %p5121_p4 = por %p5120_p1, %p5119_p2 }
 0x531   : > { %p5117_p10 = pneg %p5116_p7 }
 0x533   : > { %p5122_p8 = pnand %p5121_p4, %p5117_p10 }
 0x535   : > { %5125 = shalt.err (!%p5122_p8)
}
 0x536   : > { %4788 = dma.vmem_to_hbm [thread:$0]  (%p5354_p3), %s3655_s13, 4096, %s3657_s14, %s3630_s27, %s5230_s3, %s5230_s3, %s5231_s10   ;;  %v3103_v29 = vpack.c.bf16 %v3013_v30, %v2835_v50  ;;  %v2926_v1 = vpop.f32.mrf.mxu2  ;;  %v3015_v33 = vpop.f32.mrf.mxu3  ;;  %v2838_v56 = vadd.f32 %v2837_v25, %v2748_v18 }
 0x537   : > { %v3016_v27 = vadd.f32 %v3015_v33, %v2926_v1  ;;  %v2750_v57 = vpop.f32.mrf.mxu0  ;;  %v2839_v49 = vpop.f32.mrf.mxu1  ;;  %s3691_s12 = scalar_lea.hbm %s7093_s6, %s6975_s29  ;;  %s3692_s13 = sshll.u32 %s6921_s28, 4  ;;  %s3693_s13 = int_to_ptr.vmem [resolvable:$true] %s3692_s13 }
 0x538   : > { %v3549_v36 = vrot.slane %v3103_v29, 4  ;;  %v2840_v44 = vadd.f32 %v2839_v49, %v2750_v57  ;;  %s3694_s15 = sshll.u32 %s3691_s12, 4  ;;  %s5146_s29 = scalar_lea.hbm %s7093_s6, 512  ;;  %s3695_s15 = int_to_ptr.hbm [resolvable:$true] %s3694_s15 }
 0x539   : > { %v3106_v59 = vpack.c.bf16 %v3016_v27, %v2838_v56  ;;  %s5140_s14 = sshra.s32 %s3695_s15, 4  ;;  %s5141_s14 = int_to_ptr.hbm [resolvable:$true] %s5140_s14 }
 0x53a   : > { %4363 = vst [vmem:[%s6921_s28 + $0xc4] sm:$0xf] %v3549_v36  ;;  %v4697_v38 = vpack.c.bf16 %v2840_v44, %v2838_v56  ;;  %s5142_s27 = scalar_lea.hbm %s5141_s14, 256  ;;  %p5147_p0 = scmp.lt.s32.totalorder %s5141_s14, %s7093_s6 }
 0x53b   : > { %v3550_v53 = vrot.slane %v3106_v59, 4  ;;  %p5143_p11 = scmp.ne.s32.totalorder %s5141_s14, %s5142_s27  ;;  %p5148_p5 = scmp.lt.s32.totalorder %s5146_s29, %s5142_s27 }
 0x53c   : > { %4767 = vst [vmem:[%s6921_s28 + $0x48] sm:$0xff] %v4697_v38  }
 0x53d   : > { %4364 = vst [vmem:[%s6921_s28 + $0xc8] sm:$0xf] %v3550_v53  ;;  %p5144_p12 = pnand %p5143_p11, %p5354_p3  ;;  %p5149_p7 = por %p5148_p5, %p5147_p0 }
 0x53e   : > { %v2928_v16 = vpop.f32.mrf.mxu2  ;;  %v3017_v35 = vpop.f32.mrf.mxu3 }
 0x53f   : > { %v3018_v60 = vadd.f32 %v3017_v35, %v2928_v16  ;;  %v2753_v4 = vpop.f32.mrf.mxu0  ;;  %v2842_v15 = vpop.f32.mrf.mxu1  ;;  %p5145_p13 = pneg %p5144_p12 }
 0x540   : > { %v2843_v51 = vadd.f32 %v2842_v15, %v2753_v4 }
 0x541   : > { %v3109_v8 = vpack.c.bf16 %v3018_v60, %v2840_v44  ;;  %p5150_p10 = pnand %p5149_p7, %p5145_p13 }
 0x543   : > { %v3551_v2 = vrot.slane %v3109_v8, 4 }
 0x545   : > { %4365 = vst [vmem:[%s6921_s28 + $0xcc] sm:$0xf] %v3551_v2 }
 0x546   : > { %v2931_v17 = vpop.f32.mrf.mxu2  ;;  %v3020_v20 = vpop.f32.mrf.mxu3 }
 0x547   : > { %v3021_v54 = vadd.f32 %v3020_v20, %v2931_v17  ;;  %v2755_v5 = vpop.f32.mrf.mxu0  ;;  %v2844_v63 = vpop.f32.mrf.mxu1 }
 0x548   : > { %v2845_v37 = vadd.f32 %v2844_v63, %v2755_v5 }
 0x549   : > { %v3112_v21 = vpack.c.bf16 %v3021_v54, %v2843_v51 }
 0x54a   : > { %v4702_v9 = vpack.c.bf16 %v2845_v37, %v2843_v51 }
 0x54b   : > { %v3552_v52 = vrot.slane %v3112_v21, 4 }
 0x54c   : > { %4768 = vst [vmem:[%s6921_s28 + $0x50] sm:$0xff] %v4702_v9  }
 0x54d   : > { %4366 = vst [vmem:[%s6921_s28 + $0xd0] sm:$0xf] %v3552_v52 }
 0x54e   : > { %v2933_v12 = vpop.f32.mrf.mxu2  ;;  %v3022_v43 = vpop.f32.mrf.mxu3 }
 0x54f   : > { %v3023_v14 = vadd.f32 %v3022_v43, %v2933_v12  ;;  %v2758_v24 = vpop.f32.mrf.mxu0  ;;  %v2847_v48 = vpop.f32.mrf.mxu1 }
 0x550   : > { %v2848_v3 = vadd.f32 %v2847_v48, %v2758_v24 }
 0x551   : > { %v3115_v41 = vpack.c.bf16 %v3023_v14, %v2845_v37 }
 0x553   : > { %v3553_v61 = vrot.slane %v3115_v41, 4 }
 0x555   : > { %4367 = vst [vmem:[%s6921_s28 + $0xd4] sm:$0xf] %v3553_v61 }
 0x556   : > { %v2936_v19 = vpop.f32.mrf.mxu2  ;;  %v3025_v23 = vpop.f32.mrf.mxu3 }
 0x557   : > { %v3026_v0 = vadd.f32 %v3025_v23, %v2936_v19  ;;  %v2760_v46 = vpop.f32.mrf.mxu0  ;;  %v2849_v22 = vpop.f32.mrf.mxu1 }
 0x558   : > { %v2850_v7 = vadd.f32 %v2849_v22, %v2760_v46 }
 0x559   : > { %v3118_v26 = vpack.c.bf16 %v3026_v0, %v2848_v3 }
 0x55a   : > { %v4707_v10 = vpack.c.bf16 %v2850_v7, %v2848_v3 }
 0x55b   : > { %v3554_v6 = vrot.slane %v3118_v26, 4 }
 0x55c   : > { %4769 = vst [vmem:[%s6921_s28 + $0x58] sm:$0xff] %v4707_v10  }
 0x55d   : > { %4368 = vst [vmem:[%s6921_s28 + $0xd8] sm:$0xf] %v3554_v6 }
 0x55e   : > { %v2938_v55 = vpop.f32.mrf.mxu2  ;;  %v3027_v13 = vpop.f32.mrf.mxu3 }
 0x55f   : > { %v3028_v31 = vadd.f32 %v3027_v13, %v2938_v55  ;;  %v2763_v45 = vpop.f32.mrf.mxu0  ;;  %v2852_v40 = vpop.f32.mrf.mxu1 }
 0x560   : > { %v2853_v50 = vadd.f32 %v2852_v40, %v2763_v45 }
 0x561   : > { %v3121_v28 = vpack.c.bf16 %v3028_v31, %v2850_v7 }
 0x563   : > { %v3555_v39 = vrot.slane %v3121_v28, 4 }
 0x565   : > { %4369 = vst [vmem:[%s6921_s28 + $0xdc] sm:$0xf] %v3555_v39 }
 0x566   : > { %v2941_v62 = vpop.f32.mrf.mxu2  ;;  %v3030_v42 = vpop.f32.mrf.mxu3 }
 0x567   : > { %v3031_v32 = vadd.f32 %v3030_v42, %v2941_v62  ;;  %v2765_v58 = vpop.f32.mrf.mxu0  ;;  %v2854_v34 = vpop.f32.mrf.mxu1 }
 0x568   : > { %v2855_v11 = vadd.f32 %v2854_v34, %v2765_v58 }
 0x569   : > { %v3124_v47 = vpack.c.bf16 %v3031_v32, %v2853_v50 }
 0x56a   : > { %v4712_v30 = vpack.c.bf16 %v2855_v11, %v2853_v50 }
 0x56b   : > { %v3556_v18 = vrot.slane %v3124_v47, 4 }
 0x56c   : > { %4770 = vst [vmem:[%s6921_s28 + $0x60] sm:$0xff] %v4712_v30  }
 0x56d   : > { %4370 = vst [vmem:[%s6921_s28 + $0xe0] sm:$0xf] %v3556_v18 }
 0x56e   : > { %v2943_v25 = vpop.f32.mrf.mxu2  ;;  %v3032_v29 = vpop.f32.mrf.mxu3 }
 0x56f   : > { %v3033_v36 = vadd.f32 %v3032_v29, %v2943_v25  ;;  %v2768_v1 = vpop.f32.mrf.mxu0  ;;  %v2857_v33 = vpop.f32.mrf.mxu1 }
 0x570   : > { %v2858_v44 = vadd.f32 %v2857_v33, %v2768_v1 }
 0x571   : > { %v3127_v56 = vpack.c.bf16 %v3033_v36, %v2855_v11 }
 0x573   : > { %v3557_v27 = vrot.slane %v3127_v56, 4 }
 0x575   : > { %4371 = vst [vmem:[%s6921_s28 + $0xe4] sm:$0xf] %v3557_v27 }
 0x576   : > { %v2946_v57 = vpop.f32.mrf.mxu2  ;;  %v3035_v49 = vpop.f32.mrf.mxu3 }
 0x577   : > { %v3036_v59 = vadd.f32 %v3035_v49, %v2946_v57  ;;  %v2770_v38 = vpop.f32.mrf.mxu0  ;;  %v2859_v53 = vpop.f32.mrf.mxu1 }
 0x578   : > { %v2860_v16 = vadd.f32 %v2859_v53, %v2770_v38 }
 0x579   : > { %v3130_v35 = vpack.c.bf16 %v3036_v59, %v2858_v44 }
 0x57a   : > { %v4717_v60 = vpack.c.bf16 %v2860_v16, %v2858_v44 }
 0x57b   : > { %v3558_v4 = vrot.slane %v3130_v35, 4 }
 0x57c   : > { %4771 = vst [vmem:[%s6921_s28 + $0x68] sm:$0xff] %v4717_v60  }
 0x57d   : > { %4372 = vst [vmem:[%s6921_s28 + $0xe8] sm:$0xf] %v3558_v4 }
 0x57e   : > { %v2948_v15 = vpop.f32.mrf.mxu2  ;;  %v3037_v8 = vpop.f32.mrf.mxu3 }
 0x57f   : > { %v3038_v2 = vadd.f32 %v3037_v8, %v2948_v15  ;;  %v2773_v17 = vpop.f32.mrf.mxu0  ;;  %v2862_v20 = vpop.f32.mrf.mxu1 }
 0x580   : > { %v2863_v37 = vadd.f32 %v2862_v20, %v2773_v17 }
 0x581   : > { %v3133_v51 = vpack.c.bf16 %v3038_v2, %v2860_v16 }
 0x583   : > { %v3559_v54 = vrot.slane %v3133_v51, 4 }
 0x585   : > { %4373 = vst [vmem:[%s6921_s28 + $0xec] sm:$0xf] %v3559_v54 }
 0x586   : > { %v2951_v5 = vpop.f32.mrf.mxu2  ;;  %v3040_v63 = vpop.f32.mrf.mxu3 }
 0x587   : > { %v3041_v21 = vadd.f32 %v3040_v63, %v2951_v5  ;;  %v2775_v9 = vpop.f32.mrf.mxu0  ;;  %v2864_v52 = vpop.f32.mrf.mxu1 }
 0x588   : > { %v2865_v12 = vadd.f32 %v2864_v52, %v2775_v9 }
 0x589   : > { %v3136_v43 = vpack.c.bf16 %v3041_v21, %v2863_v37 }
 0x58a   : > { %v4722_v14 = vpack.c.bf16 %v2865_v12, %v2863_v37 }
 0x58b   : > { %v3560_v24 = vrot.slane %v3136_v43, 4 }
 0x58c   : > { %4772 = vst [vmem:[%s6921_s28 + $0x70] sm:$0xff] %v4722_v14  }
 0x58d   : > { %4374 = vst [vmem:[%s6921_s28 + $0xf0] sm:$0xf] %v3560_v24 }
 0x58e   : > { %v2953_v48 = vpop.f32.mrf.mxu2  ;;  %v3042_v41 = vpop.f32.mrf.mxu3 }
 0x58f   : > { %v3043_v61 = vadd.f32 %v3042_v41, %v2953_v48  ;;  %v2778_v19 = vpop.f32.mrf.mxu0  ;;  %v2867_v23 = vpop.f32.mrf.mxu1 }
 0x590   : > { %v2868_v7 = vadd.f32 %v2867_v23, %v2778_v19 }
 0x591   : > { %v3139_v3 = vpack.c.bf16 %v3043_v61, %v2865_v12 }
 0x593   : > { %v3561_v0 = vrot.slane %v3139_v3, 4 }
 0x595   : > { %4375 = vst [vmem:[%s6921_s28 + $0xf4] sm:$0xf] %v3561_v0 }
 0x596   : > { %v2956_v46 = vpop.f32.mrf.mxu2  ;;  %v3045_v22 = vpop.f32.mrf.mxu3 }
 0x597   : > { %v3046_v26 = vadd.f32 %v3045_v22, %v2956_v46  ;;  %v2780_v10 = vpop.f32.mrf.mxu0  ;;  %v2869_v6 = vpop.f32.mrf.mxu1 }
 0x598   : > { %v2870_v55 = vadd.f32 %v2869_v6, %v2780_v10 }
 0x599   : > { %v3142_v13 = vpack.c.bf16 %v3046_v26, %v2868_v7 }
 0x59a   : > { %v4727_v31 = vpack.c.bf16 %v2870_v55, %v2868_v7 }
 0x59b   : > { %v3562_v45 = vrot.slane %v3142_v13, 4 }
 0x59c   : > { %4773 = vst [vmem:[%s6921_s28 + $0x78] sm:$0xff] %v4727_v31  }
 0x59d   : > { %4376 = vst [vmem:[%s6921_s28 + $0xf8] sm:$0xf] %v3562_v45 }
 0x59e   : > { %v2958_v40 = vpop.f32.mrf.mxu2  ;;  %v3047_v28 = vpop.f32.mrf.mxu3 }
 0x59f   : > { %v3048_v39 = vadd.f32 %v3047_v28, %v2958_v40 }
 0x5a1   : > { %v3145_v62 = vpack.c.bf16 %v3048_v39, %v2870_v55 }
 0x5a3   : > { %v3563_v42 = vrot.slane %v3145_v62, 4 }
 0x5a5   : > { %4377 = vst [vmem:[%s6921_s28 + $0xfc] sm:$0xf] %v3563_v42 }
 0x5a6   : > { %5153 = shalt.err (!%p5150_p10)
}
 0x5a7   : > { %4790 = dma.vmem_to_hbm [thread:$0]  (%p5354_p3), %s3693_s13, 4096, %s3695_s15, %s6984_s24, %s5230_s3, %s5230_s3, %s5231_s10  }
 0x5a8 PF: > { %s3709_s28 = sand.u32 1, %s5200_s21   ;;  %p4809_p2 = pnand %p3886_p9, %p5314_p6 }
 0x5a9   : > { %s3710_s2 = scalar_lea.sflag [#allocation4], %s3709_s28 }
 0x5aa   : > { %p4810_p1 = pneg %p4809_p2 }
 0x5ac   : > { %5191 = dma.done.wait (%p4810_p1), %s3710_s2, 4096  }
 0x5ad   : > { %5193 = vsyncadd (%p4810_p1), %s3710_s2, 4294963200  ;;  %s7252_s20 = sadd.s32 4294967294, %s5220_s26  }
 0x5ae   : > { %s3719_s9 = sand.u32 1, %s7252_s20  }
 0x5af   : > { %s3720_s1 = scalar_lea.sflag [#allocation12], %s3719_s9 }
 0x5b0   : > { %5195 = dma.done.wait (%p4810_p1), %s3720_s1, 8192  }
 0x5b1   : > { %5197 = vsyncadd (%p4810_p1), %s3720_s1, 4294959104  ;;  %s28_s26 = sadd.s32 1, %s5220_s26   ;;  %s7253_s30 = sld [smem:[#allocation19_spill]] }
 0x5b2   : > { %p25_p3 = scmp.ge.s32.totalorder %s28_s26, 4   ;;  %s7254_s21 = smov %s5204_s22 }
 0x5b3   : > { %s7255_s22 = smov %s5208_s23  ;;  %s7256_s23 = smov %s5370_s7 }
 0x5b4   : > { %s7257_s24 = smov %s5216_s25  ;;  %27 = sbr.rel (!%p25_p3) target bundleno = 14 (0xe), region = 128 }
 0x5b7   : > { %s7258_s25 = smov %s7253_s30 }
 0x5b9   :  { %3736 = vsyncpa [#allocation3], 1 }
 0x5ba   :  { %3738 = vsyncpa [#allocation3 + $0x1], 1 }
 0x5bb   :  { %3739 = vsyncpa [#allocation6], 1 }
 0x5bc   :  { %3740 = vsyncpa [#allocation9], 1 }
 0x5bd   :  { %3741 = vsyncpa [#allocation4], 1 }
 0x5be   :  { %3743 = vsyncpa [#allocation4 + $0x1], 1 }
 0x5bf   :  { %3744 = vsyncpa [#allocation12], 1 }
 0x5c0   :  { %3746 = vsyncpa [#allocation12 + $0x1], 1 }

</bundles_post_ra>
